<compile_context>
chip_gen: v5e
topology: v5e:2x2
jax: 0.10.0
libtpu: 0.0.40
codegen_flags: <defaults>
</compile_context>

<pallas_src>
import functools
import math

import jax
import jax.numpy as jnp
from jax.experimental import pallas as pl
from jax.experimental.pallas import tpu as pltpu

_NEG_INF = -1e9
_LN_EPS = 1e-5
_HEAD_PAD = 128  # lane-dense packed [cls | bbox | 0-pad] head output width

_LAYER_KEYS = ("qw", "qb", "kw", "kb", "vw", "vb", "ow", "ob",
               "w1", "b1", "w2", "b2", "g1", "h1", "g2", "h2")


def _round_up(x, m):
    return -(-x // m) * m


def _layer_norm(z, g, b, eps):
    mu = jnp.mean(z, axis=-1, keepdims=True)
    var = jnp.mean((z - mu) ** 2, axis=-1, keepdims=True)
    return (z - mu) * jax.lax.rsqrt(var + eps) * g + b


def _sigmoid(z):
    # robust for large |z| (tanh form), exactly in [0, 1]
    return 0.5 * (jnp.tanh(0.5 * z) + 1.0)


def _head_block_mask(s, h):
    """Additive mask removing cross-head blocks in the head-merged (h*s, h*s) scores."""
    grp = jnp.arange(s * h, dtype=jnp.int32) // s
    same = grp[:, None] == grp[None, :]
    return jnp.where(same, 0.0, _NEG_INF).astype(jnp.float32)


# --------------------------- shared transformer layer --------------------------- #

def _transformer_layer(x, pmask, hmask, q_scr, k_scr, v_scr, ctx_scr, lw, *, nhead, eps):
    """One post-norm TransformerEncoderLayer on an (S, D) f32 activation.

    Attention is head-merged: q/k/v are staged into a head-major (H*S, dh) layout so
    scores, P@V and the output projection are each ONE MXU matmul for all heads.
    """
    (qw, qb, kw, kb, vw, vb, ow, ob,
     w1, b1, w2, b2, g1, h1g, g2, h2g) = lw
    S, D = x.shape
    H = nhead
    dh = D // H
    scale = 1.0 / math.sqrt(dh)
    xb = x.astype(jnp.bfloat16)

    q = (jnp.dot(xb, qw[...], preferred_element_type=jnp.float32) + qb[...]) * scale
    k = jnp.dot(xb, kw[...], preferred_element_type=jnp.float32) + kb[...]
    v = jnp.dot(xb, vw[...], preferred_element_type=jnp.float32) + vb[...]

    # head-major staging through VMEM scratch: (S, D) -> (H*S, dh)
    for h in range(H):
        q_scr[h * S:(h + 1) * S, :] = q[:, h * dh:(h + 1) * dh]
        k_scr[h * S:(h + 1) * S, :] = k[:, h * dh:(h + 1) * dh]
        v_scr[h * S:(h + 1) * S, :] = v[:, h * dh:(h + 1) * dh]
    qh = q_scr[...].astype(jnp.bfloat16)
    kh = k_scr[...].astype(jnp.bfloat16)
    vh = v_scr[...].astype(jnp.bfloat16)

    # all-head scores in one matmul; cross-head blocks + padded keys masked additively
    s = jax.lax.dot_general(qh, kh, (((1,), (1,)), ((), ())),
                            preferred_element_type=jnp.float32)       # (H*S, H*S)
    s = s + hmask + pmask
    m = jnp.max(s, axis=-1, keepdims=True)
    p = jnp.exp(s - m)
    p = p / jnp.sum(p, axis=-1, keepdims=True)                        # exact softmax
    ctx = jnp.dot(p.astype(jnp.bfloat16), vh,
                  preferred_element_type=jnp.float32)                 # (H*S, dh)

    # un-merge heads -> (S, D) so the out-projection is one (S,D)@(D,D) matmul
    for h in range(H):
        ctx_scr[:, h * dh:(h + 1) * dh] = ctx[h * S:(h + 1) * S, :]
    attn = (jnp.dot(ctx_scr[...].astype(jnp.bfloat16), ow[...],
                    preferred_element_type=jnp.float32) + ob[...])

    x1 = _layer_norm(x + attn, g1[...], h1g[...], eps)
    hmid = jnp.maximum(
        jnp.dot(x1.astype(jnp.bfloat16), w1[...],
                preferred_element_type=jnp.float32) + b1[...], 0.0)
    ff = jnp.dot(hmid.astype(jnp.bfloat16), w2[...],
                 preferred_element_type=jnp.float32) + b2[...]
    return _layer_norm(x1 + ff, g2[...], h2g[...], eps)


# ------------------------------- encoder stack ------------------------------- #
# grid = (batch, layer); prologue fuses fc_bbox + emb_label + enc_fc_in + relu + token.

def _encoder_kernel(bbox_ref, label_ref, pmask_ref, hmask_ref,
                    token_ref, emb_ref, fcw_ref, fcb_ref, e1_ref, e2_ref, eb_ref,
                    *rest, nhead, num_label, eps):
    lw = rest[:16]
    feat_ref = rest[16]
    carry, q_scr, k_scr, v_scr, ctx_scr = rest[17:]

    l = pl.program_id(1)
    nl = pl.num_programs(1)
    S, D = carry.shape
    n = bbox_ref.shape[1]

    @pl.when(l == 0)
    def _():
        bb = bbox_ref[0].astype(jnp.bfloat16)                               # (N, 4)
        bproj = (jnp.dot(bb, fcw_ref[...], preferred_element_type=jnp.float32)
                 + fcb_ref[...])                                            # (N, D)
        eq = (jax.lax.broadcasted_iota(jnp.int32, (n, num_label), 1)
              == label_ref[0])
        onehot = jnp.where(eq, 1.0, 0.0).astype(jnp.bfloat16)               # (N, num_label)
        lemb = jnp.dot(onehot, emb_ref[...], preferred_element_type=jnp.float32)
        x0 = (jnp.dot(bproj.astype(jnp.bfloat16), e1_ref[...],
                      preferred_element_type=jnp.float32)
              + jnp.dot(lemb.astype(jnp.bfloat16), e2_ref[...],
                        preferred_element_type=jnp.float32)
              + eb_ref[...])
        x0 = jnp.maximum(x0, 0.0)
        if S > n + 1:
            carry[...] = jnp.zeros_like(carry)
        carry[0:1, :] = token_ref[...]
        carry[1:n + 1, :] = x0

    xn = _transformer_layer(carry[...], pmask_ref[0], hmask_ref[...],
                            q_scr, k_scr, v_scr, ctx_scr, lw, nhead=nhead, eps=eps)
    carry[...] = xn

    @pl.when(l == nl - 1)
    def _():
        feat_ref[0] = xn[0:1, :]          # learned-token row is the feature


def encoder_stack(bbox, label3, pmask, hmask, params, *, nhead, eps=_LN_EPS):
    B, N, _ = bbox.shape
    D = params["token"].shape[-1]
    num_label = params["emb"].shape[0]
    L = params["enc_layers"]["qw"].shape[0]
    S = hmask.shape[0] // nhead
    dh = D // nhead

    lw = [params["enc_layers"][k] for k in _LAYER_KEYS]
    const_args = (params["token"], params["emb"], params["fcb_w"], params["fcb_b"],
                  params["enc_w1"], params["enc_w2"], params["enc_b"])

    def const_spec(a):
        return pl.BlockSpec(a.shape, lambda b, l, _n=a.ndim: (0,) * _n)

    def layer_spec(a):
        tail = a.shape[1:]
        return pl.BlockSpec((None,) + tail,
                            lambda b, l, _n=len(tail): (l,) + (0,) * _n)

    in_specs = ([pl.BlockSpec((1, N, 4), lambda b, l: (b, 0, 0)),
                 pl.BlockSpec((1, N, 1), lambda b, l: (b, 0, 0)),
                 pl.BlockSpec((1, 1, S * nhead), lambda b, l: (b, 0, 0)),
                 const_spec(hmask)]
                + [const_spec(a) for a in const_args]
                + [layer_spec(a) for a in lw])

    return pl.pallas_call(
        functools.partial(_encoder_kernel, nhead=nhead, num_label=num_label, eps=eps),
        out_shape=jax.ShapeDtypeStruct((B, 1, D), jnp.float32),
        grid=(B, L),
        in_specs=in_specs,
        out_specs=pl.BlockSpec((1, 1, D), lambda b, l: (b, 0, 0)),
        scratch_shapes=[pltpu.VMEM((S, D), jnp.float32),
                        pltpu.VMEM((nhead * S, dh), jnp.float32),
                        pltpu.VMEM((nhead * S, dh), jnp.float32),
                        pltpu.VMEM((nhead * S, dh), jnp.float32),
                        pltpu.VMEM((S, D), jnp.float32)],
        compiler_params=pltpu.CompilerParams(
            dimension_semantics=("parallel", "arbitrary"),
            vmem_limit_bytes=32 * 1024 * 1024),
    )(bbox, label3, pmask, hmask, *const_args, *lw)


# ------------------------------- decoder stack ------------------------------- #
# grid = (batch, layer); prologue fuses dec_fc_in(+relu) + fc_out_disc; epilogue fuses
# the packed [fc_out_cls | sigmoid(fc_out_bbox) | 0-pad] heads (lane-dense 128 output).

def _decoder_kernel(feat_ref, pmask_ref, hmask_ref, pos_ref,
                    d1_ref, d2_ref, db_ref, discw_ref, discb_ref, hw_ref, hb_ref,
                    *rest, nhead, num_label, eps):
    lw = rest[:16]
    disc_ref = rest[16]
    out_ref = rest[17]
    carry, q_scr, k_scr, v_scr, ctx_scr = rest[18:]

    l = pl.program_id(1)
    nl = pl.num_programs(1)

    @pl.when(l == 0)
    def _():
        f = feat_ref[0]                                                     # (1, D)
        a = (jnp.dot(f.astype(jnp.bfloat16), d1_ref[...],
                     preferred_element_type=jnp.float32) + db_ref[...])     # (1, D)
        posp = jnp.dot(pos_ref[...], d2_ref[...],
                       preferred_element_type=jnp.float32)                  # (S, D)
        carry[...] = jnp.maximum(a + posp, 0.0)
        disc_ref[0] = (jnp.sum(f * discw_ref[...], axis=-1, keepdims=True)
                       + discb_ref[...])                                    # (1, 1)

    xn = _transformer_layer(carry[...], pmask_ref[0], hmask_ref[...],
                            q_scr, k_scr, v_scr, ctx_scr, lw, nhead=nhead, eps=eps)
    carry[...] = xn

    @pl.when(l == nl - 1)
    def _():
        z = (jnp.dot(xn.astype(jnp.bfloat16), hw_ref[...],
                     preferred_element_type=jnp.float32) + hb_ref[...])     # (S, 128)
        col = jax.lax.broadcasted_iota(jnp.int32, z.shape, 1)
        is_box = jnp.logical_and(col >= num_label, col < num_label + 4)
        out_ref[0] = jnp.where(is_box, _sigmoid(z), z)


def decoder_stack(feat, pmask, hmask, pos_pad, params, *, nhead, eps=_LN_EPS):
    B, _, D = feat.shape
    num_label = params["emb"].shape[0]
    L = params["dec_layers"]["qw"].shape[0]
    S = pos_pad.shape[0]
    dh = D // nhead

    lw = [params["dec_layers"][k] for k in _LAYER_KEYS]
    const_args = (pos_pad, params["dec_w1"], params["dec_w2"], params["dec_b"],
                  params["disc_w"], params["disc_b"], params["head_w"], params["head_b"])

    def const_spec(a):
        return pl.BlockSpec(a.shape, lambda b, l, _n=a.ndim: (0,) * _n)

    def layer_spec(a):
        tail = a.shape[1:]
        return pl.BlockSpec((None,) + tail,
                            lambda b, l, _n=len(tail): (l,) + (0,) * _n)

    in_specs = ([pl.BlockSpec((1, 1, D), lambda b, l: (b, 0, 0)),
                 pl.BlockSpec((1, 1, S * nhead), lambda b, l: (b, 0, 0)),
                 const_spec(hmask)]
                + [const_spec(a) for a in const_args]
                + [layer_spec(a) for a in lw])

    return pl.pallas_call(
        functools.partial(_decoder_kernel, nhead=nhead, num_label=num_label, eps=eps),
        out_shape=(jax.ShapeDtypeStruct((B, 1, 1), jnp.float32),
                   jax.ShapeDtypeStruct((B, S, _HEAD_PAD), jnp.float32)),
        grid=(B, L),
        in_specs=in_specs,
        out_specs=(pl.BlockSpec((1, 1, 1), lambda b, l: (b, 0, 0)),
                   pl.BlockSpec((1, S, _HEAD_PAD), lambda b, l: (b, 0, 0))),
        scratch_shapes=[pltpu.VMEM((S, D), jnp.float32),
                        pltpu.VMEM((nhead * S, dh), jnp.float32),
                        pltpu.VMEM((nhead * S, dh), jnp.float32),
                        pltpu.VMEM((nhead * S, dh), jnp.float32),
                        pltpu.VMEM((S, D), jnp.float32)],
        compiler_params=pltpu.CompilerParams(
            dimension_semantics=("parallel", "arbitrary"),
            vmem_limit_bytes=32 * 1024 * 1024),
    )(feat, pmask, hmask, *const_args, *lw)


# ------------------------------ model forward ------------------------------ #

def fidnet_forward(bbox, label, padding_mask, params, *, nhead):
    B, N, _ = bbox.shape
    D = params["token"].shape[-1]
    num_label = params["emb"].shape[0]
    H = nhead

    bbox = bbox.astype(jnp.float32)
    label3 = label.reshape(B, N, 1).astype(jnp.int32)

    # ---------- encoder (TransformerWithToken): token + N positions, padded to 8 -------
    S1 = N + 1
    S1p = _round_up(S1, 8)
    mask_enc = jnp.concatenate(
        [jnp.zeros((B, 1), bool), padding_mask, jnp.ones((B, S1p - S1), bool)], axis=1)
    pmask_enc = jnp.tile(jnp.where(mask_enc, _NEG_INF, 0.0).astype(jnp.float32),
                         (1, H))[:, None, :]                      # (B, 1, H*S1p) head-major
    hmask_enc = _head_block_mask(S1p, H)
    feat = encoder_stack(bbox, label3, pmask_enc, hmask_enc, params, nhead=nhead)  # (B,1,D)

    # ------------------------------- decoder -------------------------------
    Sd = _round_up(N, 8)
    mask_dec = jnp.concatenate([padding_mask, jnp.ones((B, Sd - N), bool)], axis=1)
    pmask_dec = jnp.tile(jnp.where(mask_dec, _NEG_INF, 0.0).astype(jnp.float32),
                         (1, H))[:, None, :]
    hmask_dec = _head_block_mask(Sd, H)
    pos_pad = jnp.zeros((Sd, D), jnp.bfloat16)
    pos_pad = pos_pad.at[:N].set(params["pos_token"][:N].astype(jnp.bfloat16))

    disc, packed = decoder_stack(feat, pmask_dec, hmask_dec, pos_pad, params, nhead=nhead)

    logit_disc = disc[:, 0, 0]
    logit_cls = packed[:, :N, :num_label]
    bbox_pred = packed[:, :N, num_label:num_label + 4]
    return logit_disc, logit_cls, bbox_pred


# --------------------------------- params --------------------------------- #

def init_params(key, *, num_label, d_model, nhead, dff, num_layers, max_bbox):
    assert d_model % nhead == 0
    assert num_label + 4 <= _HEAD_PAD
    keys = iter(jax.random.split(key, 256))
    sc = 0.02

    def rnd(shape, dtype=jnp.float32):
        return (jax.random.normal(next(keys), shape, jnp.float32) * sc).astype(dtype)

    def layer_stack():
        per = []
        for _ in range(num_layers):
            per.append(dict(
                qw=rnd((d_model, d_model), jnp.bfloat16), qb=rnd((1, d_model)),
                kw=rnd((d_model, d_model), jnp.bfloat16), kb=rnd((1, d_model)),
                vw=rnd((d_model, d_model), jnp.bfloat16), vb=rnd((1, d_model)),
                ow=rnd((d_model, d_model), jnp.bfloat16), ob=rnd((1, d_model)),
                w1=rnd((d_model, dff), jnp.bfloat16), b1=rnd((1, dff)),
                w2=rnd((dff, d_model), jnp.bfloat16), b2=rnd((1, d_model)),
                g1=jnp.ones((1, d_model), jnp.float32),
                h1=jnp.zeros((1, d_model), jnp.float32),
                g2=jnp.ones((1, d_model), jnp.float32),
                h2=jnp.zeros((1, d_model), jnp.float32),
            ))
        return {k: jnp.stack([p[k] for p in per], axis=0) for k in _LAYER_KEYS}

    # packed lane-dense heads: columns [0:num_label]=fc_out_cls, [num_label:num_label+4]=fc_out_bbox
    cls_w, cls_b = rnd((d_model, num_label)), rnd((1, num_label))
    box_w, box_b = rnd((d_model, 4)), rnd((1, 4))
    head_w = jnp.zeros((d_model, _HEAD_PAD), jnp.float32)
    head_w = head_w.at[:, :num_label].set(cls_w).at[:, num_label:num_label + 4].set(box_w)
    head_b = jnp.zeros((1, _HEAD_PAD), jnp.float32)
    head_b = head_b.at[:, :num_label].set(cls_b).at[:, num_label:num_label + 4].set(box_b)

    return dict(
        emb=rnd((num_label, d_model), jnp.bfloat16),
        fcb_w=rnd((4, d_model), jnp.bfloat16), fcb_b=rnd((1, d_model)),
        enc_w1=rnd((d_model, d_model), jnp.bfloat16),
        enc_w2=rnd((d_model, d_model), jnp.bfloat16),
        enc_b=rnd((1, d_model)),
        token=jax.random.normal(next(keys), (1, d_model), jnp.float32),
        pos_token=jax.random.uniform(next(keys), (max_bbox, d_model), jnp.float32),
        dec_w1=rnd((d_model, d_model), jnp.bfloat16),
        dec_w2=rnd((d_model, d_model), jnp.bfloat16),
        dec_b=rnd((1, d_model)),
        disc_w=rnd((1, d_model)), disc_b=rnd((1, 1)),
        head_w=head_w.astype(jnp.bfloat16), head_b=head_b,
        enc_layers=layer_stack(),
        dec_layers=layer_stack(),
    )


if __name__ == "__main__":
    d_model, nhead, num_layers = 32, 4, 2
    dff = d_model // 2          # FIDNetV3 uses dim_feedforward = d_model // 2
    num_label, max_bbox = 16, 16
    B, N = 2, 8

    key = jax.random.PRNGKey(0)
    kb, kl, kp = jax.random.split(key, 3)
    bbox = jax.random.uniform(kb, (B, N, 4), jnp.float32)
    label = jax.random.randint(kl, (B, N), 0, num_label)
    padding_mask = jnp.zeros((B, N), bool).at[:, -2:].set(True)

    params = init_params(kp, num_label=num_label, d_model=d_model, nhead=nhead,
                         dff=dff, num_layers=num_layers, max_bbox=max_bbox)

    fwd = jax.jit(functools.partial(fidnet_forward, nhead=nhead))
    logit_disc, logit_cls, bbox_pred = jax.block_until_ready(
        fwd(bbox, label, padding_mask, params))

    assert logit_disc.shape == (B,), logit_disc.shape
    assert logit_cls.shape == (B, N, num_label), logit_cls.shape
    assert bbox_pred.shape == (B, N, 4), bbox_pred.shape
    assert bool(jnp.all(jnp.isfinite(logit_disc)))
    assert bool(jnp.all(jnp.isfinite(logit_cls)))
    assert bool(jnp.all(jnp.isfinite(bbox_pred)))
    assert bool(jnp.all((bbox_pred >= 0.0) & (bbox_pred <= 1.0)))
    print("KERNEL_OK")
</pallas_src>

<mosaic_0001>
module attributes {stable_mosaic.version = 11 : i64} {
  func.func @_encoder_kernel(%arg0: i32, %arg1: i32, %arg2: memref<1x8x4xf32, #tpu.memory_space<vmem>>, %arg3: memref<1x8x1xi32, #tpu.memory_space<vmem>>, %arg4: memref<1x1x64xf32, #tpu.memory_space<vmem>>, %arg5: memref<64x64xf32, #tpu.memory_space<vmem>>, %arg6: memref<1x32xf32, #tpu.memory_space<vmem>>, %arg7: memref<16x32xbf16, #tpu.memory_space<vmem>>, %arg8: memref<4x32xbf16, #tpu.memory_space<vmem>>, %arg9: memref<1x32xf32, #tpu.memory_space<vmem>>, %arg10: memref<32x32xbf16, #tpu.memory_space<vmem>>, %arg11: memref<32x32xbf16, #tpu.memory_space<vmem>>, %arg12: memref<1x32xf32, #tpu.memory_space<vmem>>, %arg13: memref<1x32x32xbf16, #tpu.memory_space<vmem>>, %arg14: memref<1x1x32xf32, #tpu.memory_space<vmem>>, %arg15: memref<1x32x32xbf16, #tpu.memory_space<vmem>>, %arg16: memref<1x1x32xf32, #tpu.memory_space<vmem>>, %arg17: memref<1x32x32xbf16, #tpu.memory_space<vmem>>, %arg18: memref<1x1x32xf32, #tpu.memory_space<vmem>>, %arg19: memref<1x32x32xbf16, #tpu.memory_space<vmem>>, %arg20: memref<1x1x32xf32, #tpu.memory_space<vmem>>, %arg21: memref<1x32x16xbf16, #tpu.memory_space<vmem>>, %arg22: memref<1x1x16xf32, #tpu.memory_space<vmem>>, %arg23: memref<1x16x32xbf16, #tpu.memory_space<vmem>>, %arg24: memref<1x1x32xf32, #tpu.memory_space<vmem>>, %arg25: memref<1x1x32xf32, #tpu.memory_space<vmem>>, %arg26: memref<1x1x32xf32, #tpu.memory_space<vmem>>, %arg27: memref<1x1x32xf32, #tpu.memory_space<vmem>>, %arg28: memref<1x1x32xf32, #tpu.memory_space<vmem>>, %arg29: memref<1x1x32xf32, #tpu.memory_space<vmem>>, %arg30: memref<16x32xf32, #tpu.memory_space<vmem>>, %arg31: memref<64x8xf32, #tpu.memory_space<vmem>>, %arg32: memref<64x8xf32, #tpu.memory_space<vmem>>, %arg33: memref<64x8xf32, #tpu.memory_space<vmem>>, %arg34: memref<16x32xf32, #tpu.memory_space<vmem>>) attributes {dimension_semantics = [#tpu.dimension_semantics<parallel>, #tpu.dimension_semantics<arbitrary>], iteration_bounds = array<i64: 2, 2>, scalar_prefetch = 0 : i64, scratch_operands = 5 : i64, tpu.core_type = #tpu.core_type<tc>, window_params = [{transform_indices = @transform_0, window_bounds = array<i64: 1, 8, 4>}, {transform_indices = @transform_1, window_bounds = array<i64: 1, 8, 1>}, {transform_indices = @transform_2, window_bounds = array<i64: 1, 1, 64>}, {pipeline_mode = #tpu.pipeline_mode<synchronous>, transform_indices = @transform_3, window_bounds = array<i64: 64, 64>}, {pipeline_mode = #tpu.pipeline_mode<synchronous>, transform_indices = @transform_4, window_bounds = array<i64: 1, 32>}, {pipeline_mode = #tpu.pipeline_mode<synchronous>, transform_indices = @transform_5, window_bounds = array<i64: 16, 32>}, {pipeline_mode = #tpu.pipeline_mode<synchronous>, transform_indices = @transform_6, window_bounds = array<i64: 4, 32>}, {pipeline_mode = #tpu.pipeline_mode<synchronous>, transform_indices = @transform_7, window_bounds = array<i64: 1, 32>}, {pipeline_mode = #tpu.pipeline_mode<synchronous>, transform_indices = @transform_8, window_bounds = array<i64: 32, 32>}, {pipeline_mode = #tpu.pipeline_mode<synchronous>, transform_indices = @transform_9, window_bounds = array<i64: 32, 32>}, {pipeline_mode = #tpu.pipeline_mode<synchronous>, transform_indices = @transform_10, window_bounds = array<i64: 1, 32>}, {transform_indices = @transform_11, window_bounds = array<i64: 1, 32, 32>}, {transform_indices = @transform_12, window_bounds = array<i64: 1, 1, 32>}, {transform_indices = @transform_13, window_bounds = array<i64: 1, 32, 32>}, {transform_indices = @transform_14, window_bounds = array<i64: 1, 1, 32>}, {transform_indices = @transform_15, window_bounds = array<i64: 1, 32, 32>}, {transform_indices = @transform_16, window_bounds = array<i64: 1, 1, 32>}, {transform_indices = @transform_17, window_bounds = array<i64: 1, 32, 32>}, {transform_indices = @transform_18, window_bounds = array<i64: 1, 1, 32>}, {transform_indices = @transform_19, window_bounds = array<i64: 1, 32, 16>}, {transform_indices = @transform_20, window_bounds = array<i64: 1, 1, 16>}, {transform_indices = @transform_21, window_bounds = array<i64: 1, 16, 32>}, {transform_indices = @transform_22, window_bounds = array<i64: 1, 1, 32>}, {transform_indices = @transform_23, window_bounds = array<i64: 1, 1, 32>}, {transform_indices = @transform_24, window_bounds = array<i64: 1, 1, 32>}, {transform_indices = @transform_25, window_bounds = array<i64: 1, 1, 32>}, {transform_indices = @transform_26, window_bounds = array<i64: 1, 1, 32>}, {transform_indices = @transform_27, window_bounds = array<i64: 1, 1, 32>}]} {
    %c0_i32 = arith.constant 0 : i32
    %0 = arith.cmpi eq, %arg1, %c0_i32 : i32
    %1 = arith.extui %0 : i1 to i32
    %c0_i32_0 = arith.constant 0 : i32
    %2 = arith.cmpi ne, %1, %c0_i32_0 : i32
    scf.if %2 {
      %c0_114 = arith.constant 0 : index
      %c0_115 = arith.constant 0 : index
      %c0_116 = arith.constant 0 : index
      %169 = vector.load %arg2[%c0_114, %c0_115, %c0_116] : memref<1x8x4xf32, #tpu.memory_space<vmem>>, vector<1x8x4xf32>
      %170 = vector.shape_cast %169 : vector<1x8x4xf32> to vector<8x4xf32>
      %171 = arith.truncf %170 : vector<8x4xf32> to vector<8x4xbf16>
      %c0_117 = arith.constant 0 : index
      %c0_118 = arith.constant 0 : index
      %172 = vector.load %arg8[%c0_117, %c0_118] : memref<4x32xbf16, #tpu.memory_space<vmem>>, vector<4x32xbf16>
      %cst_119 = arith.constant dense<0.000000e+00> : vector<8x32xf32>
      %173 = tpu.matmul %171, %172, %cst_119 {dimension_numbers = #tpu.dot_dimension_numbers<[1], [0], [0], [1], [0, 0, 1, 1], [], []>} : vector<8x4xbf16>, vector<4x32xbf16>, vector<8x32xf32> -> vector<8x32xf32>
      %c0_120 = arith.constant 0 : index
      %c0_121 = arith.constant 0 : index
      %174 = vector.load %arg9[%c0_120, %c0_121] : memref<1x32xf32, #tpu.memory_space<vmem>>, vector<1x32xf32>
      %175 = vector.broadcast %174 : vector<1x32xf32> to vector<8x32xf32>
      %176 = arith.addf %173, %175 : vector<8x32xf32>
      %177 = tpu.iota {dimensions = array<i32: 1>} : vector<8x16xi32>
      %c0_122 = arith.constant 0 : index
      %c0_123 = arith.constant 0 : index
      %c0_124 = arith.constant 0 : index
      %178 = vector.load %arg3[%c0_122, %c0_123, %c0_124] : memref<1x8x1xi32, #tpu.memory_space<vmem>>, vector<1x8x1xi32>
      %179 = vector.shape_cast %178 : vector<1x8x1xi32> to vector<8x1xi32>
      %180 = vector.broadcast %179 : vector<8x1xi32> to vector<8x16xi32>
      %181 = arith.cmpi eq, %177, %180 : vector<8x16xi32>
      %cst_125 = arith.constant 1.000000e+00 : f32
      %cst_126 = arith.constant 0.000000e+00 : f32
      %182 = vector.broadcast %cst_125 : f32 to vector<8x16xf32>
      %183 = vector.broadcast %cst_126 : f32 to vector<8x16xf32>
      %184 = arith.select %181, %182, %183 : vector<8x16xi1>, vector<8x16xf32>
      %185 = arith.truncf %184 : vector<8x16xf32> to vector<8x16xbf16>
      %c0_127 = arith.constant 0 : index
      %c0_128 = arith.constant 0 : index
      %186 = vector.load %arg7[%c0_127, %c0_128] : memref<16x32xbf16, #tpu.memory_space<vmem>>, vector<16x32xbf16>
      %cst_129 = arith.constant dense<0.000000e+00> : vector<8x32xf32>
      %187 = tpu.matmul %185, %186, %cst_129 {dimension_numbers = #tpu.dot_dimension_numbers<[1], [0], [0], [1], [0, 0, 1, 1], [], []>} : vector<8x16xbf16>, vector<16x32xbf16>, vector<8x32xf32> -> vector<8x32xf32>
      %188 = arith.truncf %176 : vector<8x32xf32> to vector<8x32xbf16>
      %c0_130 = arith.constant 0 : index
      %c0_131 = arith.constant 0 : index
      %189 = vector.load %arg10[%c0_130, %c0_131] : memref<32x32xbf16, #tpu.memory_space<vmem>>, vector<32x32xbf16>
      %cst_132 = arith.constant dense<0.000000e+00> : vector<8x32xf32>
      %190 = tpu.matmul %188, %189, %cst_132 {dimension_numbers = #tpu.dot_dimension_numbers<[1], [0], [0], [1], [0, 0, 1, 1], [], []>} : vector<8x32xbf16>, vector<32x32xbf16>, vector<8x32xf32> -> vector<8x32xf32>
      %191 = arith.truncf %187 : vector<8x32xf32> to vector<8x32xbf16>
      %c0_133 = arith.constant 0 : index
      %c0_134 = arith.constant 0 : index
      %192 = vector.load %arg11[%c0_133, %c0_134] : memref<32x32xbf16, #tpu.memory_space<vmem>>, vector<32x32xbf16>
      %cst_135 = arith.constant dense<0.000000e+00> : vector<8x32xf32>
      %193 = tpu.matmul %191, %192, %cst_135 {dimension_numbers = #tpu.dot_dimension_numbers<[1], [0], [0], [1], [0, 0, 1, 1], [], []>} : vector<8x32xbf16>, vector<32x32xbf16>, vector<8x32xf32> -> vector<8x32xf32>
      %194 = arith.addf %190, %193 : vector<8x32xf32>
      %c0_136 = arith.constant 0 : index
      %c0_137 = arith.constant 0 : index
      %195 = vector.load %arg12[%c0_136, %c0_137] : memref<1x32xf32, #tpu.memory_space<vmem>>, vector<1x32xf32>
      %196 = vector.broadcast %195 : vector<1x32xf32> to vector<8x32xf32>
      %197 = arith.addf %194, %196 : vector<8x32xf32>
      %cst_138 = arith.constant 0.000000e+00 : f32
      %198 = vector.broadcast %cst_138 : f32 to vector<8x32xf32>
      %199 = arith.maximumf %197, %198 : vector<8x32xf32>
      %cst_139 = arith.constant 0.000000e+00 : f32
      %200 = vector.broadcast %cst_139 : f32 to vector<16x32xf32>
      %c0_140 = arith.constant 0 : index
      %c0_141 = arith.constant 0 : index
      %201 = vector.load %arg30[%c0_140, %c0_141] : memref<16x32xf32, #tpu.memory_space<vmem>>, vector<16x32xf32>
      tpu.vector_store %arg30[%c0_140, %c0_141], %200 {strides = array<i32>} : memref<16x32xf32, #tpu.memory_space<vmem>>, vector<16x32xf32>,
      %c0_142 = arith.constant 0 : index
      %c0_143 = arith.constant 0 : index
      %202 = vector.load %arg6[%c0_142, %c0_143] : memref<1x32xf32, #tpu.memory_space<vmem>>, vector<1x32xf32>
      %c0_144 = arith.constant 0 : index
      %c0_145 = arith.constant 0 : index
      %203 = vector.load %arg30[%c0_144, %c0_145] : memref<16x32xf32, #tpu.memory_space<vmem>>, vector<1x32xf32>
      tpu.vector_store %arg30[%c0_144, %c0_145], %202 {strides = array<i32>} : memref<16x32xf32, #tpu.memory_space<vmem>>, vector<1x32xf32>,
      %c1 = arith.constant 1 : index
      %c0_146 = arith.constant 0 : index
      %204 = vector.load %arg30[%c1, %c0_146] : memref<16x32xf32, #tpu.memory_space<vmem>>, vector<8x32xf32>
      tpu.vector_store %arg30[%c1, %c0_146], %199 {strides = array<i32>} : memref<16x32xf32, #tpu.memory_space<vmem>>, vector<8x32xf32>,
    } else {
    }
    %c0 = arith.constant 0 : index
    %c0_1 = arith.constant 0 : index
    %3 = vector.load %arg30[%c0, %c0_1] : memref<16x32xf32, #tpu.memory_space<vmem>>, vector<16x32xf32>
    %c0_2 = arith.constant 0 : index
    %c0_3 = arith.constant 0 : index
    %c0_4 = arith.constant 0 : index
    %4 = vector.load %arg4[%c0_2, %c0_3, %c0_4] : memref<1x1x64xf32, #tpu.memory_space<vmem>>, vector<1x1x64xf32>
    %5 = vector.shape_cast %4 : vector<1x1x64xf32> to vector<1x64xf32>
    %c0_5 = arith.constant 0 : index
    %c0_6 = arith.constant 0 : index
    %6 = vector.load %arg5[%c0_5, %c0_6] : memref<64x64xf32, #tpu.memory_space<vmem>>, vector<64x64xf32>
    %7 = arith.truncf %3 : vector<16x32xf32> to vector<16x32xbf16>
    %c0_7 = arith.constant 0 : index
    %c0_8 = arith.constant 0 : index
    %c0_9 = arith.constant 0 : index
    %8 = vector.load %arg13[%c0_7, %c0_8, %c0_9] : memref<1x32x32xbf16, #tpu.memory_space<vmem>>, vector<1x32x32xbf16>
    %9 = vector.shape_cast %8 : vector<1x32x32xbf16> to vector<32x32xbf16>
    %cst = arith.constant dense<0.000000e+00> : vector<16x32xf32>
    %10 = tpu.matmul %7, %9, %cst {dimension_numbers = #tpu.dot_dimension_numbers<[1], [0], [0], [1], [0, 0, 1, 1], [], []>} : vector<16x32xbf16>, vector<32x32xbf16>, vector<16x32xf32> -> vector<16x32xf32>
    %c0_10 = arith.constant 0 : index
    %c0_11 = arith.constant 0 : index
    %c0_12 = arith.constant 0 : index
    %11 = vector.load %arg14[%c0_10, %c0_11, %c0_12] : memref<1x1x32xf32, #tpu.memory_space<vmem>>, vector<1x1x32xf32>
    %12 = vector.shape_cast %11 : vector<1x1x32xf32> to vector<1x32xf32>
    %13 = vector.broadcast %12 : vector<1x32xf32> to vector<16x32xf32>
    %14 = arith.addf %10, %13 : vector<16x32xf32>
    %cst_13 = arith.constant 0.353553385 : f32
    %15 = vector.broadcast %cst_13 : f32 to vector<16x32xf32>
    %16 = arith.mulf %14, %15 : vector<16x32xf32>
    %c0_14 = arith.constant 0 : index
    %c0_15 = arith.constant 0 : index
    %c0_16 = arith.constant 0 : index
    %17 = vector.load %arg15[%c0_14, %c0_15, %c0_16] : memref<1x32x32xbf16, #tpu.memory_space<vmem>>, vector<1x32x32xbf16>
    %18 = vector.shape_cast %17 : vector<1x32x32xbf16> to vector<32x32xbf16>
    %cst_17 = arith.constant dense<0.000000e+00> : vector<16x32xf32>
    %19 = tpu.matmul %7, %18, %cst_17 {dimension_numbers = #tpu.dot_dimension_numbers<[1], [0], [0], [1], [0, 0, 1, 1], [], []>} : vector<16x32xbf16>, vector<32x32xbf16>, vector<16x32xf32> -> vector<16x32xf32>
    %c0_18 = arith.constant 0 : index
    %c0_19 = arith.constant 0 : index
    %c0_20 = arith.constant 0 : index
    %20 = vector.load %arg16[%c0_18, %c0_19, %c0_20] : memref<1x1x32xf32, #tpu.memory_space<vmem>>, vector<1x1x32xf32>
    %21 = vector.shape_cast %20 : vector<1x1x32xf32> to vector<1x32xf32>
    %22 = vector.broadcast %21 : vector<1x32xf32> to vector<16x32xf32>
    %23 = arith.addf %19, %22 : vector<16x32xf32>
    %c0_21 = arith.constant 0 : index
    %c0_22 = arith.constant 0 : index
    %c0_23 = arith.constant 0 : index
    %24 = vector.load %arg17[%c0_21, %c0_22, %c0_23] : memref<1x32x32xbf16, #tpu.memory_space<vmem>>, vector<1x32x32xbf16>
    %25 = vector.shape_cast %24 : vector<1x32x32xbf16> to vector<32x32xbf16>
    %cst_24 = arith.constant dense<0.000000e+00> : vector<16x32xf32>
    %26 = tpu.matmul %7, %25, %cst_24 {dimension_numbers = #tpu.dot_dimension_numbers<[1], [0], [0], [1], [0, 0, 1, 1], [], []>} : vector<16x32xbf16>, vector<32x32xbf16>, vector<16x32xf32> -> vector<16x32xf32>
    %c0_25 = arith.constant 0 : index
    %c0_26 = arith.constant 0 : index
    %c0_27 = arith.constant 0 : index
    %27 = vector.load %arg18[%c0_25, %c0_26, %c0_27] : memref<1x1x32xf32, #tpu.memory_space<vmem>>, vector<1x1x32xf32>
    %28 = vector.shape_cast %27 : vector<1x1x32xf32> to vector<1x32xf32>
    %29 = vector.broadcast %28 : vector<1x32xf32> to vector<16x32xf32>
    %30 = arith.addf %26, %29 : vector<16x32xf32>
    %31 = vector.extract_strided_slice %16 {offsets = [0, 0], sizes = [16, 8], strides = [1, 1]} : vector<16x32xf32> to vector<16x8xf32>
    %c0_28 = arith.constant 0 : index
    %c0_29 = arith.constant 0 : index
    %32 = vector.load %arg31[%c0_28, %c0_29] : memref<64x8xf32, #tpu.memory_space<vmem>>, vector<16x8xf32>
    tpu.vector_store %arg31[%c0_28, %c0_29], %31 {strides = array<i32>} : memref<64x8xf32, #tpu.memory_space<vmem>>, vector<16x8xf32>,
    %33 = vector.extract_strided_slice %23 {offsets = [0, 0], sizes = [16, 8], strides = [1, 1]} : vector<16x32xf32> to vector<16x8xf32>
    %c0_30 = arith.constant 0 : index
    %c0_31 = arith.constant 0 : index
    %34 = vector.load %arg32[%c0_30, %c0_31] : memref<64x8xf32, #tpu.memory_space<vmem>>, vector<16x8xf32>
    tpu.vector_store %arg32[%c0_30, %c0_31], %33 {strides = array<i32>} : memref<64x8xf32, #tpu.memory_space<vmem>>, vector<16x8xf32>,
    %35 = vector.extract_strided_slice %30 {offsets = [0, 0], sizes = [16, 8], strides = [1, 1]} : vector<16x32xf32> to vector<16x8xf32>
    %c0_32 = arith.constant 0 : index
    %c0_33 = arith.constant 0 : index
    %36 = vector.load %arg33[%c0_32, %c0_33] : memref<64x8xf32, #tpu.memory_space<vmem>>, vector<16x8xf32>
    tpu.vector_store %arg33[%c0_32, %c0_33], %35 {strides = array<i32>} : memref<64x8xf32, #tpu.memory_space<vmem>>, vector<16x8xf32>,
    %37 = vector.extract_strided_slice %16 {offsets = [0, 8], sizes = [16, 8], strides = [1, 1]} : vector<16x32xf32> to vector<16x8xf32>
    %c16 = arith.constant 16 : index
    %c0_34 = arith.constant 0 : index
    %38 = vector.load %arg31[%c16, %c0_34] : memref<64x8xf32, #tpu.memory_space<vmem>>, vector<16x8xf32>
    tpu.vector_store %arg31[%c16, %c0_34], %37 {strides = array<i32>} : memref<64x8xf32, #tpu.memory_space<vmem>>, vector<16x8xf32>,
    %39 = vector.extract_strided_slice %23 {offsets = [0, 8], sizes = [16, 8], strides = [1, 1]} : vector<16x32xf32> to vector<16x8xf32>
    %c16_35 = arith.constant 16 : index
    %c0_36 = arith.constant 0 : index
    %40 = vector.load %arg32[%c16_35, %c0_36] : memref<64x8xf32, #tpu.memory_space<vmem>>, vector<16x8xf32>
    tpu.vector_store %arg32[%c16_35, %c0_36], %39 {strides = array<i32>} : memref<64x8xf32, #tpu.memory_space<vmem>>, vector<16x8xf32>,
    %41 = vector.extract_strided_slice %30 {offsets = [0, 8], sizes = [16, 8], strides = [1, 1]} : vector<16x32xf32> to vector<16x8xf32>
    %c16_37 = arith.constant 16 : index
    %c0_38 = arith.constant 0 : index
    %42 = vector.load %arg33[%c16_37, %c0_38] : memref<64x8xf32, #tpu.memory_space<vmem>>, vector<16x8xf32>
    tpu.vector_store %arg33[%c16_37, %c0_38], %41 {strides = array<i32>} : memref<64x8xf32, #tpu.memory_space<vmem>>, vector<16x8xf32>,
    %43 = vector.extract_strided_slice %16 {offsets = [0, 16], sizes = [16, 8], strides = [1, 1]} : vector<16x32xf32> to vector<16x8xf32>
    %c32 = arith.constant 32 : index
    %c0_39 = arith.constant 0 : index
    %44 = vector.load %arg31[%c32, %c0_39] : memref<64x8xf32, #tpu.memory_space<vmem>>, vector<16x8xf32>
    tpu.vector_store %arg31[%c32, %c0_39], %43 {strides = array<i32>} : memref<64x8xf32, #tpu.memory_space<vmem>>, vector<16x8xf32>,
    %45 = vector.extract_strided_slice %23 {offsets = [0, 16], sizes = [16, 8], strides = [1, 1]} : vector<16x32xf32> to vector<16x8xf32>
    %c32_40 = arith.constant 32 : index
    %c0_41 = arith.constant 0 : index
    %46 = vector.load %arg32[%c32_40, %c0_41] : memref<64x8xf32, #tpu.memory_space<vmem>>, vector<16x8xf32>
    tpu.vector_store %arg32[%c32_40, %c0_41], %45 {strides = array<i32>} : memref<64x8xf32, #tpu.memory_space<vmem>>, vector<16x8xf32>,
    %47 = vector.extract_strided_slice %30 {offsets = [0, 16], sizes = [16, 8], strides = [1, 1]} : vector<16x32xf32> to vector<16x8xf32>
    %c32_42 = arith.constant 32 : index
    %c0_43 = arith.constant 0 : index
    %48 = vector.load %arg33[%c32_42, %c0_43] : memref<64x8xf32, #tpu.memory_space<vmem>>, vector<16x8xf32>
    tpu.vector_store %arg33[%c32_42, %c0_43], %47 {strides = array<i32>} : memref<64x8xf32, #tpu.memory_space<vmem>>, vector<16x8xf32>,
    %49 = vector.extract_strided_slice %16 {offsets = [0, 24], sizes = [16, 8], strides = [1, 1]} : vector<16x32xf32> to vector<16x8xf32>
    %c48 = arith.constant 48 : index
    %c0_44 = arith.constant 0 : index
    %50 = vector.load %arg31[%c48, %c0_44] : memref<64x8xf32, #tpu.memory_space<vmem>>, vector<16x8xf32>
    tpu.vector_store %arg31[%c48, %c0_44], %49 {strides = array<i32>} : memref<64x8xf32, #tpu.memory_space<vmem>>, vector<16x8xf32>,
    %51 = vector.extract_strided_slice %23 {offsets = [0, 24], sizes = [16, 8], strides = [1, 1]} : vector<16x32xf32> to vector<16x8xf32>
    %c48_45 = arith.constant 48 : index
    %c0_46 = arith.constant 0 : index
    %52 = vector.load %arg32[%c48_45, %c0_46] : memref<64x8xf32, #tpu.memory_space<vmem>>, vector<16x8xf32>
    tpu.vector_store %arg32[%c48_45, %c0_46], %51 {strides = array<i32>} : memref<64x8xf32, #tpu.memory_space<vmem>>, vector<16x8xf32>,
    %53 = vector.extract_strided_slice %30 {offsets = [0, 24], sizes = [16, 8], strides = [1, 1]} : vector<16x32xf32> to vector<16x8xf32>
    %c48_47 = arith.constant 48 : index
    %c0_48 = arith.constant 0 : index
    %54 = vector.load %arg33[%c48_47, %c0_48] : memref<64x8xf32, #tpu.memory_space<vmem>>, vector<16x8xf32>
    tpu.vector_store %arg33[%c48_47, %c0_48], %53 {strides = array<i32>} : memref<64x8xf32, #tpu.memory_space<vmem>>, vector<16x8xf32>,
    %c0_49 = arith.constant 0 : index
    %c0_50 = arith.constant 0 : index
    %55 = vector.load %arg31[%c0_49, %c0_50] : memref<64x8xf32, #tpu.memory_space<vmem>>, vector<64x8xf32>
    %56 = arith.truncf %55 : vector<64x8xf32> to vector<64x8xbf16>
    %c0_51 = arith.constant 0 : index
    %c0_52 = arith.constant 0 : index
    %57 = vector.load %arg32[%c0_51, %c0_52] : memref<64x8xf32, #tpu.memory_space<vmem>>, vector<64x8xf32>
    %58 = arith.truncf %57 : vector<64x8xf32> to vector<64x8xbf16>
    %c0_53 = arith.constant 0 : index
    %c0_54 = arith.constant 0 : index
    %59 = vector.load %arg33[%c0_53, %c0_54] : memref<64x8xf32, #tpu.memory_space<vmem>>, vector<64x8xf32>
    %60 = arith.truncf %59 : vector<64x8xf32> to vector<64x8xbf16>
    %cst_55 = arith.constant dense<0.000000e+00> : vector<64x64xf32>
    %61 = tpu.matmul %56, %58, %cst_55 {dimension_numbers = #tpu.dot_dimension_numbers<[1], [1], [0], [0], [0, 0, 1, 0], [], []>} : vector<64x8xbf16>, vector<64x8xbf16>, vector<64x64xf32> -> vector<64x64xf32>
    %62 = arith.addf %61, %6 : vector<64x64xf32>
    %63 = vector.broadcast %5 : vector<1x64xf32> to vector<64x64xf32>
    %64 = arith.addf %62, %63 : vector<64x64xf32>
    %cst_56 = arith.constant dense<0xFF800000> : vector<64xf32>
    %65 = vector.multi_reduction <maximumf>, %64, %cst_56 [1] : vector<64x64xf32> to vector<64xf32>
    %66 = vector.shape_cast %65 : vector<64xf32> to vector<64x1xf32>
    %67 = vector.broadcast %66 : vector<64x1xf32> to vector<64x64xf32>
    %68 = arith.subf %64, %67 : vector<64x64xf32>
    %69 = math.exp %68 : vector<64x64xf32>
    %cst_57 = arith.constant dense<0.000000e+00> : vector<64xf32>
    %70 = vector.multi_reduction <add>, %69, %cst_57 [1] : vector<64x64xf32> to vector<64xf32>
    %71 = vector.shape_cast %70 : vector<64xf32> to vector<64x1xf32>
    %72 = vector.broadcast %71 : vector<64x1xf32> to vector<64x64xf32>
    %73 = arith.divf %69, %72 : vector<64x64xf32>
    %74 = arith.truncf %73 : vector<64x64xf32> to vector<64x64xbf16>
    %cst_58 = arith.constant dense<0.000000e+00> : vector<64x8xf32>
    %75 = tpu.matmul %74, %60, %cst_58 {dimension_numbers = #tpu.dot_dimension_numbers<[1], [0], [0], [1], [0, 0, 1, 1], [], []>} : vector<64x64xbf16>, vector<64x8xbf16>, vector<64x8xf32> -> vector<64x8xf32>
    %76 = vector.extract_strided_slice %75 {offsets = [0, 0], sizes = [16, 8], strides = [1, 1]} : vector<64x8xf32> to vector<16x8xf32>
    %c0_59 = arith.constant 0 : index
    %c0_60 = arith.constant 0 : index
    %77 = vector.load %arg34[%c0_59, %c0_60] : memref<16x32xf32, #tpu.memory_space<vmem>>, vector<16x8xf32>
    tpu.vector_store %arg34[%c0_59, %c0_60], %76 {strides = array<i32>} : memref<16x32xf32, #tpu.memory_space<vmem>>, vector<16x8xf32>,
    %78 = vector.extract_strided_slice %75 {offsets = [16, 0], sizes = [16, 8], strides = [1, 1]} : vector<64x8xf32> to vector<16x8xf32>
    %c0_61 = arith.constant 0 : index
    %c8 = arith.constant 8 : index
    %79 = vector.load %arg34[%c0_61, %c8] : memref<16x32xf32, #tpu.memory_space<vmem>>, vector<16x8xf32>
    tpu.vector_store %arg34[%c0_61, %c8], %78 {strides = array<i32>} : memref<16x32xf32, #tpu.memory_space<vmem>>, vector<16x8xf32>,
    %80 = vector.extract_strided_slice %75 {offsets = [32, 0], sizes = [16, 8], strides = [1, 1]} : vector<64x8xf32> to vector<16x8xf32>
    %c0_62 = arith.constant 0 : index
    %c16_63 = arith.constant 16 : index
    %81 = vector.load %arg34[%c0_62, %c16_63] : memref<16x32xf32, #tpu.memory_space<vmem>>, vector<16x8xf32>
    tpu.vector_store %arg34[%c0_62, %c16_63], %80 {strides = array<i32>} : memref<16x32xf32, #tpu.memory_space<vmem>>, vector<16x8xf32>,
    %82 = vector.extract_strided_slice %75 {offsets = [48, 0], sizes = [16, 8], strides = [1, 1]} : vector<64x8xf32> to vector<16x8xf32>
    %c0_64 = arith.constant 0 : index
    %c24 = arith.constant 24 : index
    %83 = vector.load %arg34[%c0_64, %c24] : memref<16x32xf32, #tpu.memory_space<vmem>>, vector<16x8xf32>
    tpu.vector_store %arg34[%c0_64, %c24], %82 {strides = array<i32>} : memref<16x32xf32, #tpu.memory_space<vmem>>, vector<16x8xf32>,
    %c0_65 = arith.constant 0 : index
    %c0_66 = arith.constant 0 : index
    %84 = vector.load %arg34[%c0_65, %c0_66] : memref<16x32xf32, #tpu.memory_space<vmem>>, vector<16x32xf32>
    %85 = arith.truncf %84 : vector<16x32xf32> to vector<16x32xbf16>
    %c0_67 = arith.constant 0 : index
    %c0_68 = arith.constant 0 : index
    %c0_69 = arith.constant 0 : index
    %86 = vector.load %arg19[%c0_67, %c0_68, %c0_69] : memref<1x32x32xbf16, #tpu.memory_space<vmem>>, vector<1x32x32xbf16>
    %87 = vector.shape_cast %86 : vector<1x32x32xbf16> to vector<32x32xbf16>
    %cst_70 = arith.constant dense<0.000000e+00> : vector<16x32xf32>
    %88 = tpu.matmul %85, %87, %cst_70 {dimension_numbers = #tpu.dot_dimension_numbers<[1], [0], [0], [1], [0, 0, 1, 1], [], []>} : vector<16x32xbf16>, vector<32x32xbf16>, vector<16x32xf32> -> vector<16x32xf32>
    %c0_71 = arith.constant 0 : index
    %c0_72 = arith.constant 0 : index
    %c0_73 = arith.constant 0 : index
    %89 = vector.load %arg20[%c0_71, %c0_72, %c0_73] : memref<1x1x32xf32, #tpu.memory_space<vmem>>, vector<1x1x32xf32>
    %90 = vector.shape_cast %89 : vector<1x1x32xf32> to vector<1x32xf32>
    %91 = vector.broadcast %90 : vector<1x32xf32> to vector<16x32xf32>
    %92 = arith.addf %88, %91 : vector<16x32xf32>
    %93 = arith.addf %3, %92 : vector<16x32xf32>
    %c0_74 = arith.constant 0 : index
    %c0_75 = arith.constant 0 : index
    %c0_76 = arith.constant 0 : index
    %94 = vector.load %arg25[%c0_74, %c0_75, %c0_76] : memref<1x1x32xf32, #tpu.memory_space<vmem>>, vector<1x1x32xf32>
    %95 = vector.shape_cast %94 : vector<1x1x32xf32> to vector<1x32xf32>
    %c0_77 = arith.constant 0 : index
    %c0_78 = arith.constant 0 : index
    %c0_79 = arith.constant 0 : index
    %96 = vector.load %arg26[%c0_77, %c0_78, %c0_79] : memref<1x1x32xf32, #tpu.memory_space<vmem>>, vector<1x1x32xf32>
    %97 = vector.shape_cast %96 : vector<1x1x32xf32> to vector<1x32xf32>
    %cst_80 = arith.constant dense<0.000000e+00> : vector<16xf32>
    %98 = vector.multi_reduction <add>, %93, %cst_80 [1] : vector<16x32xf32> to vector<16xf32>
    %99 = vector.shape_cast %98 : vector<16xf32> to vector<16x1xf32>
    %cst_81 = arith.constant 3.200000e+01 : f32
    %100 = vector.broadcast %cst_81 : f32 to vector<16x1xf32>
    %101 = arith.divf %99, %100 : vector<16x1xf32>
    %102 = vector.broadcast %101 : vector<16x1xf32> to vector<16x32xf32>
    %103 = arith.subf %93, %102 : vector<16x32xf32>
    %104 = arith.mulf %103, %103 : vector<16x32xf32>
    %cst_82 = arith.constant dense<0.000000e+00> : vector<16xf32>
    %105 = vector.multi_reduction <add>, %104, %cst_82 [1] : vector<16x32xf32> to vector<16xf32>
    %106 = vector.shape_cast %105 : vector<16xf32> to vector<16x1xf32>
    %cst_83 = arith.constant 3.200000e+01 : f32
    %107 = vector.broadcast %cst_83 : f32 to vector<16x1xf32>
    %108 = arith.divf %106, %107 : vector<16x1xf32>
    %109 = vector.broadcast %101 : vector<16x1xf32> to vector<16x32xf32>
    %110 = arith.subf %93, %109 : vector<16x32xf32>
    %cst_84 = arith.constant 9.99999974E-6 : f32
    %111 = vector.broadcast %cst_84 : f32 to vector<16x1xf32>
    %112 = arith.addf %108, %111 : vector<16x1xf32>
    %113 = math.rsqrt %112 : vector<16x1xf32>
    %114 = vector.broadcast %113 : vector<16x1xf32> to vector<16x32xf32>
    %115 = arith.mulf %110, %114 : vector<16x32xf32>
    %116 = vector.broadcast %95 : vector<1x32xf32> to vector<16x32xf32>
    %117 = arith.mulf %115, %116 : vector<16x32xf32>
    %118 = vector.broadcast %97 : vector<1x32xf32> to vector<16x32xf32>
    %119 = arith.addf %117, %118 : vector<16x32xf32>
    %120 = arith.truncf %119 : vector<16x32xf32> to vector<16x32xbf16>
    %c0_85 = arith.constant 0 : index
    %c0_86 = arith.constant 0 : index
    %c0_87 = arith.constant 0 : index
    %121 = vector.load %arg21[%c0_85, %c0_86, %c0_87] : memref<1x32x16xbf16, #tpu.memory_space<vmem>>, vector<1x32x16xbf16>
    %122 = vector.shape_cast %121 : vector<1x32x16xbf16> to vector<32x16xbf16>
    %cst_88 = arith.constant dense<0.000000e+00> : vector<16x16xf32>
    %123 = tpu.matmul %120, %122, %cst_88 {dimension_numbers = #tpu.dot_dimension_numbers<[1], [0], [0], [1], [0, 0, 1, 1], [], []>} : vector<16x32xbf16>, vector<32x16xbf16>, vector<16x16xf32> -> vector<16x16xf32>
    %c0_89 = arith.constant 0 : index
    %c0_90 = arith.constant 0 : index
    %c0_91 = arith.constant 0 : index
    %124 = vector.load %arg22[%c0_89, %c0_90, %c0_91] : memref<1x1x16xf32, #tpu.memory_space<vmem>>, vector<1x1x16xf32>
    %125 = vector.shape_cast %124 : vector<1x1x16xf32> to vector<1x16xf32>
    %126 = vector.broadcast %125 : vector<1x16xf32> to vector<16x16xf32>
    %127 = arith.addf %123, %126 : vector<16x16xf32>
    %cst_92 = arith.constant 0.000000e+00 : f32
    %128 = vector.broadcast %cst_92 : f32 to vector<16x16xf32>
    %129 = arith.maximumf %127, %128 : vector<16x16xf32>
    %130 = arith.truncf %129 : vector<16x16xf32> to vector<16x16xbf16>
    %c0_93 = arith.constant 0 : index
    %c0_94 = arith.constant 0 : index
    %c0_95 = arith.constant 0 : index
    %131 = vector.load %arg23[%c0_93, %c0_94, %c0_95] : memref<1x16x32xbf16, #tpu.memory_space<vmem>>, vector<1x16x32xbf16>
    %132 = vector.shape_cast %131 : vector<1x16x32xbf16> to vector<16x32xbf16>
    %cst_96 = arith.constant dense<0.000000e+00> : vector<16x32xf32>
    %133 = tpu.matmul %130, %132, %cst_96 {dimension_numbers = #tpu.dot_dimension_numbers<[1], [0], [0], [1], [0, 0, 1, 1], [], []>} : vector<16x16xbf16>, vector<16x32xbf16>, vector<16x32xf32> -> vector<16x32xf32>
    %c0_97 = arith.constant 0 : index
    %c0_98 = arith.constant 0 : index
    %c0_99 = arith.constant 0 : index
    %134 = vector.load %arg24[%c0_97, %c0_98, %c0_99] : memref<1x1x32xf32, #tpu.memory_space<vmem>>, vector<1x1x32xf32>
    %135 = vector.shape_cast %134 : vector<1x1x32xf32> to vector<1x32xf32>
    %136 = vector.broadcast %135 : vector<1x32xf32> to vector<16x32xf32>
    %137 = arith.addf %133, %136 : vector<16x32xf32>
    %138 = arith.addf %119, %137 : vector<16x32xf32>
    %c0_100 = arith.constant 0 : index
    %c0_101 = arith.constant 0 : index
    %c0_102 = arith.constant 0 : index
    %139 = vector.load %arg27[%c0_100, %c0_101, %c0_102] : memref<1x1x32xf32, #tpu.memory_space<vmem>>, vector<1x1x32xf32>
    %140 = vector.shape_cast %139 : vector<1x1x32xf32> to vector<1x32xf32>
    %c0_103 = arith.constant 0 : index
    %c0_104 = arith.constant 0 : index
    %c0_105 = arith.constant 0 : index
    %141 = vector.load %arg28[%c0_103, %c0_104, %c0_105] : memref<1x1x32xf32, #tpu.memory_space<vmem>>, vector<1x1x32xf32>
    %142 = vector.shape_cast %141 : vector<1x1x32xf32> to vector<1x32xf32>
    %cst_106 = arith.constant dense<0.000000e+00> : vector<16xf32>
    %143 = vector.multi_reduction <add>, %138, %cst_106 [1] : vector<16x32xf32> to vector<16xf32>
    %144 = vector.shape_cast %143 : vector<16xf32> to vector<16x1xf32>
    %cst_107 = arith.constant 3.200000e+01 : f32
    %145 = vector.broadcast %cst_107 : f32 to vector<16x1xf32>
    %146 = arith.divf %144, %145 : vector<16x1xf32>
    %147 = vector.broadcast %146 : vector<16x1xf32> to vector<16x32xf32>
    %148 = arith.subf %138, %147 : vector<16x32xf32>
    %149 = arith.mulf %148, %148 : vector<16x32xf32>
    %cst_108 = arith.constant dense<0.000000e+00> : vector<16xf32>
    %150 = vector.multi_reduction <add>, %149, %cst_108 [1] : vector<16x32xf32> to vector<16xf32>
    %151 = vector.shape_cast %150 : vector<16xf32> to vector<16x1xf32>
    %cst_109 = arith.constant 3.200000e+01 : f32
    %152 = vector.broadcast %cst_109 : f32 to vector<16x1xf32>
    %153 = arith.divf %151, %152 : vector<16x1xf32>
    %154 = vector.broadcast %146 : vector<16x1xf32> to vector<16x32xf32>
    %155 = arith.subf %138, %154 : vector<16x32xf32>
    %cst_110 = arith.constant 9.99999974E-6 : f32
    %156 = vector.broadcast %cst_110 : f32 to vector<16x1xf32>
    %157 = arith.addf %153, %156 : vector<16x1xf32>
    %158 = math.rsqrt %157 : vector<16x1xf32>
    %159 = vector.broadcast %158 : vector<16x1xf32> to vector<16x32xf32>
    %160 = arith.mulf %155, %159 : vector<16x32xf32>
    %161 = vector.broadcast %140 : vector<1x32xf32> to vector<16x32xf32>
    %162 = arith.mulf %160, %161 : vector<16x32xf32>
    %163 = vector.broadcast %142 : vector<1x32xf32> to vector<16x32xf32>
    %164 = arith.addf %162, %163 : vector<16x32xf32>
    %c0_111 = arith.constant 0 : index
    %c0_112 = arith.constant 0 : index
    %165 = vector.load %arg30[%c0_111, %c0_112] : memref<16x32xf32, #tpu.memory_space<vmem>>, vector<16x32xf32>
    tpu.vector_store %arg30[%c0_111, %c0_112], %164 {strides = array<i32>} : memref<16x32xf32, #tpu.memory_space<vmem>>, vector<16x32xf32>,
    %c1_i32 = arith.constant 1 : i32
    %166 = arith.cmpi eq, %arg1, %c1_i32 : i32
    %167 = arith.extui %166 : i1 to i32
    %c0_i32_113 = arith.constant 0 : i32
    %168 = arith.cmpi ne, %167, %c0_i32_113 : i32
    scf.if %168 {
      %169 = vector.extract_strided_slice %164 {offsets = [0, 0], sizes = [1, 32], strides = [1, 1]} : vector<16x32xf32> to vector<1x32xf32>
      %c0_114 = arith.constant 0 : index
      %c0_115 = arith.constant 0 : index
      %c0_116 = arith.constant 0 : index
      %170 = vector.load %arg29[%c0_114, %c0_115, %c0_116] : memref<1x1x32xf32, #tpu.memory_space<vmem>>, vector<1x1x32xf32>
      %171 = vector.shape_cast %170 : vector<1x1x32xf32> to vector<1x32xf32>
      %172 = vector.shape_cast %169 : vector<1x32xf32> to vector<1x1x32xf32>
      tpu.vector_store %arg29[%c0_114, %c0_115, %c0_116], %172 {strides = array<i32>} : memref<1x1x32xf32, #tpu.memory_space<vmem>>, vector<1x1x32xf32>,
    } else {
    }
    return
  }
  func.func @transform_0(%arg0: i32, %arg1: i32) -> (i32, i32, i32) {
    %c0_i32 = arith.constant 0 : i32
    %c0_i32_0 = arith.constant 0 : i32
    %c0_i32_1 = arith.constant 0 : i32
    return %arg0, %c0_i32, %c0_i32_0 : i32, i32, i32
  }
  func.func @transform_1(%arg0: i32, %arg1: i32) -> (i32, i32, i32) {
    %c0_i32 = arith.constant 0 : i32
    %c0_i32_0 = arith.constant 0 : i32
    %c0_i32_1 = arith.constant 0 : i32
    return %arg0, %c0_i32, %c0_i32_0 : i32, i32, i32
  }
  func.func @transform_2(%arg0: i32, %arg1: i32) -> (i32, i32, i32) {
    %c0_i32 = arith.constant 0 : i32
    %c0_i32_0 = arith.constant 0 : i32
    %c0_i32_1 = arith.constant 0 : i32
    return %arg0, %c0_i32, %c0_i32_0 : i32, i32, i32
  }
  func.func @transform_3(%arg0: i32, %arg1: i32) -> (i32, i32) {
    %c0_i32 = arith.constant 0 : i32
    %c0_i32_0 = arith.constant 0 : i32
    %c0_i32_1 = arith.constant 0 : i32
    return %c0_i32, %c0_i32_0 : i32, i32
  }
  func.func @transform_4(%arg0: i32, %arg1: i32) -> (i32, i32) {
    %c0_i32 = arith.constant 0 : i32
    %c0_i32_0 = arith.constant 0 : i32
    %c0_i32_1 = arith.constant 0 : i32
    return %c0_i32, %c0_i32_0 : i32, i32
  }
  func.func @transform_5(%arg0: i32, %arg1: i32) -> (i32, i32) {
    %c0_i32 = arith.constant 0 : i32
    %c0_i32_0 = arith.constant 0 : i32
    %c0_i32_1 = arith.constant 0 : i32
    return %c0_i32, %c0_i32_0 : i32, i32
  }
  func.func @transform_6(%arg0: i32, %arg1: i32) -> (i32, i32) {
    %c0_i32 = arith.constant 0 : i32
    %c0_i32_0 = arith.constant 0 : i32
    %c0_i32_1 = arith.constant 0 : i32
    return %c0_i32, %c0_i32_0 : i32, i32
  }
  func.func @transform_7(%arg0: i32, %arg1: i32) -> (i32, i32) {
    %c0_i32 = arith.constant 0 : i32
    %c0_i32_0 = arith.constant 0 : i32
    %c0_i32_1 = arith.constant 0 : i32
    return %c0_i32, %c0_i32_0 : i32, i32
  }
  func.func @transform_8(%arg0: i32, %arg1: i32) -> (i32, i32) {
    %c0_i32 = arith.constant 0 : i32
    %c0_i32_0 = arith.constant 0 : i32
    %c0_i32_1 = arith.constant 0 : i32
    return %c0_i32, %c0_i32_0 : i32, i32
  }
  func.func @transform_9(%arg0: i32, %arg1: i32) -> (i32, i32) {
    %c0_i32 = arith.constant 0 : i32
    %c0_i32_0 = arith.constant 0 : i32
    %c0_i32_1 = arith.constant 0 : i32
    return %c0_i32, %c0_i32_0 : i32, i32
  }
  func.func @transform_10(%arg0: i32, %arg1: i32) -> (i32, i32) {
    %c0_i32 = arith.constant 0 : i32
    %c0_i32_0 = arith.constant 0 : i32
    %c0_i32_1 = arith.constant 0 : i32
    return %c0_i32, %c0_i32_0 : i32, i32
  }
  func.func @transform_11(%arg0: i32, %arg1: i32) -> (i32, i32, i32) {
    %c0_i32 = arith.constant 0 : i32
    %c0_i32_0 = arith.constant 0 : i32
    %c0_i32_1 = arith.constant 0 : i32
    return %arg1, %c0_i32, %c0_i32_0 : i32, i32, i32
  }
  func.func @transform_12(%arg0: i32, %arg1: i32) -> (i32, i32, i32) {
    %c0_i32 = arith.constant 0 : i32
    %c0_i32_0 = arith.constant 0 : i32
    %c0_i32_1 = arith.constant 0 : i32
    return %arg1, %c0_i32, %c0_i32_0 : i32, i32, i32
  }
  func.func @transform_13(%arg0: i32, %arg1: i32) -> (i32, i32, i32) {
    %c0_i32 = arith.constant 0 : i32
    %c0_i32_0 = arith.constant 0 : i32
    %c0_i32_1 = arith.constant 0 : i32
    return %arg1, %c0_i32, %c0_i32_0 : i32, i32, i32
  }
  func.func @transform_14(%arg0: i32, %arg1: i32) -> (i32, i32, i32) {
    %c0_i32 = arith.constant 0 : i32
    %c0_i32_0 = arith.constant 0 : i32
    %c0_i32_1 = arith.constant 0 : i32
    return %arg1, %c0_i32, %c0_i32_0 : i32, i32, i32
  }
  func.func @transform_15(%arg0: i32, %arg1: i32) -> (i32, i32, i32) {
    %c0_i32 = arith.constant 0 : i32
    %c0_i32_0 = arith.constant 0 : i32
    %c0_i32_1 = arith.constant 0 : i32
    return %arg1, %c0_i32, %c0_i32_0 : i32, i32, i32
  }
  func.func @transform_16(%arg0: i32, %arg1: i32) -> (i32, i32, i32) {
    %c0_i32 = arith.constant 0 : i32
    %c0_i32_0 = arith.constant 0 : i32
    %c0_i32_1 = arith.constant 0 : i32
    return %arg1, %c0_i32, %c0_i32_0 : i32, i32, i32
  }
  func.func @transform_17(%arg0: i32, %arg1: i32) -> (i32, i32, i32) {
    %c0_i32 = arith.constant 0 : i32
    %c0_i32_0 = arith.constant 0 : i32
    %c0_i32_1 = arith.constant 0 : i32
    return %arg1, %c0_i32, %c0_i32_0 : i32, i32, i32
  }
  func.func @transform_18(%arg0: i32, %arg1: i32) -> (i32, i32, i32) {
    %c0_i32 = arith.constant 0 : i32
    %c0_i32_0 = arith.constant 0 : i32
    %c0_i32_1 = arith.constant 0 : i32
    return %arg1, %c0_i32, %c0_i32_0 : i32, i32, i32
  }
  func.func @transform_19(%arg0: i32, %arg1: i32) -> (i32, i32, i32) {
    %c0_i32 = arith.constant 0 : i32
    %c0_i32_0 = arith.constant 0 : i32
    %c0_i32_1 = arith.constant 0 : i32
    return %arg1, %c0_i32, %c0_i32_0 : i32, i32, i32
  }
  func.func @transform_20(%arg0: i32, %arg1: i32) -> (i32, i32, i32) {
    %c0_i32 = arith.constant 0 : i32
    %c0_i32_0 = arith.constant 0 : i32
    %c0_i32_1 = arith.constant 0 : i32
    return %arg1, %c0_i32, %c0_i32_0 : i32, i32, i32
  }
  func.func @transform_21(%arg0: i32, %arg1: i32) -> (i32, i32, i32) {
    %c0_i32 = arith.constant 0 : i32
    %c0_i32_0 = arith.constant 0 : i32
    %c0_i32_1 = arith.constant 0 : i32
    return %arg1, %c0_i32, %c0_i32_0 : i32, i32, i32
  }
  func.func @transform_22(%arg0: i32, %arg1: i32) -> (i32, i32, i32) {
    %c0_i32 = arith.constant 0 : i32
    %c0_i32_0 = arith.constant 0 : i32
    %c0_i32_1 = arith.constant 0 : i32
    return %arg1, %c0_i32, %c0_i32_0 : i32, i32, i32
  }
  func.func @transform_23(%arg0: i32, %arg1: i32) -> (i32, i32, i32) {
    %c0_i32 = arith.constant 0 : i32
    %c0_i32_0 = arith.constant 0 : i32
    %c0_i32_1 = arith.constant 0 : i32
    return %arg1, %c0_i32, %c0_i32_0 : i32, i32, i32
  }
  func.func @transform_24(%arg0: i32, %arg1: i32) -> (i32, i32, i32) {
    %c0_i32 = arith.constant 0 : i32
    %c0_i32_0 = arith.constant 0 : i32
    %c0_i32_1 = arith.constant 0 : i32
    return %arg1, %c0_i32, %c0_i32_0 : i32, i32, i32
  }
  func.func @transform_25(%arg0: i32, %arg1: i32) -> (i32, i32, i32) {
    %c0_i32 = arith.constant 0 : i32
    %c0_i32_0 = arith.constant 0 : i32
    %c0_i32_1 = arith.constant 0 : i32
    return %arg1, %c0_i32, %c0_i32_0 : i32, i32, i32
  }
  func.func @transform_26(%arg0: i32, %arg1: i32) -> (i32, i32, i32) {
    %c0_i32 = arith.constant 0 : i32
    %c0_i32_0 = arith.constant 0 : i32
    %c0_i32_1 = arith.constant 0 : i32
    return %arg1, %c0_i32, %c0_i32_0 : i32, i32, i32
  }
  func.func @transform_27(%arg0: i32, %arg1: i32) -> (i32, i32, i32) {
    %c0_i32 = arith.constant 0 : i32
    %c0_i32_0 = arith.constant 0 : i32
    %c0_i32_1 = arith.constant 0 : i32
    return %arg0, %c0_i32, %c0_i32_0 : i32, i32, i32
  }
}

module attributes {stable_mosaic.version = 11 : i64} {
  func.func @_decoder_kernel(%arg0: i32, %arg1: i32, %arg2: memref<1x1x32xf32, #tpu.memory_space<vmem>>, %arg3: memref<1x1x32xf32, #tpu.memory_space<vmem>>, %arg4: memref<32x32xf32, #tpu.memory_space<vmem>>, %arg5: memref<8x32xbf16, #tpu.memory_space<vmem>>, %arg6: memref<32x32xbf16, #tpu.memory_space<vmem>>, %arg7: memref<32x32xbf16, #tpu.memory_space<vmem>>, %arg8: memref<1x32xf32, #tpu.memory_space<vmem>>, %arg9: memref<1x32xf32, #tpu.memory_space<vmem>>, %arg10: memref<1x1xf32, #tpu.memory_space<vmem>>, %arg11: memref<32x128xbf16, #tpu.memory_space<vmem>>, %arg12: memref<1x128xf32, #tpu.memory_space<vmem>>, %arg13: memref<1x32x32xbf16, #tpu.memory_space<vmem>>, %arg14: memref<1x1x32xf32, #tpu.memory_space<vmem>>, %arg15: memref<1x32x32xbf16, #tpu.memory_space<vmem>>, %arg16: memref<1x1x32xf32, #tpu.memory_space<vmem>>, %arg17: memref<1x32x32xbf16, #tpu.memory_space<vmem>>, %arg18: memref<1x1x32xf32, #tpu.memory_space<vmem>>, %arg19: memref<1x32x32xbf16, #tpu.memory_space<vmem>>, %arg20: memref<1x1x32xf32, #tpu.memory_space<vmem>>, %arg21: memref<1x32x16xbf16, #tpu.memory_space<vmem>>, %arg22: memref<1x1x16xf32, #tpu.memory_space<vmem>>, %arg23: memref<1x16x32xbf16, #tpu.memory_space<vmem>>, %arg24: memref<1x1x32xf32, #tpu.memory_space<vmem>>, %arg25: memref<1x1x32xf32, #tpu.memory_space<vmem>>, %arg26: memref<1x1x32xf32, #tpu.memory_space<vmem>>, %arg27: memref<1x1x32xf32, #tpu.memory_space<vmem>>, %arg28: memref<1x1x32xf32, #tpu.memory_space<vmem>>, %arg29: memref<1x1x1xf32, #tpu.memory_space<vmem>>, %arg30: memref<1x8x128xf32, #tpu.memory_space<vmem>>, %arg31: memref<8x32xf32, #tpu.memory_space<vmem>>, %arg32: memref<32x8xf32, #tpu.memory_space<vmem>>, %arg33: memref<32x8xf32, #tpu.memory_space<vmem>>, %arg34: memref<32x8xf32, #tpu.memory_space<vmem>>, %arg35: memref<8x32xf32, #tpu.memory_space<vmem>>) attributes {dimension_semantics = [#tpu.dimension_semantics<parallel>, #tpu.dimension_semantics<arbitrary>], iteration_bounds = array<i64: 2, 2>, scalar_prefetch = 0 : i64, scratch_operands = 5 : i64, tpu.core_type = #tpu.core_type<tc>, window_params = [{transform_indices = @transform_0, window_bounds = array<i64: 1, 1, 32>}, {transform_indices = @transform_1, window_bounds = array<i64: 1, 1, 32>}, {pipeline_mode = #tpu.pipeline_mode<synchronous>, transform_indices = @transform_2, window_bounds = array<i64: 32, 32>}, {pipeline_mode = #tpu.pipeline_mode<synchronous>, transform_indices = @transform_3, window_bounds = array<i64: 8, 32>}, {pipeline_mode = #tpu.pipeline_mode<synchronous>, transform_indices = @transform_4, window_bounds = array<i64: 32, 32>}, {pipeline_mode = #tpu.pipeline_mode<synchronous>, transform_indices = @transform_5, window_bounds = array<i64: 32, 32>}, {pipeline_mode = #tpu.pipeline_mode<synchronous>, transform_indices = @transform_6, window_bounds = array<i64: 1, 32>}, {pipeline_mode = #tpu.pipeline_mode<synchronous>, transform_indices = @transform_7, window_bounds = array<i64: 1, 32>}, {pipeline_mode = #tpu.pipeline_mode<synchronous>, transform_indices = @transform_8, window_bounds = array<i64: 1, 1>}, {pipeline_mode = #tpu.pipeline_mode<synchronous>, transform_indices = @transform_9, window_bounds = array<i64: 32, 128>}, {pipeline_mode = #tpu.pipeline_mode<synchronous>, transform_indices = @transform_10, window_bounds = array<i64: 1, 128>}, {transform_indices = @transform_11, window_bounds = array<i64: 1, 32, 32>}, {transform_indices = @transform_12, window_bounds = array<i64: 1, 1, 32>}, {transform_indices = @transform_13, window_bounds = array<i64: 1, 32, 32>}, {transform_indices = @transform_14, window_bounds = array<i64: 1, 1, 32>}, {transform_indices = @transform_15, window_bounds = array<i64: 1, 32, 32>}, {transform_indices = @transform_16, window_bounds = array<i64: 1, 1, 32>}, {transform_indices = @transform_17, window_bounds = array<i64: 1, 32, 32>}, {transform_indices = @transform_18, window_bounds = array<i64: 1, 1, 32>}, {transform_indices = @transform_19, window_bounds = array<i64: 1, 32, 16>}, {transform_indices = @transform_20, window_bounds = array<i64: 1, 1, 16>}, {transform_indices = @transform_21, window_bounds = array<i64: 1, 16, 32>}, {transform_indices = @transform_22, window_bounds = array<i64: 1, 1, 32>}, {transform_indices = @transform_23, window_bounds = array<i64: 1, 1, 32>}, {transform_indices = @transform_24, window_bounds = array<i64: 1, 1, 32>}, {transform_indices = @transform_25, window_bounds = array<i64: 1, 1, 32>}, {transform_indices = @transform_26, window_bounds = array<i64: 1, 1, 32>}, {transform_indices = @transform_27, window_bounds = array<i64: 1, 1, 1>}, {transform_indices = @transform_28, window_bounds = array<i64: 1, 8, 128>}]} {
    %c0_i32 = arith.constant 0 : i32
    %0 = arith.cmpi eq, %arg1, %c0_i32 : i32
    %1 = arith.extui %0 : i1 to i32
    %c0_i32_0 = arith.constant 0 : i32
    %2 = arith.cmpi ne, %1, %c0_i32_0 : i32
    scf.if %2 {
      %c0_116 = arith.constant 0 : index
      %c0_117 = arith.constant 0 : index
      %c0_118 = arith.constant 0 : index
      %169 = vector.load %arg2[%c0_116, %c0_117, %c0_118] : memref<1x1x32xf32, #tpu.memory_space<vmem>>, vector<1x1x32xf32>
      %170 = vector.shape_cast %169 : vector<1x1x32xf32> to vector<1x32xf32>
      %171 = arith.truncf %170 : vector<1x32xf32> to vector<1x32xbf16>
      %c0_119 = arith.constant 0 : index
      %c0_120 = arith.constant 0 : index
      %172 = vector.load %arg6[%c0_119, %c0_120] : memref<32x32xbf16, #tpu.memory_space<vmem>>, vector<32x32xbf16>
      %cst_121 = arith.constant dense<0.000000e+00> : vector<1x32xf32>
      %173 = tpu.matmul %171, %172, %cst_121 {dimension_numbers = #tpu.dot_dimension_numbers<[1], [0], [0], [1], [0, 0, 1, 1], [], []>} : vector<1x32xbf16>, vector<32x32xbf16>, vector<1x32xf32> -> vector<1x32xf32>
      %c0_122 = arith.constant 0 : index
      %c0_123 = arith.constant 0 : index
      %174 = vector.load %arg8[%c0_122, %c0_123] : memref<1x32xf32, #tpu.memory_space<vmem>>, vector<1x32xf32>
      %175 = arith.addf %173, %174 : vector<1x32xf32>
      %c0_124 = arith.constant 0 : index
      %c0_125 = arith.constant 0 : index
      %176 = vector.load %arg5[%c0_124, %c0_125] : memref<8x32xbf16, #tpu.memory_space<vmem>>, vector<8x32xbf16>
      %c0_126 = arith.constant 0 : index
      %c0_127 = arith.constant 0 : index
      %177 = vector.load %arg7[%c0_126, %c0_127] : memref<32x32xbf16, #tpu.memory_space<vmem>>, vector<32x32xbf16>
      %cst_128 = arith.constant dense<0.000000e+00> : vector<8x32xf32>
      %178 = tpu.matmul %176, %177, %cst_128 {dimension_numbers = #tpu.dot_dimension_numbers<[1], [0], [0], [1], [0, 0, 1, 1], [], []>} : vector<8x32xbf16>, vector<32x32xbf16>, vector<8x32xf32> -> vector<8x32xf32>
      %179 = vector.broadcast %175 : vector<1x32xf32> to vector<8x32xf32>
      %180 = arith.addf %179, %178 : vector<8x32xf32>
      %cst_129 = arith.constant 0.000000e+00 : f32
      %181 = vector.broadcast %cst_129 : f32 to vector<8x32xf32>
      %182 = arith.maximumf %180, %181 : vector<8x32xf32>
      %c0_130 = arith.constant 0 : index
      %c0_131 = arith.constant 0 : index
      %183 = vector.load %arg31[%c0_130, %c0_131] : memref<8x32xf32, #tpu.memory_space<vmem>>, vector<8x32xf32>
      tpu.vector_store %arg31[%c0_130, %c0_131], %182 {strides = array<i32>} : memref<8x32xf32, #tpu.memory_space<vmem>>, vector<8x32xf32>,
      %c0_132 = arith.constant 0 : index
      %c0_133 = arith.constant 0 : index
      %184 = vector.load %arg9[%c0_132, %c0_133] : memref<1x32xf32, #tpu.memory_space<vmem>>, vector<1x32xf32>
      %185 = arith.mulf %170, %184 : vector<1x32xf32>
      %cst_134 = arith.constant dense<0.000000e+00> : vector<1xf32>
      %186 = vector.multi_reduction <add>, %185, %cst_134 [1] : vector<1x32xf32> to vector<1xf32>
      %187 = vector.shape_cast %186 : vector<1xf32> to vector<1x1xf32>
      %c0_135 = arith.constant 0 : index
      %c0_136 = arith.constant 0 : index
      %188 = vector.load %arg10[%c0_135, %c0_136] : memref<1x1xf32, #tpu.memory_space<vmem>>, vector<1x1xf32>
      %189 = arith.addf %187, %188 : vector<1x1xf32>
      %c0_137 = arith.constant 0 : index
      %c0_138 = arith.constant 0 : index
      %c0_139 = arith.constant 0 : index
      %190 = vector.load %arg29[%c0_137, %c0_138, %c0_139] : memref<1x1x1xf32, #tpu.memory_space<vmem>>, vector<1x1x1xf32>
      %191 = vector.shape_cast %190 : vector<1x1x1xf32> to vector<1x1xf32>
      %192 = vector.shape_cast %189 : vector<1x1xf32> to vector<1x1x1xf32>
      tpu.vector_store %arg29[%c0_137, %c0_138, %c0_139], %192 {strides = array<i32>} : memref<1x1x1xf32, #tpu.memory_space<vmem>>, vector<1x1x1xf32>,
    } else {
    }
    %c0 = arith.constant 0 : index
    %c0_1 = arith.constant 0 : index
    %3 = vector.load %arg31[%c0, %c0_1] : memref<8x32xf32, #tpu.memory_space<vmem>>, vector<8x32xf32>
    %c0_2 = arith.constant 0 : index
    %c0_3 = arith.constant 0 : index
    %c0_4 = arith.constant 0 : index
    %4 = vector.load %arg3[%c0_2, %c0_3, %c0_4] : memref<1x1x32xf32, #tpu.memory_space<vmem>>, vector<1x1x32xf32>
    %5 = vector.shape_cast %4 : vector<1x1x32xf32> to vector<1x32xf32>
    %c0_5 = arith.constant 0 : index
    %c0_6 = arith.constant 0 : index
    %6 = vector.load %arg4[%c0_5, %c0_6] : memref<32x32xf32, #tpu.memory_space<vmem>>, vector<32x32xf32>
    %7 = arith.truncf %3 : vector<8x32xf32> to vector<8x32xbf16>
    %c0_7 = arith.constant 0 : index
    %c0_8 = arith.constant 0 : index
    %c0_9 = arith.constant 0 : index
    %8 = vector.load %arg13[%c0_7, %c0_8, %c0_9] : memref<1x32x32xbf16, #tpu.memory_space<vmem>>, vector<1x32x32xbf16>
    %9 = vector.shape_cast %8 : vector<1x32x32xbf16> to vector<32x32xbf16>
    %cst = arith.constant dense<0.000000e+00> : vector<8x32xf32>
    %10 = tpu.matmul %7, %9, %cst {dimension_numbers = #tpu.dot_dimension_numbers<[1], [0], [0], [1], [0, 0, 1, 1], [], []>} : vector<8x32xbf16>, vector<32x32xbf16>, vector<8x32xf32> -> vector<8x32xf32>
    %c0_10 = arith.constant 0 : index
    %c0_11 = arith.constant 0 : index
    %c0_12 = arith.constant 0 : index
    %11 = vector.load %arg14[%c0_10, %c0_11, %c0_12] : memref<1x1x32xf32, #tpu.memory_space<vmem>>, vector<1x1x32xf32>
    %12 = vector.shape_cast %11 : vector<1x1x32xf32> to vector<1x32xf32>
    %13 = vector.broadcast %12 : vector<1x32xf32> to vector<8x32xf32>
    %14 = arith.addf %10, %13 : vector<8x32xf32>
    %cst_13 = arith.constant 0.353553385 : f32
    %15 = vector.broadcast %cst_13 : f32 to vector<8x32xf32>
    %16 = arith.mulf %14, %15 : vector<8x32xf32>
    %c0_14 = arith.constant 0 : index
    %c0_15 = arith.constant 0 : index
    %c0_16 = arith.constant 0 : index
    %17 = vector.load %arg15[%c0_14, %c0_15, %c0_16] : memref<1x32x32xbf16, #tpu.memory_space<vmem>>, vector<1x32x32xbf16>
    %18 = vector.shape_cast %17 : vector<1x32x32xbf16> to vector<32x32xbf16>
    %cst_17 = arith.constant dense<0.000000e+00> : vector<8x32xf32>
    %19 = tpu.matmul %7, %18, %cst_17 {dimension_numbers = #tpu.dot_dimension_numbers<[1], [0], [0], [1], [0, 0, 1, 1], [], []>} : vector<8x32xbf16>, vector<32x32xbf16>, vector<8x32xf32> -> vector<8x32xf32>
    %c0_18 = arith.constant 0 : index
    %c0_19 = arith.constant 0 : index
    %c0_20 = arith.constant 0 : index
    %20 = vector.load %arg16[%c0_18, %c0_19, %c0_20] : memref<1x1x32xf32, #tpu.memory_space<vmem>>, vector<1x1x32xf32>
    %21 = vector.shape_cast %20 : vector<1x1x32xf32> to vector<1x32xf32>
    %22 = vector.broadcast %21 : vector<1x32xf32> to vector<8x32xf32>
    %23 = arith.addf %19, %22 : vector<8x32xf32>
    %c0_21 = arith.constant 0 : index
    %c0_22 = arith.constant 0 : index
    %c0_23 = arith.constant 0 : index
    %24 = vector.load %arg17[%c0_21, %c0_22, %c0_23] : memref<1x32x32xbf16, #tpu.memory_space<vmem>>, vector<1x32x32xbf16>
    %25 = vector.shape_cast %24 : vector<1x32x32xbf16> to vector<32x32xbf16>
    %cst_24 = arith.constant dense<0.000000e+00> : vector<8x32xf32>
    %26 = tpu.matmul %7, %25, %cst_24 {dimension_numbers = #tpu.dot_dimension_numbers<[1], [0], [0], [1], [0, 0, 1, 1], [], []>} : vector<8x32xbf16>, vector<32x32xbf16>, vector<8x32xf32> -> vector<8x32xf32>
    %c0_25 = arith.constant 0 : index
    %c0_26 = arith.constant 0 : index
    %c0_27 = arith.constant 0 : index
    %27 = vector.load %arg18[%c0_25, %c0_26, %c0_27] : memref<1x1x32xf32, #tpu.memory_space<vmem>>, vector<1x1x32xf32>
    %28 = vector.shape_cast %27 : vector<1x1x32xf32> to vector<1x32xf32>
    %29 = vector.broadcast %28 : vector<1x32xf32> to vector<8x32xf32>
    %30 = arith.addf %26, %29 : vector<8x32xf32>
    %31 = vector.extract_strided_slice %16 {offsets = [0, 0], sizes = [8, 8], strides = [1, 1]} : vector<8x32xf32> to vector<8x8xf32>
    %c0_28 = arith.constant 0 : index
    %c0_29 = arith.constant 0 : index
    %32 = vector.load %arg32[%c0_28, %c0_29] : memref<32x8xf32, #tpu.memory_space<vmem>>, vector<8x8xf32>
    tpu.vector_store %arg32[%c0_28, %c0_29], %31 {strides = array<i32>} : memref<32x8xf32, #tpu.memory_space<vmem>>, vector<8x8xf32>,
    %33 = vector.extract_strided_slice %23 {offsets = [0, 0], sizes = [8, 8], strides = [1, 1]} : vector<8x32xf32> to vector<8x8xf32>
    %c0_30 = arith.constant 0 : index
    %c0_31 = arith.constant 0 : index
    %34 = vector.load %arg33[%c0_30, %c0_31] : memref<32x8xf32, #tpu.memory_space<vmem>>, vector<8x8xf32>
    tpu.vector_store %arg33[%c0_30, %c0_31], %33 {strides = array<i32>} : memref<32x8xf32, #tpu.memory_space<vmem>>, vector<8x8xf32>,
    %35 = vector.extract_strided_slice %30 {offsets = [0, 0], sizes = [8, 8], strides = [1, 1]} : vector<8x32xf32> to vector<8x8xf32>
    %c0_32 = arith.constant 0 : index
    %c0_33 = arith.constant 0 : index
    %36 = vector.load %arg34[%c0_32, %c0_33] : memref<32x8xf32, #tpu.memory_space<vmem>>, vector<8x8xf32>
    tpu.vector_store %arg34[%c0_32, %c0_33], %35 {strides = array<i32>} : memref<32x8xf32, #tpu.memory_space<vmem>>, vector<8x8xf32>,
    %37 = vector.extract_strided_slice %16 {offsets = [0, 8], sizes = [8, 8], strides = [1, 1]} : vector<8x32xf32> to vector<8x8xf32>
    %c8 = arith.constant 8 : index
    %c0_34 = arith.constant 0 : index
    %38 = vector.load %arg32[%c8, %c0_34] : memref<32x8xf32, #tpu.memory_space<vmem>>, vector<8x8xf32>
    tpu.vector_store %arg32[%c8, %c0_34], %37 {strides = array<i32>} : memref<32x8xf32, #tpu.memory_space<vmem>>, vector<8x8xf32>,
    %39 = vector.extract_strided_slice %23 {offsets = [0, 8], sizes = [8, 8], strides = [1, 1]} : vector<8x32xf32> to vector<8x8xf32>
    %c8_35 = arith.constant 8 : index
    %c0_36 = arith.constant 0 : index
    %40 = vector.load %arg33[%c8_35, %c0_36] : memref<32x8xf32, #tpu.memory_space<vmem>>, vector<8x8xf32>
    tpu.vector_store %arg33[%c8_35, %c0_36], %39 {strides = array<i32>} : memref<32x8xf32, #tpu.memory_space<vmem>>, vector<8x8xf32>,
    %41 = vector.extract_strided_slice %30 {offsets = [0, 8], sizes = [8, 8], strides = [1, 1]} : vector<8x32xf32> to vector<8x8xf32>
    %c8_37 = arith.constant 8 : index
    %c0_38 = arith.constant 0 : index
    %42 = vector.load %arg34[%c8_37, %c0_38] : memref<32x8xf32, #tpu.memory_space<vmem>>, vector<8x8xf32>
    tpu.vector_store %arg34[%c8_37, %c0_38], %41 {strides = array<i32>} : memref<32x8xf32, #tpu.memory_space<vmem>>, vector<8x8xf32>,
    %43 = vector.extract_strided_slice %16 {offsets = [0, 16], sizes = [8, 8], strides = [1, 1]} : vector<8x32xf32> to vector<8x8xf32>
    %c16 = arith.constant 16 : index
    %c0_39 = arith.constant 0 : index
    %44 = vector.load %arg32[%c16, %c0_39] : memref<32x8xf32, #tpu.memory_space<vmem>>, vector<8x8xf32>
    tpu.vector_store %arg32[%c16, %c0_39], %43 {strides = array<i32>} : memref<32x8xf32, #tpu.memory_space<vmem>>, vector<8x8xf32>,
    %45 = vector.extract_strided_slice %23 {offsets = [0, 16], sizes = [8, 8], strides = [1, 1]} : vector<8x32xf32> to vector<8x8xf32>
    %c16_40 = arith.constant 16 : index
    %c0_41 = arith.constant 0 : index
    %46 = vector.load %arg33[%c16_40, %c0_41] : memref<32x8xf32, #tpu.memory_space<vmem>>, vector<8x8xf32>
    tpu.vector_store %arg33[%c16_40, %c0_41], %45 {strides = array<i32>} : memref<32x8xf32, #tpu.memory_space<vmem>>, vector<8x8xf32>,
    %47 = vector.extract_strided_slice %30 {offsets = [0, 16], sizes = [8, 8], strides = [1, 1]} : vector<8x32xf32> to vector<8x8xf32>
    %c16_42 = arith.constant 16 : index
    %c0_43 = arith.constant 0 : index
    %48 = vector.load %arg34[%c16_42, %c0_43] : memref<32x8xf32, #tpu.memory_space<vmem>>, vector<8x8xf32>
    tpu.vector_store %arg34[%c16_42, %c0_43], %47 {strides = array<i32>} : memref<32x8xf32, #tpu.memory_space<vmem>>, vector<8x8xf32>,
    %49 = vector.extract_strided_slice %16 {offsets = [0, 24], sizes = [8, 8], strides = [1, 1]} : vector<8x32xf32> to vector<8x8xf32>
    %c24 = arith.constant 24 : index
    %c0_44 = arith.constant 0 : index
    %50 = vector.load %arg32[%c24, %c0_44] : memref<32x8xf32, #tpu.memory_space<vmem>>, vector<8x8xf32>
    tpu.vector_store %arg32[%c24, %c0_44], %49 {strides = array<i32>} : memref<32x8xf32, #tpu.memory_space<vmem>>, vector<8x8xf32>,
    %51 = vector.extract_strided_slice %23 {offsets = [0, 24], sizes = [8, 8], strides = [1, 1]} : vector<8x32xf32> to vector<8x8xf32>
    %c24_45 = arith.constant 24 : index
    %c0_46 = arith.constant 0 : index
    %52 = vector.load %arg33[%c24_45, %c0_46] : memref<32x8xf32, #tpu.memory_space<vmem>>, vector<8x8xf32>
    tpu.vector_store %arg33[%c24_45, %c0_46], %51 {strides = array<i32>} : memref<32x8xf32, #tpu.memory_space<vmem>>, vector<8x8xf32>,
    %53 = vector.extract_strided_slice %30 {offsets = [0, 24], sizes = [8, 8], strides = [1, 1]} : vector<8x32xf32> to vector<8x8xf32>
    %c24_47 = arith.constant 24 : index
    %c0_48 = arith.constant 0 : index
    %54 = vector.load %arg34[%c24_47, %c0_48] : memref<32x8xf32, #tpu.memory_space<vmem>>, vector<8x8xf32>
    tpu.vector_store %arg34[%c24_47, %c0_48], %53 {strides = array<i32>} : memref<32x8xf32, #tpu.memory_space<vmem>>, vector<8x8xf32>,
    %c0_49 = arith.constant 0 : index
    %c0_50 = arith.constant 0 : index
    %55 = vector.load %arg32[%c0_49, %c0_50] : memref<32x8xf32, #tpu.memory_space<vmem>>, vector<32x8xf32>
    %56 = arith.truncf %55 : vector<32x8xf32> to vector<32x8xbf16>
    %c0_51 = arith.constant 0 : index
    %c0_52 = arith.constant 0 : index
    %57 = vector.load %arg33[%c0_51, %c0_52] : memref<32x8xf32, #tpu.memory_space<vmem>>, vector<32x8xf32>
    %58 = arith.truncf %57 : vector<32x8xf32> to vector<32x8xbf16>
    %c0_53 = arith.constant 0 : index
    %c0_54 = arith.constant 0 : index
    %59 = vector.load %arg34[%c0_53, %c0_54] : memref<32x8xf32, #tpu.memory_space<vmem>>, vector<32x8xf32>
    %60 = arith.truncf %59 : vector<32x8xf32> to vector<32x8xbf16>
    %cst_55 = arith.constant dense<0.000000e+00> : vector<32x32xf32>
    %61 = tpu.matmul %56, %58, %cst_55 {dimension_numbers = #tpu.dot_dimension_numbers<[1], [1], [0], [0], [0, 0, 1, 0], [], []>} : vector<32x8xbf16>, vector<32x8xbf16>, vector<32x32xf32> -> vector<32x32xf32>
    %62 = arith.addf %61, %6 : vector<32x32xf32>
    %63 = vector.broadcast %5 : vector<1x32xf32> to vector<32x32xf32>
    %64 = arith.addf %62, %63 : vector<32x32xf32>
    %cst_56 = arith.constant dense<0xFF800000> : vector<32xf32>
    %65 = vector.multi_reduction <maximumf>, %64, %cst_56 [1] : vector<32x32xf32> to vector<32xf32>
    %66 = vector.shape_cast %65 : vector<32xf32> to vector<32x1xf32>
    %67 = vector.broadcast %66 : vector<32x1xf32> to vector<32x32xf32>
    %68 = arith.subf %64, %67 : vector<32x32xf32>
    %69 = math.exp %68 : vector<32x32xf32>
    %cst_57 = arith.constant dense<0.000000e+00> : vector<32xf32>
    %70 = vector.multi_reduction <add>, %69, %cst_57 [1] : vector<32x32xf32> to vector<32xf32>
    %71 = vector.shape_cast %70 : vector<32xf32> to vector<32x1xf32>
    %72 = vector.broadcast %71 : vector<32x1xf32> to vector<32x32xf32>
    %73 = arith.divf %69, %72 : vector<32x32xf32>
    %74 = arith.truncf %73 : vector<32x32xf32> to vector<32x32xbf16>
    %cst_58 = arith.constant dense<0.000000e+00> : vector<32x8xf32>
    %75 = tpu.matmul %74, %60, %cst_58 {dimension_numbers = #tpu.dot_dimension_numbers<[1], [0], [0], [1], [0, 0, 1, 1], [], []>} : vector<32x32xbf16>, vector<32x8xbf16>, vector<32x8xf32> -> vector<32x8xf32>
    %76 = vector.extract_strided_slice %75 {offsets = [0, 0], sizes = [8, 8], strides = [1, 1]} : vector<32x8xf32> to vector<8x8xf32>
    %c0_59 = arith.constant 0 : index
    %c0_60 = arith.constant 0 : index
    %77 = vector.load %arg35[%c0_59, %c0_60] : memref<8x32xf32, #tpu.memory_space<vmem>>, vector<8x8xf32>
    tpu.vector_store %arg35[%c0_59, %c0_60], %76 {strides = array<i32>} : memref<8x32xf32, #tpu.memory_space<vmem>>, vector<8x8xf32>,
    %78 = vector.extract_strided_slice %75 {offsets = [8, 0], sizes = [8, 8], strides = [1, 1]} : vector<32x8xf32> to vector<8x8xf32>
    %c0_61 = arith.constant 0 : index
    %c8_62 = arith.constant 8 : index
    %79 = vector.load %arg35[%c0_61, %c8_62] : memref<8x32xf32, #tpu.memory_space<vmem>>, vector<8x8xf32>
    tpu.vector_store %arg35[%c0_61, %c8_62], %78 {strides = array<i32>} : memref<8x32xf32, #tpu.memory_space<vmem>>, vector<8x8xf32>,
    %80 = vector.extract_strided_slice %75 {offsets = [16, 0], sizes = [8, 8], strides = [1, 1]} : vector<32x8xf32> to vector<8x8xf32>
    %c0_63 = arith.constant 0 : index
    %c16_64 = arith.constant 16 : index
    %81 = vector.load %arg35[%c0_63, %c16_64] : memref<8x32xf32, #tpu.memory_space<vmem>>, vector<8x8xf32>
    tpu.vector_store %arg35[%c0_63, %c16_64], %80 {strides = array<i32>} : memref<8x32xf32, #tpu.memory_space<vmem>>, vector<8x8xf32>,
    %82 = vector.extract_strided_slice %75 {offsets = [24, 0], sizes = [8, 8], strides = [1, 1]} : vector<32x8xf32> to vector<8x8xf32>
    %c0_65 = arith.constant 0 : index
    %c24_66 = arith.constant 24 : index
    %83 = vector.load %arg35[%c0_65, %c24_66] : memref<8x32xf32, #tpu.memory_space<vmem>>, vector<8x8xf32>
    tpu.vector_store %arg35[%c0_65, %c24_66], %82 {strides = array<i32>} : memref<8x32xf32, #tpu.memory_space<vmem>>, vector<8x8xf32>,
    %c0_67 = arith.constant 0 : index
    %c0_68 = arith.constant 0 : index
    %84 = vector.load %arg35[%c0_67, %c0_68] : memref<8x32xf32, #tpu.memory_space<vmem>>, vector<8x32xf32>
    %85 = arith.truncf %84 : vector<8x32xf32> to vector<8x32xbf16>
    %c0_69 = arith.constant 0 : index
    %c0_70 = arith.constant 0 : index
    %c0_71 = arith.constant 0 : index
    %86 = vector.load %arg19[%c0_69, %c0_70, %c0_71] : memref<1x32x32xbf16, #tpu.memory_space<vmem>>, vector<1x32x32xbf16>
    %87 = vector.shape_cast %86 : vector<1x32x32xbf16> to vector<32x32xbf16>
    %cst_72 = arith.constant dense<0.000000e+00> : vector<8x32xf32>
    %88 = tpu.matmul %85, %87, %cst_72 {dimension_numbers = #tpu.dot_dimension_numbers<[1], [0], [0], [1], [0, 0, 1, 1], [], []>} : vector<8x32xbf16>, vector<32x32xbf16>, vector<8x32xf32> -> vector<8x32xf32>
    %c0_73 = arith.constant 0 : index
    %c0_74 = arith.constant 0 : index
    %c0_75 = arith.constant 0 : index
    %89 = vector.load %arg20[%c0_73, %c0_74, %c0_75] : memref<1x1x32xf32, #tpu.memory_space<vmem>>, vector<1x1x32xf32>
    %90 = vector.shape_cast %89 : vector<1x1x32xf32> to vector<1x32xf32>
    %91 = vector.broadcast %90 : vector<1x32xf32> to vector<8x32xf32>
    %92 = arith.addf %88, %91 : vector<8x32xf32>
    %93 = arith.addf %3, %92 : vector<8x32xf32>
    %c0_76 = arith.constant 0 : index
    %c0_77 = arith.constant 0 : index
    %c0_78 = arith.constant 0 : index
    %94 = vector.load %arg25[%c0_76, %c0_77, %c0_78] : memref<1x1x32xf32, #tpu.memory_space<vmem>>, vector<1x1x32xf32>
    %95 = vector.shape_cast %94 : vector<1x1x32xf32> to vector<1x32xf32>
    %c0_79 = arith.constant 0 : index
    %c0_80 = arith.constant 0 : index
    %c0_81 = arith.constant 0 : index
    %96 = vector.load %arg26[%c0_79, %c0_80, %c0_81] : memref<1x1x32xf32, #tpu.memory_space<vmem>>, vector<1x1x32xf32>
    %97 = vector.shape_cast %96 : vector<1x1x32xf32> to vector<1x32xf32>
    %cst_82 = arith.constant dense<0.000000e+00> : vector<8xf32>
    %98 = vector.multi_reduction <add>, %93, %cst_82 [1] : vector<8x32xf32> to vector<8xf32>
    %99 = vector.shape_cast %98 : vector<8xf32> to vector<8x1xf32>
    %cst_83 = arith.constant 3.200000e+01 : f32
    %100 = vector.broadcast %cst_83 : f32 to vector<8x1xf32>
    %101 = arith.divf %99, %100 : vector<8x1xf32>
    %102 = vector.broadcast %101 : vector<8x1xf32> to vector<8x32xf32>
    %103 = arith.subf %93, %102 : vector<8x32xf32>
    %104 = arith.mulf %103, %103 : vector<8x32xf32>
    %cst_84 = arith.constant dense<0.000000e+00> : vector<8xf32>
    %105 = vector.multi_reduction <add>, %104, %cst_84 [1] : vector<8x32xf32> to vector<8xf32>
    %106 = vector.shape_cast %105 : vector<8xf32> to vector<8x1xf32>
    %cst_85 = arith.constant 3.200000e+01 : f32
    %107 = vector.broadcast %cst_85 : f32 to vector<8x1xf32>
    %108 = arith.divf %106, %107 : vector<8x1xf32>
    %109 = vector.broadcast %101 : vector<8x1xf32> to vector<8x32xf32>
    %110 = arith.subf %93, %109 : vector<8x32xf32>
    %cst_86 = arith.constant 9.99999974E-6 : f32
    %111 = vector.broadcast %cst_86 : f32 to vector<8x1xf32>
    %112 = arith.addf %108, %111 : vector<8x1xf32>
    %113 = math.rsqrt %112 : vector<8x1xf32>
    %114 = vector.broadcast %113 : vector<8x1xf32> to vector<8x32xf32>
    %115 = arith.mulf %110, %114 : vector<8x32xf32>
    %116 = vector.broadcast %95 : vector<1x32xf32> to vector<8x32xf32>
    %117 = arith.mulf %115, %116 : vector<8x32xf32>
    %118 = vector.broadcast %97 : vector<1x32xf32> to vector<8x32xf32>
    %119 = arith.addf %117, %118 : vector<8x32xf32>
    %120 = arith.truncf %119 : vector<8x32xf32> to vector<8x32xbf16>
    %c0_87 = arith.constant 0 : index
    %c0_88 = arith.constant 0 : index
    %c0_89 = arith.constant 0 : index
    %121 = vector.load %arg21[%c0_87, %c0_88, %c0_89] : memref<1x32x16xbf16, #tpu.memory_space<vmem>>, vector<1x32x16xbf16>
    %122 = vector.shape_cast %121 : vector<1x32x16xbf16> to vector<32x16xbf16>
    %cst_90 = arith.constant dense<0.000000e+00> : vector<8x16xf32>
    %123 = tpu.matmul %120, %122, %cst_90 {dimension_numbers = #tpu.dot_dimension_numbers<[1], [0], [0], [1], [0, 0, 1, 1], [], []>} : vector<8x32xbf16>, vector<32x16xbf16>, vector<8x16xf32> -> vector<8x16xf32>
    %c0_91 = arith.constant 0 : index
    %c0_92 = arith.constant 0 : index
    %c0_93 = arith.constant 0 : index
    %124 = vector.load %arg22[%c0_91, %c0_92, %c0_93] : memref<1x1x16xf32, #tpu.memory_space<vmem>>, vector<1x1x16xf32>
    %125 = vector.shape_cast %124 : vector<1x1x16xf32> to vector<1x16xf32>
    %126 = vector.broadcast %125 : vector<1x16xf32> to vector<8x16xf32>
    %127 = arith.addf %123, %126 : vector<8x16xf32>
    %cst_94 = arith.constant 0.000000e+00 : f32
    %128 = vector.broadcast %cst_94 : f32 to vector<8x16xf32>
    %129 = arith.maximumf %127, %128 : vector<8x16xf32>
    %130 = arith.truncf %129 : vector<8x16xf32> to vector<8x16xbf16>
    %c0_95 = arith.constant 0 : index
    %c0_96 = arith.constant 0 : index
    %c0_97 = arith.constant 0 : index
    %131 = vector.load %arg23[%c0_95, %c0_96, %c0_97] : memref<1x16x32xbf16, #tpu.memory_space<vmem>>, vector<1x16x32xbf16>
    %132 = vector.shape_cast %131 : vector<1x16x32xbf16> to vector<16x32xbf16>
    %cst_98 = arith.constant dense<0.000000e+00> : vector<8x32xf32>
    %133 = tpu.matmul %130, %132, %cst_98 {dimension_numbers = #tpu.dot_dimension_numbers<[1], [0], [0], [1], [0, 0, 1, 1], [], []>} : vector<8x16xbf16>, vector<16x32xbf16>, vector<8x32xf32> -> vector<8x32xf32>
    %c0_99 = arith.constant 0 : index
    %c0_100 = arith.constant 0 : index
    %c0_101 = arith.constant 0 : index
    %134 = vector.load %arg24[%c0_99, %c0_100, %c0_101] : memref<1x1x32xf32, #tpu.memory_space<vmem>>, vector<1x1x32xf32>
    %135 = vector.shape_cast %134 : vector<1x1x32xf32> to vector<1x32xf32>
    %136 = vector.broadcast %135 : vector<1x32xf32> to vector<8x32xf32>
    %137 = arith.addf %133, %136 : vector<8x32xf32>
    %138 = arith.addf %119, %137 : vector<8x32xf32>
    %c0_102 = arith.constant 0 : index
    %c0_103 = arith.constant 0 : index
    %c0_104 = arith.constant 0 : index
    %139 = vector.load %arg27[%c0_102, %c0_103, %c0_104] : memref<1x1x32xf32, #tpu.memory_space<vmem>>, vector<1x1x32xf32>
    %140 = vector.shape_cast %139 : vector<1x1x32xf32> to vector<1x32xf32>
    %c0_105 = arith.constant 0 : index
    %c0_106 = arith.constant 0 : index
    %c0_107 = arith.constant 0 : index
    %141 = vector.load %arg28[%c0_105, %c0_106, %c0_107] : memref<1x1x32xf32, #tpu.memory_space<vmem>>, vector<1x1x32xf32>
    %142 = vector.shape_cast %141 : vector<1x1x32xf32> to vector<1x32xf32>
    %cst_108 = arith.constant dense<0.000000e+00> : vector<8xf32>
    %143 = vector.multi_reduction <add>, %138, %cst_108 [1] : vector<8x32xf32> to vector<8xf32>
    %144 = vector.shape_cast %143 : vector<8xf32> to vector<8x1xf32>
    %cst_109 = arith.constant 3.200000e+01 : f32
    %145 = vector.broadcast %cst_109 : f32 to vector<8x1xf32>
    %146 = arith.divf %144, %145 : vector<8x1xf32>
    %147 = vector.broadcast %146 : vector<8x1xf32> to vector<8x32xf32>
    %148 = arith.subf %138, %147 : vector<8x32xf32>
    %149 = arith.mulf %148, %148 : vector<8x32xf32>
    %cst_110 = arith.constant dense<0.000000e+00> : vector<8xf32>
    %150 = vector.multi_reduction <add>, %149, %cst_110 [1] : vector<8x32xf32> to vector<8xf32>
    %151 = vector.shape_cast %150 : vector<8xf32> to vector<8x1xf32>
    %cst_111 = arith.constant 3.200000e+01 : f32
    %152 = vector.broadcast %cst_111 : f32 to vector<8x1xf32>
    %153 = arith.divf %151, %152 : vector<8x1xf32>
    %154 = vector.broadcast %146 : vector<8x1xf32> to vector<8x32xf32>
    %155 = arith.subf %138, %154 : vector<8x32xf32>
    %cst_112 = arith.constant 9.99999974E-6 : f32
    %156 = vector.broadcast %cst_112 : f32 to vector<8x1xf32>
    %157 = arith.addf %153, %156 : vector<8x1xf32>
    %158 = math.rsqrt %157 : vector<8x1xf32>
    %159 = vector.broadcast %158 : vector<8x1xf32> to vector<8x32xf32>
    %160 = arith.mulf %155, %159 : vector<8x32xf32>
    %161 = vector.broadcast %140 : vector<1x32xf32> to vector<8x32xf32>
    %162 = arith.mulf %160, %161 : vector<8x32xf32>
    %163 = vector.broadcast %142 : vector<1x32xf32> to vector<8x32xf32>
    %164 = arith.addf %162, %163 : vector<8x32xf32>
    %c0_113 = arith.constant 0 : index
    %c0_114 = arith.constant 0 : index
    %165 = vector.load %arg31[%c0_113, %c0_114] : memref<8x32xf32, #tpu.memory_space<vmem>>, vector<8x32xf32>
    tpu.vector_store %arg31[%c0_113, %c0_114], %164 {strides = array<i32>} : memref<8x32xf32, #tpu.memory_space<vmem>>, vector<8x32xf32>,
    %c1_i32 = arith.constant 1 : i32
    %166 = arith.cmpi eq, %arg1, %c1_i32 : i32
    %167 = arith.extui %166 : i1 to i32
    %c0_i32_115 = arith.constant 0 : i32
    %168 = arith.cmpi ne, %167, %c0_i32_115 : i32
    scf.if %168 {
      %169 = arith.truncf %164 : vector<8x32xf32> to vector<8x32xbf16>
      %c0_116 = arith.constant 0 : index
      %c0_117 = arith.constant 0 : index
      %170 = vector.load %arg11[%c0_116, %c0_117] : memref<32x128xbf16, #tpu.memory_space<vmem>>, vector<32x128xbf16>
      %cst_118 = arith.constant dense<0.000000e+00> : vector<8x128xf32>
      %171 = tpu.matmul %169, %170, %cst_118 {dimension_numbers = #tpu.dot_dimension_numbers<[1], [0], [0], [1], [0, 0, 1, 1], [], []>} : vector<8x32xbf16>, vector<32x128xbf16>, vector<8x128xf32> -> vector<8x128xf32>
      %c0_119 = arith.constant 0 : index
      %c0_120 = arith.constant 0 : index
      %172 = vector.load %arg12[%c0_119, %c0_120] : memref<1x128xf32, #tpu.memory_space<vmem>>, vector<1x128xf32>
      %173 = vector.broadcast %172 : vector<1x128xf32> to vector<8x128xf32>
      %174 = arith.addf %171, %173 : vector<8x128xf32>
      %175 = tpu.iota {dimensions = array<i32: 1>} : vector<8x128xi32>
      %c16_i32 = arith.constant 16 : i32
      %176 = vector.broadcast %c16_i32 : i32 to vector<8x128xi32>
      %177 = arith.cmpi sge, %175, %176 : vector<8x128xi32>
      %c20_i32 = arith.constant 20 : i32
      %178 = vector.broadcast %c20_i32 : i32 to vector<8x128xi32>
      %179 = arith.cmpi slt, %175, %178 : vector<8x128xi32>
      %180 = arith.andi %177, %179 : vector<8x128xi1>
      %cst_121 = arith.constant 5.000000e-01 : f32
      %181 = vector.broadcast %cst_121 : f32 to vector<8x128xf32>
      %182 = arith.mulf %181, %174 : vector<8x128xf32>
      %183 = math.tanh %182 : vector<8x128xf32>
      %cst_122 = arith.constant 1.000000e+00 : f32
      %184 = vector.broadcast %cst_122 : f32 to vector<8x128xf32>
      %185 = arith.addf %183, %184 : vector<8x128xf32>
      %cst_123 = arith.constant 5.000000e-01 : f32
      %186 = vector.broadcast %cst_123 : f32 to vector<8x128xf32>
      %187 = arith.mulf %186, %185 : vector<8x128xf32>
      %188 = arith.select %180, %187, %174 : vector<8x128xi1>, vector<8x128xf32>
      %c0_124 = arith.constant 0 : index
      %c0_125 = arith.constant 0 : index
      %c0_126 = arith.constant 0 : index
      %189 = vector.load %arg30[%c0_124, %c0_125, %c0_126] : memref<1x8x128xf32, #tpu.memory_space<vmem>>, vector<1x8x128xf32>
      %190 = vector.shape_cast %189 : vector<1x8x128xf32> to vector<8x128xf32>
      %191 = vector.shape_cast %188 : vector<8x128xf32> to vector<1x8x128xf32>
      tpu.vector_store %arg30[%c0_124, %c0_125, %c0_126], %191 {strides = array<i32>} : memref<1x8x128xf32, #tpu.memory_space<vmem>>, vector<1x8x128xf32>,
    } else {
    }
    return
  }
  func.func @transform_0(%arg0: i32, %arg1: i32) -> (i32, i32, i32) {
    %c0_i32 = arith.constant 0 : i32
    %c0_i32_0 = arith.constant 0 : i32
    %c0_i32_1 = arith.constant 0 : i32
    return %arg0, %c0_i32, %c0_i32_0 : i32, i32, i32
  }
  func.func @transform_1(%arg0: i32, %arg1: i32) -> (i32, i32, i32) {
    %c0_i32 = arith.constant 0 : i32
    %c0_i32_0 = arith.constant 0 : i32
    %c0_i32_1 = arith.constant 0 : i32
    return %arg0, %c0_i32, %c0_i32_0 : i32, i32, i32
  }
  func.func @transform_2(%arg0: i32, %arg1: i32) -> (i32, i32) {
    %c0_i32 = arith.constant 0 : i32
    %c0_i32_0 = arith.constant 0 : i32
    %c0_i32_1 = arith.constant 0 : i32
    return %c0_i32, %c0_i32_0 : i32, i32
  }
  func.func @transform_3(%arg0: i32, %arg1: i32) -> (i32, i32) {
    %c0_i32 = arith.constant 0 : i32
    %c0_i32_0 = arith.constant 0 : i32
    %c0_i32_1 = arith.constant 0 : i32
    return %c0_i32, %c0_i32_0 : i32, i32
  }
  func.func @transform_4(%arg0: i32, %arg1: i32) -> (i32, i32) {
    %c0_i32 = arith.constant 0 : i32
    %c0_i32_0 = arith.constant 0 : i32
    %c0_i32_1 = arith.constant 0 : i32
    return %c0_i32, %c0_i32_0 : i32, i32
  }
  func.func @transform_5(%arg0: i32, %arg1: i32) -> (i32, i32) {
    %c0_i32 = arith.constant 0 : i32
    %c0_i32_0 = arith.constant 0 : i32
    %c0_i32_1 = arith.constant 0 : i32
    return %c0_i32, %c0_i32_0 : i32, i32
  }
  func.func @transform_6(%arg0: i32, %arg1: i32) -> (i32, i32) {
    %c0_i32 = arith.constant 0 : i32
    %c0_i32_0 = arith.constant 0 : i32
    %c0_i32_1 = arith.constant 0 : i32
    return %c0_i32, %c0_i32_0 : i32, i32
  }
  func.func @transform_7(%arg0: i32, %arg1: i32) -> (i32, i32) {
    %c0_i32 = arith.constant 0 : i32
    %c0_i32_0 = arith.constant 0 : i32
    %c0_i32_1 = arith.constant 0 : i32
    return %c0_i32, %c0_i32_0 : i32, i32
  }
  func.func @transform_8(%arg0: i32, %arg1: i32) -> (i32, i32) {
    %c0_i32 = arith.constant 0 : i32
    %c0_i32_0 = arith.constant 0 : i32
    %c0_i32_1 = arith.constant 0 : i32
    return %c0_i32, %c0_i32_0 : i32, i32
  }
  func.func @transform_9(%arg0: i32, %arg1: i32) -> (i32, i32) {
    %c0_i32 = arith.constant 0 : i32
    %c0_i32_0 = arith.constant 0 : i32
    %c0_i32_1 = arith.constant 0 : i32
    return %c0_i32, %c0_i32_0 : i32, i32
  }
  func.func @transform_10(%arg0: i32, %arg1: i32) -> (i32, i32) {
    %c0_i32 = arith.constant 0 : i32
    %c0_i32_0 = arith.constant 0 : i32
    %c0_i32_1 = arith.constant 0 : i32
    return %c0_i32, %c0_i32_0 : i32, i32
  }
  func.func @transform_11(%arg0: i32, %arg1: i32) -> (i32, i32, i32) {
    %c0_i32 = arith.constant 0 : i32
    %c0_i32_0 = arith.constant 0 : i32
    %c0_i32_1 = arith.constant 0 : i32
    return %arg1, %c0_i32, %c0_i32_0 : i32, i32, i32
  }
  func.func @transform_12(%arg0: i32, %arg1: i32) -> (i32, i32, i32) {
    %c0_i32 = arith.constant 0 : i32
    %c0_i32_0 = arith.constant 0 : i32
    %c0_i32_1 = arith.constant 0 : i32
    return %arg1, %c0_i32, %c0_i32_0 : i32, i32, i32
  }
  func.func @transform_13(%arg0: i32, %arg1: i32) -> (i32, i32, i32) {
    %c0_i32 = arith.constant 0 : i32
    %c0_i32_0 = arith.constant 0 : i32
    %c0_i32_1 = arith.constant 0 : i32
    return %arg1, %c0_i32, %c0_i32_0 : i32, i32, i32
  }
  func.func @transform_14(%arg0: i32, %arg1: i32) -> (i32, i32, i32) {
    %c0_i32 = arith.constant 0 : i32
    %c0_i32_0 = arith.constant 0 : i32
    %c0_i32_1 = arith.constant 0 : i32
    return %arg1, %c0_i32, %c0_i32_0 : i32, i32, i32
  }
  func.func @transform_15(%arg0: i32, %arg1: i32) -> (i32, i32, i32) {
    %c0_i32 = arith.constant 0 : i32
    %c0_i32_0 = arith.constant 0 : i32
    %c0_i32_1 = arith.constant 0 : i32
    return %arg1, %c0_i32, %c0_i32_0 : i32, i32, i32
  }
  func.func @transform_16(%arg0: i32, %arg1: i32) -> (i32, i32, i32) {
    %c0_i32 = arith.constant 0 : i32
    %c0_i32_0 = arith.constant 0 : i32
    %c0_i32_1 = arith.constant 0 : i32
    return %arg1, %c0_i32, %c0_i32_0 : i32, i32, i32
  }
  func.func @transform_17(%arg0: i32, %arg1: i32) -> (i32, i32, i32) {
    %c0_i32 = arith.constant 0 : i32
    %c0_i32_0 = arith.constant 0 : i32
    %c0_i32_1 = arith.constant 0 : i32
    return %arg1, %c0_i32, %c0_i32_0 : i32, i32, i32
  }
  func.func @transform_18(%arg0: i32, %arg1: i32) -> (i32, i32, i32) {
    %c0_i32 = arith.constant 0 : i32
    %c0_i32_0 = arith.constant 0 : i32
    %c0_i32_1 = arith.constant 0 : i32
    return %arg1, %c0_i32, %c0_i32_0 : i32, i32, i32
  }
  func.func @transform_19(%arg0: i32, %arg1: i32) -> (i32, i32, i32) {
    %c0_i32 = arith.constant 0 : i32
    %c0_i32_0 = arith.constant 0 : i32
    %c0_i32_1 = arith.constant 0 : i32
    return %arg1, %c0_i32, %c0_i32_0 : i32, i32, i32
  }
  func.func @transform_20(%arg0: i32, %arg1: i32) -> (i32, i32, i32) {
    %c0_i32 = arith.constant 0 : i32
    %c0_i32_0 = arith.constant 0 : i32
    %c0_i32_1 = arith.constant 0 : i32
    return %arg1, %c0_i32, %c0_i32_0 : i32, i32, i32
  }
  func.func @transform_21(%arg0: i32, %arg1: i32) -> (i32, i32, i32) {
    %c0_i32 = arith.constant 0 : i32
    %c0_i32_0 = arith.constant 0 : i32
    %c0_i32_1 = arith.constant 0 : i32
    return %arg1, %c0_i32, %c0_i32_0 : i32, i32, i32
  }
  func.func @transform_22(%arg0: i32, %arg1: i32) -> (i32, i32, i32) {
    %c0_i32 = arith.constant 0 : i32
    %c0_i32_0 = arith.constant 0 : i32
    %c0_i32_1 = arith.constant 0 : i32
    return %arg1, %c0_i32, %c0_i32_0 : i32, i32, i32
  }
  func.func @transform_23(%arg0: i32, %arg1: i32) -> (i32, i32, i32) {
    %c0_i32 = arith.constant 0 : i32
    %c0_i32_0 = arith.constant 0 : i32
    %c0_i32_1 = arith.constant 0 : i32
    return %arg1, %c0_i32, %c0_i32_0 : i32, i32, i32
  }
  func.func @transform_24(%arg0: i32, %arg1: i32) -> (i32, i32, i32) {
    %c0_i32 = arith.constant 0 : i32
    %c0_i32_0 = arith.constant 0 : i32
    %c0_i32_1 = arith.constant 0 : i32
    return %arg1, %c0_i32, %c0_i32_0 : i32, i32, i32
  }
  func.func @transform_25(%arg0: i32, %arg1: i32) -> (i32, i32, i32) {
    %c0_i32 = arith.constant 0 : i32
    %c0_i32_0 = arith.constant 0 : i32
    %c0_i32_1 = arith.constant 0 : i32
    return %arg1, %c0_i32, %c0_i32_0 : i32, i32, i32
  }
  func.func @transform_26(%arg0: i32, %arg1: i32) -> (i32, i32, i32) {
    %c0_i32 = arith.constant 0 : i32
    %c0_i32_0 = arith.constant 0 : i32
    %c0_i32_1 = arith.constant 0 : i32
    return %arg1, %c0_i32, %c0_i32_0 : i32, i32, i32
  }
  func.func @transform_27(%arg0: i32, %arg1: i32) -> (i32, i32, i32) {
    %c0_i32 = arith.constant 0 : i32
    %c0_i32_0 = arith.constant 0 : i32
    %c0_i32_1 = arith.constant 0 : i32
    return %arg0, %c0_i32, %c0_i32_0 : i32, i32, i32
  }
  func.func @transform_28(%arg0: i32, %arg1: i32) -> (i32, i32, i32) {
    %c0_i32 = arith.constant 0 : i32
    %c0_i32_0 = arith.constant 0 : i32
    %c0_i32_1 = arith.constant 0 : i32
    return %arg0, %c0_i32, %c0_i32_0 : i32, i32, i32
  }
}

</mosaic_0001>

<bundles_post_ra>
// kernel: fidnet_forward.3
= control target key start
LH: loop header
LB: loop body
LE: loop exit
PB: predicated region body
PF: predicated region fallthrough
CT: control target
= control target key end

     0   :  { %s4034_s0 = inlined_call_operand.vmem [shape: f32[2,1,32], index: 0, kind: input, shape index: {}]   ;;  %s4035_s1 = inlined_call_operand.vmem [shape: f32[2,1,32], index: 1, kind: input, shape index: {}]   ;;  %s4036_s2 = inlined_call_operand.vmem [shape: f32[32,32], index: 2, kind: input, shape index: {}]   ;;  %s4037_s3 = inlined_call_operand.vmem [shape: bf16[8,32], index: 3, kind: input, shape index: {}]   ;;  %s4038_s4 = inlined_call_operand.hbm [shape: bf16[32,32], index: 4, kind: input, shape index: {}]   ;;  %s4039_s5 = inlined_call_operand.hbm [shape: bf16[32,32], index: 5, kind: input, shape index: {}]   ;;  %s4040_s6 = inlined_call_operand.vmem [shape: f32[1,32], index: 6, kind: input, shape index: {}]   ;;  %s4041_s7 = inlined_call_operand.hbm [shape: f32[1,32], index: 7, kind: input, shape index: {}]   ;;  %s4042_s8 = inlined_call_operand.<no memory space> [shape: f32[1,1], index: 8, kind: input, shape index: {}]   ;;  %s4043_s9 = inlined_call_operand.hbm [shape: bf16[32,128], index: 9, kind: input, shape index: {}]   ;;  %s4044_s10 = inlined_call_operand.hbm [shape: f32[1,128], index: 10, kind: input, shape index: {}]   ;;  %s4045_s11 = inlined_call_operand.vmem [shape: bf16[2,32,32], index: 11, kind: input, shape index: {}]   ;;  %s4046_s12 = inlined_call_operand.vmem [shape: f32[2,1,32], index: 12, kind: input, shape index: {}]   ;;  %s4047_s13 = inlined_call_operand.vmem [shape: bf16[2,32,32], index: 13, kind: input, shape index: {}]   ;;  %s4048_s14 = inlined_call_operand.vmem [shape: f32[2,1,32], index: 14, kind: input, shape index: {}]   ;;  %s4049_s15 = inlined_call_operand.vmem [shape: bf16[2,32,32], index: 15, kind: input, shape index: {}]   ;;  %s4050_s16 = inlined_call_operand.hbm [shape: f32[2,1,32], index: 16, kind: input, shape index: {}]   ;;  %s4051_s17 = inlined_call_operand.hbm [shape: bf16[2,32,32], index: 17, kind: input, shape index: {}]   ;;  %s4052_s18 = inlined_call_operand.hbm [shape: f32[2,1,32], index: 18, kind: input, shape index: {}]   ;;  %s4053_s19 = inlined_call_operand.vmem [shape: bf16[2,32,16], index: 19, kind: input, shape index: {}]   ;;  %s4054_s20 = inlined_call_operand.hbm [shape: f32[2,1,16], index: 20, kind: input, shape index: {}]   ;;  %s4055_s21 = inlined_call_operand.hbm [shape: bf16[2,16,32], index: 21, kind: input, shape index: {}]   ;;  %s4056_s22 = inlined_call_operand.hbm [shape: f32[2,1,32], index: 22, kind: input, shape index: {}]   ;;  %s4057_s23 = inlined_call_operand.hbm [shape: f32[2,1,32], index: 23, kind: input, shape index: {}]   ;;  %s4058_s24 = inlined_call_operand.hbm [shape: f32[2,1,32], index: 24, kind: input, shape index: {}]   ;;  %s4059_s25 = inlined_call_operand.hbm [shape: f32[2,1,32], index: 25, kind: input, shape index: {}]   ;;  %s4060_s26 = inlined_call_operand.hbm [shape: f32[2,1,32], index: 26, kind: input, shape index: {}]   ;;  %s4061_s27 = inlined_call_operand.vmem [shape: f32[2,1,1], index: 27, kind: output, shape index: {0}]   ;;  %s4062_s28 = inlined_call_operand.vmem [shape: f32[2,8,128], index: 28, kind: output, shape index: {1}]  }
   0x1   :  { %4082 = sst [smem:[#allocation49_spill]] %s4034_s0 }
   0x2   :  { %4083 = sst [smem:[#allocation50_spill]] %s4035_s1 }
   0x3   :  { %4084 = sst [smem:[#allocation51_spill]] %s4036_s2 }
   0x4   :  { %4085 = sst [smem:[#allocation52_spill]] %s4037_s3 }
   0x5   :  { %4086 = sst [smem:[#allocation53_spill]] %s4038_s4 }
   0x6   :  { %4087 = sst [smem:[#allocation54_spill]] %s4039_s5 }
   0x7   :  { %4088 = sst [smem:[#allocation55_spill]] %s4040_s6 }
   0x8   :  { %4089 = sst [smem:[#allocation56_spill]] %s4041_s7 }
   0x9   :  { %4090 = sst [smem:[#allocation57_spill]] %s4042_s8 }
   0xa   :  { %4091 = sst [smem:[#allocation58_spill]] %s4043_s9 }
   0xb   :  { %4092 = sst [smem:[#allocation59_spill]] %s4044_s10 }
   0xc   :  { %4093 = sst [smem:[#allocation60_spill]] %s4045_s11 }
   0xd   :  { %4094 = sst [smem:[#allocation61_spill]] %s4046_s12 }
   0xe   :  { %4095 = sst [smem:[#allocation62_spill]] %s4047_s13 }
   0xf   :  { %4096 = sst [smem:[#allocation63_spill]] %s4048_s14 }
  0x10   :  { %4097 = sst [smem:[#allocation64_spill]] %s4049_s15 }
  0x11   :  { %4098 = sst [smem:[#allocation65_spill]] %s4050_s16 }
  0x12   :  { %4099 = sst [smem:[#allocation66_spill]] %s4051_s17 }
  0x13   :  { %4100 = sst [smem:[#allocation67_spill]] %s4052_s18 }
  0x14   :  { %4101 = sst [smem:[#allocation68_spill]] %s4053_s19 }
  0x15   :  { %4102 = sst [smem:[#allocation69_spill]] %s4054_s20 }
  0x16   :  { %4103 = sst [smem:[#allocation70_spill]] %s4055_s21 }
  0x17   :  { %4104 = sst [smem:[#allocation71_spill]] %s4056_s22 }
  0x18   :  { %4105 = sst [smem:[#allocation72_spill]] %s4057_s23 }
  0x19   :  { %4106 = sst [smem:[#allocation73_spill]] %s4058_s24 }
  0x1a   :  { %4107 = sst [smem:[#allocation74_spill]] %s4059_s25 }
  0x1b   :  { %4108 = sst [smem:[#allocation75_spill]] %s4060_s26 }
  0x1c   :  { %4109 = sst [smem:[#allocation76_spill]] %s4061_s27 }
  0x1d   :  { %4110 = sst [smem:[#allocation77_spill]] %s4062_s28 }
  0x1e   :  { %s4111_s9 = sld [smem:[#allocation57_spill]] }
  0x24   :  { %v34_v0 = vstv %s4111_s9 }
  0x25   :  { %35 = vst [vmem:[#allocation7] sm:$0x1] %v34_v0 }
  0x26   :  { %36 = vsyncpa [#allocation9], 0 }
  0x27   :  { %37 = vsyncpa [#allocation11], 0 }
  0x28   :  { %38 = vsyncpa [#allocation14], 0 }
  0x29   :  { %39 = vsyncpa [#allocation17], 0 }
  0x2a   :  { %41 = vsyncpa [#allocation17 + $0x1], 0 }
  0x2b   :  { %42 = vsyncpa [#allocation20], 0 }
  0x2c   :  { %44 = vsyncpa [#allocation20 + $0x1], 0 }
  0x2d   :  { %45 = vsyncpa [#allocation23], 0 }
  0x2e   :  { %47 = vsyncpa [#allocation23 + $0x1], 0 }
  0x2f   :  { %48 = vsyncpa [#allocation26], 0 }
  0x30   :  { %50 = vsyncpa [#allocation26 + $0x1], 0 }
  0x31   :  { %51 = vsyncpa [#allocation29], 0 }
  0x32   :  { %53 = vsyncpa [#allocation29 + $0x1], 0  ;;  %s3538_s30 = smov 0   ;;  %s3540_s3 = smov 0  }
  0x33   :  { %s3542_s6 = smov 0   ;;  %s3544_s10 = smov 0  }
  0x34   :  { %s3546_s0 = smov 0   ;;  %s3548_s11 = smov 0  }
  0x35   :  { %s3550_s29 = smov 0   ;;  %s3552_s2 = smov 0  }
  0x36 LB: > { %4112 = sst [smem:[#allocation39_spill]] %s3350_s3  ;;  %s4064_s7 = sadd.s32 4294967295, %s3374_s2   ;;  %s3374_s2 = sphi %s3552_s2, %s59_s2   ;;  %s3370_s29 = sphi %s3550_s29, %s4185_s29   ;;  %s3366_s11 = sphi %s3548_s11, %s4184_s11   ;;  %s3362_s0 = sphi %s3546_s0, %s4183_s0   ;;  %s3358_s10 = sphi %s3544_s10, %s4182_s10   ;;  %s3354_s6 = sphi %s3542_s6, %s4181_s6   ;;  %s3350_s3 = sphi %s3540_s3, %s4180_s3   ;;  %s3346_s30 = sphi %s3538_s30, %s4179_s30  }
  0x37   : > { %4113 = sst [smem:[#allocation40_spill]] %s3354_s6  ;;  %s68_s12 = sadd.s32 1, %s3366_s11 }
  0x38   : > { %4114 = sst [smem:[#allocation41_spill]] %s3358_s10  ;;  %p69_p0 = scmp.ge.s32.totalorder %s68_s12, 2 }
  0x39   : > { %4115 = sst [smem:[#allocation42_spill]] %s3362_s0  ;;  %s71_s1 = sadd.s32 1, %s3370_s29 }
  0x3a   : > { %4116 = sst [smem:[#allocation43_spill]] %s3366_s11  ;;  %s449_s4 = sadd.s32 1, %s3354_s6 }
  0x3b   : > { %4117 = sst [smem:[#allocation44_spill]] %s3370_s29  ;;  %p456_p1 = scmp.ne.s32.totalorder %s3354_s6, %s3350_s3 }
  0x3c   : > { %s4187_s12 = smov (%p69_p0, %s68_s12), 0  ;;  %s4189_s1 = smov (!%p69_p0, %s71_s1), %s3370_s29 }
  0x3d   : > { %4118 = sst [smem:[#allocation45_spill]] %s4187_s12  ;;  %s446_s8 = ssub.s32 %s3366_s11, %s4187_s12 }
  0x3e   : > { %p457_p2 = scmp.eq.s32.totalorder %s3374_s2, 0  ;;  %p73_p3 = scmp.ge.s32.totalorder %s4189_s1, 2 }
  0x3f   : > { %p447_p4 = scmp.eq.s32.totalorder %s446_s8, 0  ;;  %p462_p6 = scmp.ne.s32.totalorder %s3350_s3, %s3346_s30 }
  0x40   : > { %p3588_p5 = por %p457_p2, %p456_p1  ;;  %s4191_s1 = smov (%p73_p3, %s4189_s1), 0 }
  0x41   : > { %4120 = sst [smem:[#allocation46_spill]] %s4191_s1  ;;  %p3600_p7 = scmp.eq.s32.totalorder %s4064_s7, 0 }
  0x42   : > { %s3596_s9 = scalar_select %p447_p4, %s3354_s6, %s449_s4  }
  0x43   : > { %p2480_p8 = scmp.ge.s32.totalorder %s3374_s2, 1  ;;  %p785_p9 = scmp.lt.s32.totalorder %s3374_s2, 5 }
  0x44   : > { %4121 = sst [smem:[#allocation47_spill]] %s3596_s9  ;;  %p3608_p10 = por %p3600_p7, %p462_p6 }
  0x45   : > { %p3612_p11 = pnand %p2480_p8, %p785_p9  ;;  %s4126_s7 = sld [smem:[#allocation54_spill]] }
  0x46   : > { %s4123_s8 = scalar_select %p3608_p10, 1, 0 }
  0x47   : > { %p2658_p12 = pneg %p3612_p11  ;;  %s3376_s29 = smov [#allocation10]  }
  0x48   : > { %4124 = sst [smem:[#allocation48_spill]] %s4123_s8  ;;  %s818_s9 = sshll.u32 %s3376_s29, 4  ;;  %s819_s9 = int_to_ptr.vmem [resolvable:$true] %s818_s9 }
  0x49   : > { %p3623_p13 = pnand %p2658_p12, %p3600_p7  ;;  %p2710_p0 = scmp.lt.s32.totalorder %s3374_s2, 4 }
  0x4a   : > { %s4071_s15 = smov 64   ;;  %s4073_s14 = smov 4  }
  0x4b   : > { %s816_s12 = sshll.u32 %s4126_s7, 4  ;;  %s4128_s7 = sld [smem:[#allocation58_spill]]  ;;  %s817_s12 = int_to_ptr.hbm [resolvable:$true] %s816_s12 }
  0x4c   : > { %2664 = dma.hbm_to_vmem [thread:$0]  (!%p3623_p13), %s817_s12, 256, %s819_s9, [#allocation11], %s4071_s15, %s4071_s15, %s4073_s14  }
  0x4d   : > { %p3638_p1 = pnand %p2710_p0, %p3588_p5  ;;  %s3379_s13 = smov [#allocation13]  }
  0x4e   : > { %s850_s10 = sshll.u32 %s3379_s13, 4  ;;  %s3643_s0 = sand.u32 1, %s3374_s2   ;;  %s851_s10 = int_to_ptr.vmem [resolvable:$true] %s850_s10 }
  0x4f   : > { %s3651_s12 = sand.u32 1, %s3354_s6   ;;  %s4130_s16 = sld [smem:[#allocation65_spill]] }
  0x50   : > { %s927_s4 = scalar_lea.vmem [#allocation16], %s3651_s12  ;;  %s4075_s8 = scalar_lea.sflag [#allocation17], %s3643_s0 }
  0x51   : > { %s848_s19 = sshll.u32 %s4128_s7, 4  ;;  %s934_s7 = sshll.u32 %s927_s4, 4  ;;  %s849_s19 = int_to_ptr.hbm [resolvable:$true] %s848_s19  ;;  %s935_s7 = int_to_ptr.vmem [resolvable:$true] %s934_s7 }
  0x52   : > { %2670 = dma.hbm_to_vmem [thread:$0]  (!%p3623_p13), %s849_s19, 256, %s851_s10, [#allocation14], %s4071_s15, %s4071_s15, %s4073_s14  }
  0x53   : > { %s4131_s18 = sld [smem:[#allocation67_spill]]  ;;  %s966_s9 = scalar_lea.vmem [#allocation19], %s3651_s12 }
  0x54   : > { %s973_s15 = sshll.u32 %s966_s9, 4  ;;  %s4076_s4 = scalar_lea.sflag [#allocation20], %s3643_s0  ;;  %s974_s15 = int_to_ptr.vmem [resolvable:$true] %s973_s15 }
  0x55   : > { %s930_s13 = scalar_lea.hbm %s4130_s16, %s3366_s11  ;;  %s2490_s14 = sshll.u32 %s3651_s12, 3 }
  0x56   : > { %s932_s1 = sshll.u32 %s930_s13, 4  ;;  %s4132_s21 = sld [smem:[#allocation70_spill]]  ;;  %s933_s1 = int_to_ptr.hbm [resolvable:$true] %s932_s1 }
  0x57   : > { %2677 = dma.hbm_to_vmem [thread:$0]  (!%p3638_p1), %s933_s1, 16, %s935_s7, %s4075_s8  }
  0x58   : > { %s2596_s1 = sshll.u32 %s3366_s11, 3  ;;  %s1009_s8 = scalar_lea.vmem [#allocation22], %s2490_s14 }
  0x59   : > { %s969_s5 = scalar_lea.hbm %s4131_s18, %s3366_s11  ;;  %s4077_s16 = scalar_lea.sflag [#allocation23], %s3643_s0 }
  0x5a   : > { %s971_s13 = sshll.u32 %s969_s5, 4  ;;  %s1017_s5 = sshll.u32 %s1009_s8, 4  ;;  %s972_s13 = int_to_ptr.hbm [resolvable:$true] %s971_s13  ;;  %s1018_s5 = int_to_ptr.vmem [resolvable:$true] %s1017_s5 }
  0x5b   : > { %2683 = dma.hbm_to_vmem [thread:$0]  (!%p3638_p1), %s972_s13, 16, %s974_s15, %s4076_s4  }
  0x5c   : > { %s1014_s10 = scalar_lea.hbm %s4132_s21, %s2596_s1  ;;  %s4133_s18 = smov 4  }
  0x5d   : > { %s1015_s9 = sshll.u32 %s1014_s10, 4  ;;  %s4134_s15 = smov 64   ;;  %s1016_s9 = int_to_ptr.hbm [resolvable:$true] %s1015_s9 }
  0x5e   : > { %2689 = dma.hbm_to_vmem [thread:$0]  (!%p3638_p1), %s1016_s9, 128, %s1018_s5, %s4077_s16, %s4134_s15, %s4134_s15, %s4133_s18  }
  0x5f   : > { %s4135_s23 = sld [smem:[#allocation72_spill]]  ;;  %s1047_s19 = scalar_lea.vmem [#allocation25], %s3651_s12 }
  0x60   : > { %s1054_s14 = sshll.u32 %s1047_s19, 4  ;;  %s1045_s8 = scalar_lea.sflag [#allocation26], %s3643_s0  ;;  %s1055_s14 = int_to_ptr.vmem [resolvable:$true] %s1054_s14 }
  0x61   : > { %s4136_s25 = sld [smem:[#allocation74_spill]]  ;;  %s1081_s16 = scalar_lea.vmem [#allocation28], %s3651_s12 }
  0x62   : > { %s1088_s13 = sshll.u32 %s1081_s16, 4  ;;  %s4079_s7 = scalar_lea.sflag [#allocation29], %s3643_s0  ;;  %s1089_s13 = int_to_ptr.vmem [resolvable:$true] %s1088_s13 }
  0x63   : > { %s4139_s19 = sld [smem:[#allocation59_spill]]  ;;  %s3382_s4 = smov [#allocation15]  }
  0x64   : > { %s865_s16 = sshll.u32 %s3382_s4, 4  ;;  %s4140_s17 = sld [smem:[#allocation66_spill]]  ;;  %s866_s16 = int_to_ptr.vmem [resolvable:$true] %s865_s16 }
  0x65   : > { %s1050_s1 = scalar_lea.hbm %s4135_s23, %s3366_s11  ;;  %s4137_s23 = sld [smem:[#allocation53_spill]] }
  0x66   : > { %s1052_s10 = sshll.u32 %s1050_s1, 4  ;;  %s4142_s20 = sld [smem:[#allocation69_spill]]  ;;  %s1053_s10 = int_to_ptr.hbm [resolvable:$true] %s1052_s10 }
  0x67   : > { %2695 = dma.hbm_to_vmem [thread:$0]  (!%p3638_p1), %s1053_s10, 16, %s1055_s14, %s1045_s8  }
  0x68   : > { %s1084_s9 = scalar_lea.hbm %s4136_s25, %s3366_s11  ;;  %s3380_s14 = smov [#allocation8]  }
  0x69   : > { %s1086_s5 = sshll.u32 %s1084_s9, 4  ;;  %s804_s21 = sshll.u32 %s3380_s14, 4  ;;  %s1087_s5 = int_to_ptr.hbm [resolvable:$true] %s1086_s5  ;;  %s805_s21 = int_to_ptr.vmem [resolvable:$true] %s804_s21 }
  0x6a   : > { %2701 = dma.hbm_to_vmem [thread:$0]  (!%p3638_p1), %s1087_s5, 16, %s1089_s13, %s4079_s7  }
  0x6b   : > { %s802_s6 = sshll.u32 %s4137_s23, 4  ;;  %s4138_s10 = sld [smem:[#allocation56_spill]]  ;;  %s803_s6 = int_to_ptr.hbm [resolvable:$true] %s802_s6 }
  0x6c   : > { %2661 = dma.hbm_to_vmem [thread:$0]  (!%p3623_p13), %s803_s6, 256, %s805_s21, [#allocation9], %s4134_s15, %s4134_s15, %s4133_s18  }
  0x6d   : > { %s3381_s5 = smov [#allocation12]   ;;  %s863_s7 = sshll.u32 %s4139_s19, 4  ;;  %s864_s7 = int_to_ptr.hbm [resolvable:$true] %s863_s7 }
  0x6e   : > { %s836_s13 = sshll.u32 %s3381_s5, 4  ;;  %s2487_s14 = sshll.u32 %s3651_s12, 4  ;;  %s837_s13 = int_to_ptr.vmem [resolvable:$true] %s836_s13 }
  0x6f   : > { %s2595_s6 = sshll.u32 %s3366_s11, 4  ;;  %s945_s1 = scalar_lea.vmem [#allocation18], %s2487_s14 }
  0x70   : > { %2673 = dma.hbm_to_vmem [thread:$0]  (!%p3623_p13), %s864_s7, 16, %s866_s16, [#allocation14]  }
  0x71   : > { %s834_s9 = sshll.u32 %s4138_s10, 4  ;;  %s950_s5 = scalar_lea.hbm %s4140_s17, %s2595_s6  ;;  %s835_s9 = int_to_ptr.hbm [resolvable:$true] %s834_s9 }
  0x72   : > { %2667 = dma.hbm_to_vmem [thread:$0]  (!%p3623_p13), %s835_s9, 16, %s837_s13, [#allocation11]  }
  0x73   : > { %s953_s23 = sshll.u32 %s945_s1, 4  ;;  %s951_s19 = sshll.u32 %s950_s5, 4  ;;  %s954_s23 = int_to_ptr.vmem [resolvable:$true] %s953_s23  ;;  %s952_s19 = int_to_ptr.hbm [resolvable:$true] %s951_s19 }
  0x74   : > { %s4141_s9 = scalar_lea.sflag [#allocation17], %s3643_s0  ;;  %s994_s13 = scalar_lea.hbm %s4142_s20, %s3366_s11 }
  0x75   : > { %2680 = dma.hbm_to_vmem [thread:$0]  (!%p3638_p1), %s952_s19, 256, %s954_s23, %s4141_s9, %s4134_s15, %s4134_s15, %s4133_s18  }
  0x76   : > { %s991_s4 = scalar_lea.vmem [#allocation21], %s3651_s12  ;;  %s996_s16 = sshll.u32 %s994_s13, 4  ;;  %s997_s16 = int_to_ptr.hbm [resolvable:$true] %s996_s16 }
  0x77   : > { %s998_s14 = sshll.u32 %s991_s4, 4  ;;  %s4143_s6 = scalar_lea.sflag [#allocation20], %s3643_s0  ;;  %s999_s14 = int_to_ptr.vmem [resolvable:$true] %s998_s14 }
  0x78   : > { %2686 = dma.hbm_to_vmem [thread:$0]  (!%p3638_p1), %s997_s16, 16, %s999_s14, %s4143_s6  }
  0x79   : > { %s4144_s22 = sld [smem:[#allocation71_spill]]  ;;  %s1030_s15 = scalar_lea.vmem [#allocation24], %s3651_s12 }
  0x7a   : > { %s1037_s5 = sshll.u32 %s1030_s15, 4  ;;  %s4145_s23 = scalar_lea.sflag [#allocation23], %s3643_s0  ;;  %s1038_s5 = int_to_ptr.vmem [resolvable:$true] %s1037_s5 }
  0x7b   : > { %s4146_s24 = sld [smem:[#allocation73_spill]]  ;;  %s1064_s7 = scalar_lea.vmem [#allocation27], %s3651_s12 }
  0x7c   : > { %s1071_s13 = sshll.u32 %s1064_s7, 4  ;;  %s4147_s26 = sld [smem:[#allocation75_spill]]  ;;  %s1072_s13 = int_to_ptr.vmem [resolvable:$true] %s1071_s13 }
  0x7d   : > { %s1098_s21 = scalar_lea.vmem [#allocation30], %s3651_s12  ;;  %s4148_s15 = scalar_lea.sflag [#allocation29], %s3643_s0 }
  0x7e   : > { %s1105_s10 = sshll.u32 %s1098_s21, 4  ;;  %s1106_s10 = int_to_ptr.vmem [resolvable:$true] %s1105_s10 }
  0x7f   : > { %s1033_s18 = scalar_lea.hbm %s4144_s22, %s3366_s11 }
  0x80   : > { %s1035_s1 = sshll.u32 %s1033_s18, 4  ;;  %s1036_s1 = int_to_ptr.hbm [resolvable:$true] %s1035_s1 }
  0x81   : > { %2692 = dma.hbm_to_vmem [thread:$0]  (!%p3638_p1), %s1036_s1, 16, %s1038_s5, %s4145_s23  }
  0x82   : > { %s1067_s27 = scalar_lea.hbm %s4146_s24, %s3366_s11  ;;  %s1101_s6 = scalar_lea.hbm %s4147_s26, %s3366_s11 }
  0x83   : > { %s1069_s4 = sshll.u32 %s1067_s27, 4  ;;  %s1103_s18 = sshll.u32 %s1101_s6, 4  ;;  %s1070_s4 = int_to_ptr.hbm [resolvable:$true] %s1069_s4  ;;  %s1104_s18 = int_to_ptr.hbm [resolvable:$true] %s1103_s18 }
  0x84   : > { %2698 = dma.hbm_to_vmem [thread:$0]  (!%p3638_p1), %s1070_s4, 16, %s1072_s13, %s1045_s8  }
  0x85   : > { %2704 = dma.hbm_to_vmem [thread:$0]  (!%p3638_p1), %s1104_s18, 16, %s1106_s10, %s4148_s15  }
  0x86   : > { %1114 = sbr.rel (%p3612_p11) target bundleno = 2420 (0x974), region = 128 }
  0x8b   : > { %3313 = dma.done.wait (%p3600_p7), [#allocation9], 256  }
  0x8c   : > { %3315 = vsyncadd (%p3600_p7), [#allocation9], 4294967040 }
  0x8d   : > { %3317 = dma.done.wait (%p3600_p7), [#allocation11], 272  }
  0x8e   : > { %3319 = vsyncadd (%p3600_p7), [#allocation11], 4294967024 }
  0x8f   : > { %3321 = dma.done.wait (%p3600_p7), [#allocation14], 272  }
  0x90   : > { %3323 = vsyncadd (%p3600_p7), [#allocation14], 4294967024  ;;  %s4149_s0 = sadd.s32 4294967295, %s3374_s2   ;;  %s3789_s12 = sand.u32 1, %s3350_s3  }
  0x91   : > { %s1141_s29 = sand.u32 1, %s4149_s0  }
  0x92   : > { %s1142_s8 = scalar_lea.sflag [#allocation17], %s1141_s29 }
  0x93   : > { %3325 = dma.done.wait (%p3608_p10), %s1142_s8, 272  }
  0x94   : > { %3327 = vsyncadd (%p3608_p10), %s1142_s8, 4294967024  ;;  %s2499_s28 = sshll.u32 %s3789_s12, 4  ;;  %s1161_s23 = scalar_lea.sflag [#allocation20], %s1141_s29 }
  0x95   : > { %s3797_s1 = scalar_lea.vmem [#allocation18], %s2499_s28 }
  0x96   : > { %3329 = dma.done.wait (%p3608_p10), %s1161_s23, 32  }
  0x97   : > { %3331 = vsyncadd (%p3608_p10), %s1161_s23, 4294967264  ;;  %s2500_s9 = sshll.u32 %s3789_s12, 3  ;;  %s1179_s7 = scalar_lea.sflag [#allocation23], %s1141_s29 }
  0x98   : > { %s3806_s13 = scalar_lea.vmem [#allocation22], %s2500_s9 }
  0x99   : > { %3333 = dma.done.wait (%p3608_p10), %s1179_s7, 144  }
  0x9a   : > { %3335 = vsyncadd (%p3608_p10), %s1179_s7, 4294967152  ;;  %s1198_s14 = scalar_lea.sflag [#allocation26], %s1141_s29 }
  0x9b   : > { %3337 = dma.done.wait (%p3608_p10), %s1198_s14, 32  }
  0x9c   : > { %3339 = vsyncadd (%p3608_p10), %s1198_s14, 4294967264  ;;  %s1216_s21 = scalar_lea.sflag [#allocation29], %s1141_s29 }
  0x9d   : > { %3341 = dma.done.wait (%p3608_p10), %s1216_s21, 32  }
  0x9e   : > { %3343 = vsyncadd (%p3608_p10), %s1216_s21, 4294967264  ;;  %s4151_s18 = sld [smem:[#allocation42_spill]] }
  0x9f   : > { %s4152_s15 = sld [smem:[#allocation41_spill]] }
  0xa0   : > { %s4153_s28 = sld [smem:[#allocation49_spill]] }
  0xa1   : > { %s4156_s5 = sld [smem:[#allocation60_spill]] }
  0xa2   : > { %s4157_s8 = sld [smem:[#allocation62_spill]] }
  0xa3   : > { %s4158_s25 = sld [smem:[#allocation63_spill]] }
  0xa4   : > { %p1372_p2 = scmp.lt.s32.totalorder %s4151_s18, 1  ;;  %s4159_s14 = sld [smem:[#allocation64_spill]] }
  0xa5   : > { %p1378_p3 = scmp.lt.s32.totalorder %s4152_s15, 1  ;;  %s4160_s10 = sld [smem:[#allocation68_spill]] }
  0xa6   : > { %s4193_s18 = smov (!%p1372_p2, %s4151_s18), 1  ;;  %s4161_s6 = sld [smem:[#allocation76_spill]] }
  0xa7   : > { %s3830_s0 = scalar_select %p1378_p3, %s4152_s15, 1 }
  0xa8   : > { %s1374_s30 = scalar_lea.vmem %s4153_s28, %s4193_s18  ;;  %s2509_s29 = sshll.u32 %s4193_s18, 3 }
  0xa9   : > { %s2597_s21 = sshll.u32 %s3830_s0, 4  ;;  %s1393_s23 = scalar_lea.vmem %s4158_s25, %s3830_s0 }
  0xaa   : > { %s3848_s17 = scalar_lea.vmem %s4156_s5, %s2597_s21  ;;  %s3853_s22 = scalar_lea.vmem %s4157_s8, %s2597_s21 }
  0xab   : > { %s3862_s26 = scalar_lea.vmem %s4159_s14, %s2597_s21  ;;  %s3867_s19 = scalar_lea.vmem %s4160_s10, %s2597_s21 }
  0xac   : > { %s1406_s20 = scalar_lea.vmem %s4161_s6, %s4193_s18  ;;  %s4162_s3 = sld [smem:[#allocation77_spill]] }
  0xad   : > { %s1227_s25 = scalar_lea.vmem [#allocation30], %s3789_s12  ;;  %p2510_p4 = scmp.ne.s32.totalorder %s4152_s15, 0 }
  0xae   : > { %s4163_s6 = sld [smem:[#allocation52_spill]] (!%p2510_p4) }
  0xaf   : > { %1415 = sbr.rel (%p2510_p4) target bundleno = 323 (0x143), region = 192  ;;  %s4164_s14 = sld [smem:[#allocation55_spill]] (!%p2510_p4) }
  0xb2   : > { %s3877_s24 = scalar_lea.vmem %s4162_s3, %s2509_s29 }
  0xb4   : > { %v2602_v1 = vld [vmem:[#allocation8 + $0x8] sm:$0xff]  ;;  %v2604_v2 = vld [vmem:[#allocation10 + $0x8] sm:$0xff]  ;;  %v2601_v3 = vld [vmem:[#allocation8] sm:$0xff]  ;;  %vm1491_vm0 = vcmask 253952   ;;  %vm1435_vm1 = vcmask 261120   ;;  %vm1497_vm2 = vcmask 0  }
  0xb5   : > { %1445 = vmatpush.bf16.msra.mxu0 %v2602_v1  ;;  %1478 = vmatpush.bf16.msra.mxu1 %v2604_v2  ;;  %v2603_v4 = vld [vmem:[#allocation10] sm:$0xff]  ;;  %v1416_v5 = vld [vmem:[%s1374_s30] sm:$0x1]  ;;  %v1489_v6 = vld [vmem:[#allocation12] sm:$0x1] }
  0xb6   : > { %v1490_v7 = vmul.f32 %v1489_v6, %v1416_v5  ;;  %v1417_v8 = vpack.c.bf16 %v1416_v5, %v1416_v5  ;;  %v1452_v10 = vld [vmem:[%s4163_s6] sm:$0xf]  ;;  %v1495_v11 = vld [vmem:[#allocation7] sm:$0x1] }
  0xb7   : > { %v1422_v14 = vld [vmem:[%s4164_s14] sm:$0x1] }
  0xb8   : > { %v1492_v9 = vsel %vm1491_vm0, %v1490_v7, 0.0 }
  0xb9   : > { %1446 = vmatpush.bf16.msra.mxu0 %v2601_v3  ;;  %1479 = vmatpush.bf16.msra.mxu1 %v2603_v4 }
  0xba   : > { %1493 = vadd.xlane.f32.xlu0 %v1492_v9 }
  0xbc   : > { %2519 = vmatmul.msk.bf16.vlgmr.msra.gmra.mxu0 %vm1435_vm1, %v1417_v8  ;;  %2528 = vmatmul.msk.bf16.vlgmr.msra.gmra.mxu1 %vm1435_vm1, %v1452_v10 }
 0x12d   : > { %v1494_v12 = vpop.xlane.xlu0 %1493 }
 0x12e   : > { %v1496_v13 = vadd.f32 %v1495_v11, %v1494_v12 }
 0x130   : > { %1498 = vst.msk [vmem:[%s1406_s20] sm:$0x1] %vm1497_vm2, %v1496_v13 }
 0x139   : > { %v1448_v15 = vpop.f32.mrf.mxu0  ;;  %v1481_v16 = vpop.f32.mrf.mxu1 }
 0x13a   : > { %v1449_v17 = vadd.f32 %v1448_v15, %v1422_v14 }
 0x13c   : > { %v1485_v18 = vperm.slane %v1449_v17, 0 }
 0x13e   : > { %v1486_v19 = vadd.f32 %v1485_v18, %v1481_v16 }
 0x140   : > { %v1487_v20 = vmax.f32 %v1486_v19, 0.0 }
 0x141   : > { %v1450_v21 = vpop.f32.mrf.mxu0  ;;  %v1483_v22 = vpop.f32.mrf.mxu1 }
 0x142   : > { %1488 = vst.msk [vmem:[#allocation2] sm:$0xff] %vm1435_vm1, %v1487_v20 }
 0x143 PF: > { %v2608_v23 = vld [vmem:[%s3853_s22 + $0x8] sm:$0xff]  ;;  %v2607_v25 = vld [vmem:[%s3853_s22] sm:$0xff]  ;;  %vm1526_vm3 = vcmask 261120   ;;  %s4166_s27 = sld [smem:[#allocation61_spill]]  ;;  %vm1610_vm4 = vcmask 64512   ;;  %s3384_s10 = smov 112  }
 0x144   : > { %v2606_v24 = vld [vmem:[%s3848_s17 + $0x8] sm:$0xff]  ;;  %1570 = vmatpush.bf16.msra.mxu1 %v2608_v23  ;;  %v2605_v27 = vld [vmem:[%s3848_s17] sm:$0xff]  ;;  %s3383_s17 = smov 120   ;;  %s4168_s5 = sld [smem:[#allocation51_spill]] }
 0x145   : > { %1536 = vmatpush.bf16.msra.mxu0 %v2606_v24  ;;  %v2794_v29 = vld [vmem:[%s1393_s23] ss:$0 sm:$0xff]  ;;  %v2610_v48 = vld [vmem:[%s3862_s26 + $0x8] sm:$0xff]  ;;  %s4169_s16 = scalar_lea.vmem [#allocation16], %s3789_s12  ;;  %s4170_s8 = sld [smem:[#allocation50_spill]] }
 0x146   : > { %1603 = vmatpush.bf16.msra.mxu2 %v2610_v48  ;;  %v2609_v50 = vld [vmem:[%s3862_s26] sm:$0xff]  ;;  %s3386_s21 = smov 8   ;;  %s3387_s28 = smov 16  }
 0x147   : > { %v2797_v61 = vld [vmem:[%s4169_s16] ss:$0 sm:$0xff]  ;;  %s3388_s9 = smov 24   ;;  %s4172_s22 = scalar_lea.vmem [#allocation19], %s3789_s12 }
 0x148   : > { %1571 = vmatpush.bf16.msra.mxu1 %v2607_v25  ;;  %s4176_s7 = scalar_lea.vmem [#allocation24], %s3789_s12 }
 0x149   : > { %v3893_v26 = vld [vmem:[#allocation2] sm:$0xff]  ;;  %1537 = vmatpush.bf16.msra.mxu0 %v2605_v27  ;;  %s4167_s4 = scalar_lea.vmem %s4166_s27, %s3830_s0  ;;  %s3385_s0 = smov 104  }
 0x14a   : > { %v1505_v28 = vpack.c.bf16 %v3893_v26, %v3893_v26  ;;  %v2795_v30 = vld [vmem:[%s4167_s4] ss:$0 sm:$0xff]  ;;  %1604 = vmatpush.bf16.msra.mxu2 %v2609_v50  ;;  %v1502_v5 = vld [vmem:[%s4168_s5 + $0x8] sm:$0xff]  ;;  %v1503_v11 = vld [vmem:[%s4168_s5 + $0x10] sm:$0xff]  ;;  %s4177_s27 = scalar_lea.vmem [#allocation28], %s3789_s12  ;;  %s4178_s4 = sld [smem:[#allocation41_spill]] }
 0x14b   : > { %v1501_v60 = vld [vmem:[%s4168_s5] sm:$0xff]  ;;  %s4171_s3 = scalar_lea.vmem %s4170_s8, %s4193_s18  ;;  %v1504_v16 = vld [vmem:[%s4168_s5 + $0x18] sm:$0xff] }
 0x14c   : > { %2546 = vmatmul.msk.bf16.vlgmr.msra.gmra.mxu1 %vm1526_vm3, %v1505_v28  ;;  %2537 = vmatmul.msk.bf16.vlgmr.msra.gmra.mxu0 %vm1526_vm3, %v1505_v28  ;;  %v2796_v63 = vld [vmem:[%s4171_s3] ss:$0 sm:$0xff] }
 0x14d   : > { %2555 = vmatmul.msk.bf16.vlgmr.msra.gmra.mxu2 %vm1526_vm3, %v1505_v28 }
 0x150   : > { %p2583_p5 = scmp.ne.s32.totalorder %s4178_s4, 1 }
 0x1c9   : > { %v1573_v31 = vpop.f32.mrf.mxu1  ;;  %v1539_v32 = vpop.f32.mrf.mxu0 }
 0x1ca   : > { %v1574_v33 = vadd.f32 %v2794_v29, %v1573_v31  ;;  %v1540_v34 = vadd.f32 %v2795_v30, %v1539_v32 }
 0x1cc   : > { %1612 = vst.msk [vmem:[#allocation4] sm:$0xff] %vm1610_vm4, %v1574_v33  ;;  %1620 = vrot.lane.b32.xlu1 %v1574_v33, %s3383_s17  ;;  %1633 = vrot.lane.b32.xlu0 %v1574_v33, %s3384_s10  ;;  %v1543_v35 = vmul.f32 0.35355338, %v1540_v34 }
 0x1ce   : > { %1611 = vst.msk [vmem:[#allocation3] sm:$0xff] %vm1610_vm4, %v1543_v35  ;;  %1629 = vrot.lane.b32.xlu2 %v1543_v35, %s3384_s10 }
 0x1d0   : > { %v1606_v62 = vpop.f32.mrf.mxu2 }
 0x1d1   : > { %v1575_v36 = vpop.f32.mrf.mxu1  ;;  %v1541_v37 = vpop.f32.mrf.mxu0  ;;  %v1607_v1 = vadd.f32 %v2797_v61, %v1606_v62 }
 0x1d3   : > { %v1659_v51 = vld [vmem:[#allocation4] sm:$0xff]  ;;  %1613 = vst.msk [vmem:[#allocation5] sm:$0xff] %vm1610_vm4, %v1607_v1 }
 0x1d4   : > { %1645 = vrot.lane.b32.xlu0 %v1574_v33, %s3385_s0  ;;  %1615 = vrot.lane.b32.xlu1 %v1543_v35, %s3383_s17 }
 0x1d5   : > { %v1653_v55 = vld [vmem:[#allocation3] sm:$0xff] }
 0x1d6   : > { %1641 = vrot.lane.b32.xlu2 %v1543_v35, %s3385_s0 }
 0x1d8   : > { %v1608_v6 = vpop.f32.mrf.mxu2 }
 0x1da   : > { %v1665_v6 = vld [vmem:[#allocation5] sm:$0xff] }
 0x228   : > { %v1630_v38 = vpop.permute.xlu2 %1629 }
 0x229   : > { %1632 = vst.msk [vmem:[#allocation3 + $0x10] sm:$0xff] %vm1610_vm4, %v1630_v38 }
 0x230   : > { %v1642_v39 = vpop.permute.xlu2 %1641  ;;  %v1655_v57 = vld [vmem:[#allocation3 + $0x10] sm:$0xff] }
 0x231   : > { %1644 = vst.msk [vmem:[#allocation3 + $0x18] sm:$0xff] %vm1610_vm4, %v1642_v39 }
 0x238   : > { %v1656_v58 = vld [vmem:[#allocation3 + $0x18] sm:$0xff] }
 0x239   : > { %v1658_v59 = vpack.c.bf16 %v1656_v58, %v1655_v57 }
 0x23e   : > { %v1621_v40 = vpop.permute.xlu1 %1620  ;;  %v1634_v41 = vpop.permute.xlu0 %1633 }
 0x23f   : > { %1623 = vst.msk [vmem:[#allocation4 + $0x8] sm:$0xff] %vm1610_vm4, %v1621_v40 }
 0x240   : > { %1636 = vst.msk [vmem:[#allocation4 + $0x10] sm:$0xff] %vm1610_vm4, %v1634_v41 }
 0x246   : > { %v1646_v42 = vpop.permute.xlu0 %1645  ;;  %v1616_v43 = vpop.permute.xlu1 %1615  ;;  %v1660_v49 = vld [vmem:[#allocation4 + $0x8] sm:$0xff] }
 0x247   : > { %1648 = vst.msk [vmem:[#allocation4 + $0x18] sm:$0xff] %vm1610_vm4, %v1646_v42  ;;  %v1661_v44 = vld [vmem:[#allocation4 + $0x10] sm:$0xff]  ;;  %v1663_v52 = vpack.c.bf16 %v1660_v49, %v1659_v51 }
 0x248   : > { %1618 = vst.msk [vmem:[#allocation3 + $0x8] sm:$0xff] %vm1610_vm4, %v1616_v43 }
 0x249   : > { %v1678_v53 = vsel %vm1610_vm4, %v1663_v52, 0 }
 0x24e   : > { %v1662_v45 = vld [vmem:[#allocation4 + $0x18] sm:$0xff] }
 0x24f   : > { %v1664_v46 = vpack.c.bf16 %v1662_v45, %v1661_v44  ;;  %v1654_v54 = vld [vmem:[#allocation3 + $0x8] sm:$0xff] }
 0x250   : > { %v1657_v56 = vpack.c.bf16 %v1654_v54, %v1653_v55 }
 0x251   : > { %v1681_v47 = vsel %vm1610_vm4, %v1664_v46, 0 }
 0x252   : > { %1689 = vmatpush.bf16.xpose.msra.mxu3 %v1681_v47 }
 0x25a   : > { %1690 = vmatpush.bf16.xpose.msra.mxu3 %v1678_v53 }
 0x261   : > { %2556 = vmatmul.msk.bf16.vlgmr.msra.gmra.mxu3 %vm1610_vm4, %v1657_v56 }
 0x271   : > { %2557 = vmatmul.msk.bf16.gmra.mxu3 %vm1610_vm4, %v1658_v59 }
 0x2e4   : > { %v1692_v0 = vpop.f32.mrf.mxu3 }
 0x2e5   : > { %v1693_v2 = vadd.f32 %v1692_v0, %v1501_v60 }
 0x2e7   : > { %v1705_v3 = vadd.f32 %v2796_v63, %v1693_v2 }
 0x2e9   : > { %v1709_v4 = vsel %vm1526_vm3, %v1705_v3, -inf }
 0x2ea   : > { %1710 = vmax.xlane.f32.xlu0 %v1709_v4 }
 0x2ec   : > { %v1694_v7 = vpop.f32.mrf.mxu3 }
 0x2ed   : > { %v1695_v8 = vadd.f32 %v1694_v7, %v1502_v5 }
 0x2ef   : > { %v1706_v9 = vadd.f32 %v2796_v63, %v1695_v8 }
 0x2f1   : > { %v1712_v10 = vsel %vm1526_vm3, %v1706_v9, -inf }
 0x2f2   : > { %1713 = vmax.xlane.f32.xlu1 %v1712_v10 }
 0x2f4   : > { %v1697_v12 = vpop.f32.mrf.mxu3 }
 0x2f5   : > { %v1698_v13 = vadd.f32 %v1697_v12, %v1503_v11 }
 0x2f7   : > { %v1707_v14 = vadd.f32 %v2796_v63, %v1698_v13 }
 0x2f9   : > { %v1715_v15 = vsel %vm1526_vm3, %v1707_v14, -inf }
 0x2fa   : > { %1716 = vmax.xlane.f32.xlu2 %v1715_v15 }
 0x2fc   : > { %v1699_v17 = vpop.f32.mrf.mxu3 }
 0x2fd   : > { %v1700_v18 = vadd.f32 %v1699_v17, %v1504_v16 }
 0x2ff   : > { %v1708_v19 = vadd.f32 %v2796_v63, %v1700_v18 }
 0x301   : > { %v1718_v20 = vsel %vm1526_vm3, %v1708_v19, -inf }
 0x302   : > { %1719 = vmax.xlane.f32.xlu2 %v1718_v20 }
 0x31a   : > { %1637 = vrot.lane.b32.xlu2 %v1607_v1, %s3384_s10 }
 0x35d   : > { %v1711_v21 = vpop.xlane.xlu0 %1710 }
 0x35e   : > { %v1721_v22 = vsub.f32 %v1705_v3, %v1711_v21 }
 0x360   : > { %v1725_v23 = vmul.f32 1.442695, %v1721_v22 }
 0x362   : > { %2805 = vpow2.f32 %v1725_v23 }
 0x365   : > { %v1714_v24 = vpop.xlane.xlu1 %1713 }
 0x366   : > { %v1722_v25 = vsub.f32 %v1706_v9, %v1714_v24 }
 0x368   : > { %v3956_v27 = vpop.eup %2805  ;;  %v1727_v28 = vmul.f32 1.442695, %v1722_v25 }
 0x369   : > { %v1733_v29 = vsel %vm1526_vm3, %v3956_v27, 0.0 }
 0x36a   : > { %2807 = vpow2.f32 %v1727_v28  ;;  %1734 = vadd.xlane.f32.xlu0 %v1733_v29 }
 0x36d   : > { %v1717_v30 = vpop.xlane.xlu2 %1716 }
 0x36e   : > { %v1723_v39 = vsub.f32 %v1707_v14, %v1717_v30 }
 0x370   : > { %v2808_v31 = vpop.eup %2807  ;;  %v1729_v40 = vmul.f32 1.442695, %v1723_v39 }
 0x371   : > { %v1736_v32 = vsel %vm1526_vm3, %v2808_v31, 0.0 }
 0x372   : > { %1737 = vadd.xlane.f32.xlu1 %v1736_v32 }
 0x375   : > { %v1720_v33 = vpop.xlane.xlu2 %1719 }
 0x376   : > { %v1724_v34 = vsub.f32 %v1708_v19, %v1720_v33 }
 0x378   : > { %v1731_v35 = vmul.f32 1.442695, %v1724_v34 }
 0x37a   : > { %2809 = vpow2.f32 %v1731_v35 }
 0x37b   : > { %2811 = vpow2.f32 %v1729_v40 }
 0x37d   : > { %v1638_v38 = vpop.permute.xlu2 %1637 }
 0x37e   : > { %1649 = vrot.lane.b32.xlu0 %v1607_v1, %s3385_s0  ;;  %1640 = vst.msk [vmem:[#allocation5 + $0x10] sm:$0xff] %vm1610_vm4, %v1638_v38 }
 0x380   : > { %v3962_v36 = vpop.eup %2809 }
 0x381   : > { %v1742_v37 = vsel %vm1526_vm3, %v3962_v36, 0.0  ;;  %v3968_v41 = vpop.eup %2811 }
 0x382   : > { %1743 = vadd.xlane.f32.xlu2 %v1742_v37  ;;  %v1739_v42 = vsel %vm1526_vm3, %v3968_v41, 0.0 }
 0x385   : > { %v1667_v53 = vld [vmem:[#allocation5 + $0x10] sm:$0xff] }
 0x38b   : > { %1625 = vrot.lane.b32.xlu1 %v1607_v1, %s3383_s17 }
 0x3a8   : > { %1740 = vadd.xlane.f32.xlu0 %v1739_v42 }
 0x3dd   : > { %v1735_v43 = vpop.xlane.xlu0 %1734 }
 0x3de   : > { %v1756_v62 = vand.u32 2147483648, %v1735_v43  ;;  %vm1750_vm9 = vweird.f32 %v1735_v43  ;;  %v1754_v63 = vand.u32 2147483647, %v1735_v43 }
 0x3e0   : > { %v1757_v3 = vor.u32 1.1754944e-38, %v1756_v62  ;;  %vm1755_vm12 = vcmp.eq.f32.partialorder %v1754_v63, 8.507059e+37 }
 0x3e5   : > { %v1738_v44 = vpop.xlane.xlu1 %1737 }
 0x3e6   : > { %2813 = vrcp.f32 %v1738_v44  ;;  %v1771_v58 = vand.u32 2147483648, %v1738_v44  ;;  %vm1765_vm7 = vweird.f32 %v1738_v44  ;;  %v1769_v60 = vand.u32 2147483647, %v1738_v44 }
 0x3e7   : > { %2815 = vrcp.f32 %v1735_v43 }
 0x3e8   : > { %v1772_v1 = vor.u32 1.1754944e-38, %v1771_v58  ;;  %vm1770_vm11 = vcmp.eq.f32.partialorder %v1769_v60, 8.507059e+37 }
 0x3ec   : > { %v2814_v45 = vpop.eup %2813 }
 0x3ed   : > { %v2816_v46 = vpop.eup %2815  ;;  %v1761_v47 = vmul.f32 %v2814_v45, %v1738_v44  ;;  %vm1766_vm5 = vweird.f32 %v2814_v45  ;;  %v2611_v44 = vld [vmem:[%s3797_s1] sm:$0xff] }
 0x3ee   : > { %v1746_v49 = vmul.f32 %v2816_v46, %v1735_v43  ;;  %vm1751_vm6 = vweird.f32 %v2816_v46  ;;  %vm1767_vm8 = vmor %vm1765_vm7, %vm1766_vm5  ;;  %vm1837_vm7 = vcmask 130112  }
 0x3ef   : > { %v1762_v50 = vsub.f32 1.0, %v1761_v47  ;;  %vm1752_vm10 = vmor %vm1750_vm9, %vm1751_vm6 }
 0x3f0   : > { %v1650_v48 = vpop.permute.xlu0 %1649  ;;  %v1747_v51 = vsub.f32 1.0, %v1746_v49  ;;  %v2798_v49 = vld [vmem:[%s4172_s22] ss:$0 sm:$0xff] }
 0x3f1   : > { %1652 = vst.msk [vmem:[#allocation5 + $0x18] sm:$0xff] %vm1610_vm4, %v1650_v48  ;;  %v1763_v52 = vmul.f32 %v2814_v45, %v1762_v50 }
 0x3f2   : > { %v1748_v55 = vmul.f32 %v2816_v46, %v1747_v51 }
 0x3f3   : > { %v1764_v57 = vadd.f32 %v2814_v45, %v1763_v52 }
 0x3f4   : > { %v1749_v59 = vadd.f32 %v2816_v46, %v1748_v55  ;;  %v3389_v55 = vmov 32.0  }
 0x3f5   : > { %v1768_v0 = vsel %vm1767_vm8, %v2814_v45, %v1764_v57  ;;  %v1744_v12 = vpop.xlane.xlu2 %1743  ;;  %vm1843_vm8 = vcmask 195712  }
 0x3f6   : > { %v1753_v2 = vsel %vm1752_vm10, %v2816_v46, %v1749_v59  ;;  %v1773_v4 = vsel %vm1770_vm11, %v1772_v1, %v1768_v0  ;;  %2817 = vrcp.f32 %v1744_v12  ;;  %v1801_v21 = vand.u32 2147483648, %v1744_v12 }
 0x3f7   : > { %v1758_v5 = vsel %vm1755_vm12, %v1757_v3, %v1753_v2  ;;  %v1774_v8 = vmul.f32 %v2808_v31, %v1773_v4  ;;  %vm1795_vm14 = vweird.f32 %v1744_v12  ;;  %v1799_v22 = vand.u32 2147483647, %v1744_v12  ;;  %v2614_v2 = vld [vmem:[%s3867_s19 + $0x8] sm:$0xff]  ;;  %v2613_v3 = vld [vmem:[%s3867_s19] sm:$0xff]  ;;  %s4175_s19 = scalar_lea.vmem [#allocation21], %s3789_s12 }
 0x3f8   : > { %v1668_v54 = vld [vmem:[#allocation5 + $0x18] sm:$0xff]  ;;  %v1759_v10 = vmul.f32 %v3956_v27, %v1758_v5  ;;  %v1802_v29 = vor.u32 1.1754944e-38, %v1801_v21  ;;  %1959 = vmatpush.bf16.msrb.mxu2 %v2614_v2  ;;  %v2615_v4 = vld [vmem:[%s3806_s13] sm:$0xff]  ;;  %s4174_s13 = scalar_lea.vmem [#allocation27], %s3789_s12 }
 0x3f9   : > { %v1670_v56 = vpack.c.bf16 %v1668_v54, %v1667_v53  ;;  %vm1800_vm1 = vcmp.eq.f32.partialorder %v1799_v22, 8.507059e+37  ;;  %v2801_v21 = vld [vmem:[%s4175_s19] ss:$0 sm:$0xff] }
 0x3fa   : > { %v1805_v11 = vpack.c.bf16 %v1774_v8, %v1759_v10 }
 0x3fb   : > { %1819 = vmatpush.bf16.msrb.mxu0 %v1670_v56 }
 0x3fc   : > { %v2818_v13 = vpop.eup %2817  ;;  %1960 = vmatpush.bf16.msrb.mxu2 %v2613_v3 }
 0x3fd   : > { %v1626_v61 = vpop.permute.xlu1 %1625  ;;  %v1791_v14 = vmul.f32 %v2818_v13, %v1744_v12  ;;  %vm1796_vm13 = vweird.f32 %v2818_v13 }
 0x3fe   : > { %1628 = vst.msk [vmem:[#allocation5 + $0x8] sm:$0xff] %vm1610_vm4, %v1626_v61  ;;  %vm1797_vm15 = vmor %vm1795_vm14, %vm1796_vm13  ;;  %vm1980_vm13 = vcmask 130048  }
 0x3ff   : > { %v1792_v15 = vsub.f32 1.0, %v1791_v14 }
 0x401   : > { %v1793_v17 = vmul.f32 %v2818_v13, %v1792_v15 }
 0x403   : > { %v1794_v19 = vadd.f32 %v2818_v13, %v1793_v17  ;;  %v2800_v17 = vld [vmem:[%s4174_s13] ss:$0 sm:$0xff] }
 0x405   : > { %v1666_v7 = vld [vmem:[#allocation5 + $0x8] sm:$0xff]  ;;  %v1798_v28 = vsel %vm1797_vm15, %v2818_v13, %v1794_v19 }
 0x406   : > { %v1669_v9 = vpack.c.bf16 %v1666_v7, %v1665_v6  ;;  %v1803_v32 = vsel %vm1800_vm1, %v1802_v29, %v1798_v28  ;;  %v2802_v28 = vld [vmem:[%s4176_s7] ss:$0 sm:$0xff] }
 0x407   : > { %v1804_v37 = vmul.f32 %v3962_v36, %v1803_v32 }
 0x408   : > { %1820 = vmatpush.bf16.msrb.mxu0 %v1669_v9 }
 0x40b   : > { %2558 = vmatmul.msk.bf16.vlgmr.msrb.gmra.mxu0 %vm1526_vm3, %v1805_v11 }
 0x41b   : > { %v1741_v16 = vpop.xlane.xlu0 %1740 }
 0x41c   : > { %2819 = vrcp.f32 %v1741_v16  ;;  %v1786_v24 = vand.u32 2147483648, %v1741_v16  ;;  %v1784_v27 = vand.u32 2147483647, %v1741_v16  ;;  %vm1780_vm2 = vweird.f32 %v1741_v16 }
 0x41d   : > { %2821 = vrcp.f32 %v3389_v55 }
 0x41e   : > { %v1787_v31 = vor.u32 1.1754944e-38, %v1786_v24  ;;  %vm1785_vm6 = vcmp.eq.f32.partialorder %v1784_v27, 8.507059e+37 }
 0x422   : > { %v2820_v18 = vpop.eup %2819 }
 0x423   : > { %v1776_v20 = vmul.f32 %v2820_v18, %v1741_v16  ;;  %vm1781_vm0 = vweird.f32 %v2820_v18  ;;  %v2822_v56 = vpop.eup %2821 }
 0x424   : > { %vm1782_vm5 = vmor %vm1780_vm2, %vm1781_vm0  ;;  %v1896_v57 = vmul.f32 32.0, %v2822_v56  ;;  %vm1900_vm9 = vweird.f32 %v2822_v56 }
 0x425   : > { %v1777_v23 = vsub.f32 1.0, %v1776_v20 }
 0x426   : > { %v1897_v58 = vsub.f32 1.0, %v1896_v57 }
 0x427   : > { %v1778_v25 = vmul.f32 %v2820_v18, %v1777_v23 }
 0x428   : > { %v1898_v59 = vmul.f32 %v2822_v56, %v1897_v58 }
 0x429   : > { %v1779_v30 = vadd.f32 %v2820_v18, %v1778_v25 }
 0x42a   : > { %v1899_v60 = vadd.f32 %v2822_v56, %v1898_v59 }
 0x42b   : > { %v1783_v33 = vsel %vm1782_vm5, %v2820_v18, %v1779_v30 }
 0x42c   : > { %v1788_v34 = vsel %vm1785_vm6, %v1787_v31, %v1783_v33  ;;  %v1901_v61 = vsel %vm1900_vm9, %v2822_v56, %v1899_v60 }
 0x42d   : > { %v1789_v35 = vmul.f32 %v3968_v41, %v1788_v34  ;;  %v2612_v41 = vld [vmem:[%s3797_s1 + $0x8] sm:$0xff]  ;;  %s4173_s1 = scalar_lea.vmem [#allocation25], %s3789_s12 }
 0x42e   : > { %1882 = vmatpush.bf16.msrb.mxu1 %v2612_v41  ;;  %v2799_v14 = vld [vmem:[%s4173_s1] ss:$0 sm:$0xff] }
 0x42f   : > { %v1806_v38 = vpack.c.bf16 %v1804_v37, %v1789_v35 }
 0x431   : > { %2559 = vmatmul.msk.bf16.gmra.mxu0 %vm1526_vm3, %v1806_v38 }
 0x432   : > { %1883 = vmatpush.bf16.msrb.mxu1 %v2611_v44 }
 0x436   : > { %1991 = vmatpush.bf16.msra.mxu1 %v2615_v4 }
 0x488   : > { %v1822_v39 = vpop.f32.mrf.mxu0 }
 0x489   : > { %1832 = vst.msk [vmem:[#allocation6] sm:$0xff] %vm1610_vm4, %v1822_v39  ;;  %vm1849_vm4 = vcmask 261312  }
 0x490   : > { %v1824_v40 = vpop.f32.mrf.mxu0 }
 0x491   : > { %1834 = vrot.lane.b32.xlu1 %v1824_v40, %s3386_s21 }
 0x4ae   : > { %v1827_v42 = vpop.f32.mrf.mxu0 }
 0x4af   : > { %1840 = vrot.lane.b32.xlu1 %v1827_v42, %s3387_s28 }
 0x4b6   : > { %v1829_v43 = vpop.f32.mrf.mxu0 }
 0x4b7   : > { %1846 = vrot.lane.b32.xlu1 %v1829_v43, %s3388_s9 }
 0x503   : > { %v1835_v36 = vpop.permute.xlu1 %1834 }
 0x504   : > { %1838 = vst.msk [vmem:[#allocation6] sm:$0xff] %vm1837_vm7, %v1835_v36 }
 0x521   : > { %v1841_v45 = vpop.permute.xlu1 %1840 }
 0x522   : > { %1844 = vst.msk [vmem:[#allocation6] sm:$0xff] %vm1843_vm8, %v1841_v45 }
 0x529   : > { %v1847_v46 = vpop.permute.xlu1 %1846 }
 0x52a   : > { %1850 = vst.msk [vmem:[#allocation6] sm:$0xff] %vm1849_vm4, %v1847_v46 }
 0x531   : > { %v1851_v47 = vld [vmem:[#allocation6] sm:$0xff] }
 0x532   : > { %v1852_v48 = vpack.c.bf16 %v1851_v47, %v1851_v47 }
 0x534   : > { %2568 = vmatmul.msk.bf16.vlgmr.msrb.gmra.mxu1 %vm1526_vm3, %v1852_v48  ;;  %v2803_v48 = vld [vmem:[%s4177_s27] ss:$0 sm:$0xff] }
 0x5b1   : > { %v1885_v50 = vpop.f32.mrf.mxu1 }
 0x5b2   : > { %v1886_v51 = vadd.f32 %v2798_v49, %v1885_v50  ;;  %v2804_v50 = vld [vmem:[%s1227_s25] ss:$0 sm:$0xff] }
 0x5b4   : > { %v1889_v52 = vadd.f32 %v1886_v51, %v3893_v26 }
 0x5b6   : > { %v1892_v53 = vsel %vm1526_vm3, %v1889_v52, 0.0 }
 0x5b7   : > { %1893 = vadd.xlane.f32.xlu1 %v1892_v53 }
 0x5b9   : > { %v1887_v54 = vpop.f32.mrf.mxu1 }
 0x62a   : > { %v1894_v62 = vpop.xlane.xlu1 %1893 }
 0x62b   : > { %v1902_v63 = vmul.f32 %v1901_v61, %v1894_v62 }
 0x62d   : > { %v1903_v0 = vsub.f32 %v1889_v52, %v1902_v63 }
 0x62f   : > { %v1904_v26 = vmul.f32 %v1903_v0, %v1903_v0 }
 0x631   : > { %v1905_v1 = vsel %vm1526_vm3, %v1904_v26, 0.0 }
 0x632   : > { %1906 = vadd.xlane.f32.xlu0 %v1905_v1 }
 0x6a5   : > { %v1907_v5 = vpop.xlane.xlu0 %1906 }
 0x6a6   : > { %v1908_v6 = vmul.f32 %v1907_v5, %v1901_v61 }
 0x6a8   : > { %v1909_v7 = vadd.f32 1e-05, %v1908_v6 }
 0x6aa   : > { %2823 = vrsqrt.f32 %v1909_v7  ;;  %vm1916_vm11 = vweird.f32 %v1909_v7 }
 0x6b0   : > { %v2824_v8 = vpop.eup %2823 }
 0x6b1   : > { %v1911_v9 = vmul.f32 %v2824_v8, %v1909_v7  ;;  %vm1917_vm10 = vweird.f32 %v2824_v8 }
 0x6b2   : > { %vm1918_vm12 = vmor %vm1916_vm11, %vm1917_vm10 }
 0x6b3   : > { %v1912_v10 = vmul.f32 %v2824_v8, %v1911_v9 }
 0x6b5   : > { %v1913_v11 = vmul.f32 0.5, %v1912_v10 }
 0x6b7   : > { %v1914_v12 = vsub.f32 1.5, %v1913_v11 }
 0x6b9   : > { %v1915_v13 = vmul.f32 %v2824_v8, %v1914_v12 }
 0x6bb   : > { %v1919_v15 = vsel %vm1918_vm12, %v2824_v8, %v1915_v13 }
 0x6bc   : > { %v1920_v16 = vmul.f32 %v1919_v15, %v1903_v0 }
 0x6be   : > { %v1924_v18 = vmul.f32 %v2799_v14, %v1920_v16 }
 0x6c0   : > { %v1928_v19 = vadd.f32 %v2800_v17, %v1924_v18 }
 0x6c2   : > { %v1929_v20 = vpack.c.bf16 %v1928_v19, %v1928_v19 }
 0x6c4   : > { %2577 = vmatmul.msk.bf16.vlgmr.msrb.gmra.mxu2 %vm1526_vm3, %v1929_v20 }
 0x747   : > { %v1962_v22 = vpop.f32.mrf.mxu2 }
 0x748   : > { %v1963_v23 = vadd.f32 %v2801_v21, %v1962_v22 }
 0x74a   : > { %v1966_v24 = vmax.f32 %v1963_v23, 0.0 }
 0x74c   : > { %v1967_v25 = vpack.c.bf16 %v1966_v24, %v1966_v24 }
 0x74e   : > { %2582 = vmatmul.msk.bf16.vlgmr.msra.gmra.mxu1 %vm1980_vm13, %v1967_v25 }
 0x74f   : > { %v1964_v27 = vpop.f32.mrf.mxu2 }
 0x7cb   : > { %v1993_v29 = vpop.f32.mrf.mxu1 }
 0x7cc   : > { %v1994_v30 = vadd.f32 %v2802_v28, %v1993_v29 }
 0x7ce   : > { %v1997_v31 = vadd.f32 %v1994_v30, %v1928_v19 }
 0x7d0   : > { %v2000_v32 = vsel %vm1526_vm3, %v1997_v31, 0.0 }
 0x7d1   : > { %2001 = vadd.xlane.f32.xlu2 %v2000_v32 }
 0x7d3   : > { %v1995_v33 = vpop.f32.mrf.mxu1 }
 0x844   : > { %v2002_v34 = vpop.xlane.xlu2 %2001 }
 0x845   : > { %v2003_v35 = vmul.f32 %v2002_v34, %v1901_v61 }
 0x847   : > { %v2004_v37 = vsub.f32 %v1997_v31, %v2003_v35 }
 0x849   : > { %v2005_v38 = vmul.f32 %v2004_v37, %v2004_v37 }
 0x84b   : > { %v2006_v39 = vsel %vm1526_vm3, %v2005_v38, 0.0 }
 0x84c   : > { %2007 = vadd.xlane.f32.xlu0 %v2006_v39 }
 0x8bf   : > { %v2008_v40 = vpop.xlane.xlu0 %2007 }
 0x8c0   : > { %v2009_v42 = vmul.f32 %v2008_v40, %v1901_v61 }
 0x8c2   : > { %v2010_v43 = vadd.f32 1e-05, %v2009_v42 }
 0x8c4   : > { %2825 = vrsqrt.f32 %v2010_v43  ;;  %vm2017_vm15 = vweird.f32 %v2010_v43 }
 0x8ca   : > { %v2826_v41 = vpop.eup %2825 }
 0x8cb   : > { %v2012_v36 = vmul.f32 %v2826_v41, %v2010_v43  ;;  %vm2018_vm14 = vweird.f32 %v2826_v41 }
 0x8cc   : > { %vm2019_vm0 = vmor %vm2017_vm15, %vm2018_vm14 }
 0x8cd   : > { %v2013_v44 = vmul.f32 %v2826_v41, %v2012_v36 }
 0x8cf   : > { %v2014_v45 = vmul.f32 0.5, %v2013_v44 }
 0x8d1   : > { %v2015_v46 = vsub.f32 1.5, %v2014_v45 }
 0x8d3   : > { %v2016_v47 = vmul.f32 %v2826_v41, %v2015_v46 }
 0x8d5   : > { %v2020_v49 = vsel %vm2019_vm0, %v2826_v41, %v2016_v47 }
 0x8d6   : > { %v2021_v51 = vmul.f32 %v2020_v49, %v2004_v37 }
 0x8d8   : > { %v2025_v52 = vmul.f32 %v2803_v48, %v2021_v51  ;;  %2034 = sbr.rel (%p2583_p5) target bundleno = 2420 (0x974), region = 196 }
 0x8da   : > { %v2029_v53 = vadd.f32 %v2804_v50, %v2025_v52 }
 0x8dc   : > { %2030 = vst.msk [vmem:[#allocation2] sm:$0xff] %vm1526_vm3, %v2029_v53 }
 0x8dd   : > { %v2617_v54 = vld [vmem:[#allocation13 + $0x8] sm:$0xff]  ;;  %v2616_v55 = vld [vmem:[#allocation13] sm:$0xff]  ;;  %v2035_v56 = vpack.c.bf16 %v2029_v53, %v2029_v53  ;;  %v2827_v57 = vld [vmem:[#allocation15] ss:$0 sm:$0xff]  ;;  %v2072_v60 = vlaneseq }
 0x8de   : > { %2065 = vmatpush.bf16.msra.mxu0 %v2617_v54 }
 0x8df   : > { %v2073_v62 = vand.u32 127, %v2072_v60 }
 0x8e1   : > { %vm2074_vm1 = vcmp.ge.s32.totalorder %v2073_v62, 16  ;;  %vm2075_vm2 = vcmp.lt.s32.totalorder %v2073_v62, 20 }
 0x8e2   : > { %2066 = vmatpush.bf16.msra.mxu0 %v2616_v55  ;;  %vm2076_vm5 = vmand %vm2074_vm1, %vm2075_vm2 }
 0x8e5   : > { %2592 = vmatmul.msk.bf16.vlgmr.msra.gmra.mxu0 %vm1526_vm3, %v2035_v56 }
 0x962   : > { %v2068_v58 = vpop.f32.mrf.mxu0 }
 0x963   : > { %v2069_v59 = vadd.f32 %v2827_v57, %v2068_v58 }
 0x965   : > { %v2077_v61 = vmul.f32 0.5, %v2069_v59 }
 0x967   : > { %2828 = vtanh.f32 %v2077_v61 }
 0x96a   : > { %v2070_v63 = vpop.f32.mrf.mxu0 }
 0x96d   : > { %v2829_v0 = vpop.eup %2828 }
 0x96e   : > { %v2079_v26 = vadd.f32 1.0, %v2829_v0 }
 0x970   : > { %v2080_v1 = vmul.f32 0.5, %v2079_v26 }
 0x972   : > { %v2081_v2 = vsel %vm2076_vm5, %v2080_v1, %v2069_v59 }
 0x973   : > { %2082 = vst [vmem:[%s3877_s24] sm:$0xff] %v2081_v2 }
 0x974 PF: > { %s59_s2 = sadd.s32 1, %s3374_s2   ;;  %s4179_s30 = sld [smem:[#allocation39_spill]] }
 0x975   : > { %p56_p6 = scmp.ge.s32.totalorder %s59_s2, 6   ;;  %s4180_s3 = sld [smem:[#allocation40_spill]] }
 0x976   : > { %s4181_s6 = sld [smem:[#allocation47_spill]] }
 0x977   : > { %s4182_s10 = sld [smem:[#allocation43_spill]]  ;;  %58 = sbr.rel (!%p56_p6) target bundleno = 54 (0x36), region = 340 }
 0x978   : > { %s4183_s0 = sld [smem:[#allocation44_spill]] }
 0x979   : > { %s4184_s11 = sld [smem:[#allocation45_spill]] }
 0x97a   : > { %s4185_s29 = sld [smem:[#allocation46_spill]] }
 0x97c   :  { %2114 = vsyncpa [#allocation9], 1 }
 0x97d   :  { %2116 = vsyncpa [#allocation9 + $0x1], 1 }
 0x97e   :  { %2117 = vsyncpa [#allocation11], 1 }
 0x97f   :  { %2118 = vsyncpa [#allocation14], 1 }
 0x980   :  { %2119 = vsyncpa [#allocation17], 1 }
 0x981   :  { %2121 = vsyncpa [#allocation17 + $0x1], 1 }
 0x982   :  { %2122 = vsyncpa [#allocation20], 1 }
 0x983   :  { %2124 = vsyncpa [#allocation20 + $0x1], 1 }
 0x984   :  { %2125 = vsyncpa [#allocation23], 1 }
 0x985   :  { %2127 = vsyncpa [#allocation23 + $0x1], 1 }
 0x986   :  { %2128 = vsyncpa [#allocation26], 1 }
 0x987   :  { %2130 = vsyncpa [#allocation26 + $0x1], 1 }
 0x988   :  { %2131 = vsyncpa [#allocation29], 1 }
 0x989   :  { %2133 = vsyncpa [#allocation29 + $0x1], 1 }

// kernel: fidnet_forward.2
= control target key start
LH: loop header
LB: loop body
LE: loop exit
PB: predicated region body
PF: predicated region fallthrough
CT: control target
= control target key end

     0   :  { %s3812_s0 = inlined_call_operand.vmem [shape: f32[2,8,4], index: 0, kind: input, shape index: {}]   ;;  %s3813_s1 = inlined_call_operand.vmem [shape: s32[2,8,1], index: 1, kind: input, shape index: {}]   ;;  %s3814_s2 = inlined_call_operand.vmem [shape: f32[2,1,64], index: 2, kind: input, shape index: {}]   ;;  %s3815_s3 = inlined_call_operand.vmem [shape: f32[64,64], index: 3, kind: input, shape index: {}]   ;;  %s3816_s4 = inlined_call_operand.vmem [shape: f32[1,32], index: 4, kind: input, shape index: {}]   ;;  %s3817_s5 = inlined_call_operand.vmem [shape: bf16[16,32], index: 5, kind: input, shape index: {}]   ;;  %s3818_s6 = inlined_call_operand.vmem [shape: bf16[4,32], index: 6, kind: input, shape index: {}]   ;;  %s3819_s7 = inlined_call_operand.vmem [shape: f32[1,32], index: 7, kind: input, shape index: {}]   ;;  %s3820_s8 = inlined_call_operand.vmem [shape: bf16[32,32], index: 8, kind: input, shape index: {}]   ;;  %s3821_s9 = inlined_call_operand.vmem [shape: bf16[32,32], index: 9, kind: input, shape index: {}]   ;;  %s3822_s10 = inlined_call_operand.vmem [shape: f32[1,32], index: 10, kind: input, shape index: {}]   ;;  %s3823_s11 = inlined_call_operand.vmem [shape: bf16[2,32,32], index: 11, kind: input, shape index: {}]   ;;  %s3824_s12 = inlined_call_operand.vmem [shape: f32[2,1,32], index: 12, kind: input, shape index: {}]   ;;  %s3825_s13 = inlined_call_operand.vmem [shape: bf16[2,32,32], index: 13, kind: input, shape index: {}]   ;;  %s3826_s14 = inlined_call_operand.vmem [shape: f32[2,1,32], index: 14, kind: input, shape index: {}]   ;;  %s3827_s15 = inlined_call_operand.vmem [shape: bf16[2,32,32], index: 15, kind: input, shape index: {}]   ;;  %s3828_s16 = inlined_call_operand.vmem [shape: f32[2,1,32], index: 16, kind: input, shape index: {}]   ;;  %s3829_s17 = inlined_call_operand.vmem [shape: bf16[2,32,32], index: 17, kind: input, shape index: {}]   ;;  %s3830_s18 = inlined_call_operand.hbm [shape: f32[2,1,32], index: 18, kind: input, shape index: {}]   ;;  %s3831_s19 = inlined_call_operand.vmem [shape: bf16[2,32,16], index: 19, kind: input, shape index: {}]   ;;  %s3832_s20 = inlined_call_operand.hbm [shape: f32[2,1,16], index: 20, kind: input, shape index: {}]   ;;  %s3833_s21 = inlined_call_operand.vmem [shape: bf16[2,16,32], index: 21, kind: input, shape index: {}]   ;;  %s3834_s22 = inlined_call_operand.hbm [shape: f32[2,1,32], index: 22, kind: input, shape index: {}]   ;;  %s3835_s23 = inlined_call_operand.hbm [shape: f32[2,1,32], index: 23, kind: input, shape index: {}]   ;;  %s3836_s24 = inlined_call_operand.hbm [shape: f32[2,1,32], index: 24, kind: input, shape index: {}]   ;;  %s3837_s25 = inlined_call_operand.hbm [shape: f32[2,1,32], index: 25, kind: input, shape index: {}]   ;;  %s3838_s26 = inlined_call_operand.hbm [shape: f32[2,1,32], index: 26, kind: input, shape index: {}]   ;;  %s3839_s27 = inlined_call_operand.vmem [shape: f32[2,1,32], index: 27, kind: output, shape index: {}]  }
   0x1   :  { %3853 = sst [smem:[#allocation30_spill]] %s3812_s0 }
   0x2   :  { %3854 = sst [smem:[#allocation31_spill]] %s3813_s1 }
   0x3   :  { %3855 = sst [smem:[#allocation32_spill]] %s3814_s2 }
   0x4   :  { %3856 = sst [smem:[#allocation33_spill]] %s3815_s3 }
   0x5   :  { %3857 = sst [smem:[#allocation34_spill]] %s3816_s4 }
   0x6   :  { %3858 = sst [smem:[#allocation35_spill]] %s3817_s5 }
   0x7   :  { %3859 = sst [smem:[#allocation36_spill]] %s3818_s6 }
   0x8   :  { %3860 = sst [smem:[#allocation37_spill]] %s3819_s7 }
   0x9   :  { %3861 = sst [smem:[#allocation38_spill]] %s3820_s8 }
   0xa   :  { %3862 = sst [smem:[#allocation39_spill]] %s3821_s9 }
   0xb   :  { %3863 = sst [smem:[#allocation40_spill]] %s3822_s10 }
   0xc   :  { %3864 = sst [smem:[#allocation41_spill]] %s3823_s11 }
   0xd   :  { %3865 = sst [smem:[#allocation42_spill]] %s3825_s13 }
   0xe   :  { %3866 = sst [smem:[#allocation43_spill]] %s3827_s15 }
   0xf   :  { %3867 = sst [smem:[#allocation44_spill]] %s3828_s16 }
  0x10   :  { %3868 = sst [smem:[#allocation45_spill]] %s3829_s17 }
  0x11   :  { %3869 = sst [smem:[#allocation46_spill]] %s3830_s18 }
  0x12   :  { %3870 = sst [smem:[#allocation47_spill]] %s3831_s19 }
  0x13   :  { %3871 = sst [smem:[#allocation48_spill]] %s3832_s20 }
  0x14   :  { %3872 = sst [smem:[#allocation49_spill]] %s3833_s21 }
  0x15   :  { %3873 = sst [smem:[#allocation50_spill]] %s3834_s22 }
  0x16   :  { %3874 = sst [smem:[#allocation51_spill]] %s3835_s23 }
  0x17   :  { %3875 = sst [smem:[#allocation52_spill]] %s3836_s24 }
  0x18   :  { %3876 = sst [smem:[#allocation53_spill]] %s3837_s25 }
  0x19   :  { %3877 = sst [smem:[#allocation54_spill]] %s3838_s26 }
  0x1a   :  { %3878 = sst [smem:[#allocation55_spill]] %s3839_s27 }
  0x1b   :  { %32 = vsyncpa [#allocation8], 0 }
  0x1c   :  { %34 = vsyncpa [#allocation8 + $0x1], 0 }
  0x1d   :  { %35 = vsyncpa [#allocation10], 0 }
  0x1e   :  { %37 = vsyncpa [#allocation10 + $0x1], 0 }
  0x1f   :  { %38 = vsyncpa [#allocation13], 0 }
  0x20   :  { %40 = vsyncpa [#allocation13 + $0x1], 0 }
  0x21   :  { %41 = vsyncpa [#allocation16], 0 }
  0x22   :  { %43 = vsyncpa [#allocation16 + $0x1], 0  ;;  %s3258_s7 = smov 0   ;;  %s3260_s4 = smov 0  }
  0x23   :  { %s3262_s8 = smov 0   ;;  %s3264_s30 = smov 0  }
  0x24   :  { %s3266_s9 = smov 0   ;;  %s3268_s5 = smov 0  }
  0x25   :  { %s3270_s28 = smov 0   ;;  %s3272_s0 = smov 0  }
  0x26 LB: > { %3879 = sst [smem:[#allocation22_spill]] %s3083_s4  ;;  %s3844_s10 = sadd.s32 4294967295, %s3107_s0   ;;  %s3107_s0 = sphi %s3272_s0, %s49_s0   ;;  %s3103_s28 = sphi %s3270_s28, %s3943_s28   ;;  %s3099_s5 = sphi %s3268_s5, %s3942_s5   ;;  %s3095_s9 = sphi %s3266_s9, %s3941_s9   ;;  %s3091_s30 = sphi %s3264_s30, %s3940_s30   ;;  %s3087_s8 = sphi %s3262_s8, %s3939_s8   ;;  %s3083_s4 = sphi %s3260_s4, %s3938_s4   ;;  %s3079_s7 = sphi %s3258_s7, %s3937_s7  }
  0x27   : > { %3880 = sst [smem:[#allocation23_spill]] %s3087_s8  ;;  %s58_s29 = sadd.s32 1, %s3099_s5 }
  0x28   : > { %3881 = sst [smem:[#allocation24_spill]] %s3099_s5  ;;  %p59_p0 = scmp.ge.s32.totalorder %s58_s29, 2 }
  0x29   : > { %3882 = sst [smem:[#allocation25_spill]] %s3103_s28  ;;  %s61_s1 = sadd.s32 1, %s3103_s28 }
  0x2a   : > { %3883 = sst [smem:[#allocation26_spill]] %s3107_s0  ;;  %s496_s6 = sadd.s32 1, %s3087_s8 }
  0x2b   : > { %p503_p1 = scmp.ne.s32.totalorder %s3087_s8, %s3083_s4  ;;  %s3945_s29 = smov (%p59_p0, %s58_s29), 0 }
  0x2c   : > { %3884 = sst [smem:[#allocation27_spill]] %s3945_s29  ;;  %s3947_s1 = smov (!%p59_p0, %s61_s1), %s3103_s28 }
  0x2d   : > { %s493_s11 = ssub.s32 %s3099_s5, %s3945_s29  ;;  %p504_p2 = scmp.eq.s32.totalorder %s3107_s0, 0 }
  0x2e   : > { %p63_p3 = scmp.ge.s32.totalorder %s3947_s1, 2  ;;  %p494_p4 = scmp.eq.s32.totalorder %s493_s11, 0 }
  0x2f   : > { %p505_p5 = por %p504_p2, %p503_p1  ;;  %p509_p6 = scmp.ne.s32.totalorder %s3083_s4, %s3079_s7 }
  0x30   : > { %s3949_s1 = smov (%p63_p3, %s3947_s1), 0  ;;  %p510_p7 = scmp.eq.s32.totalorder %s3844_s10, 0 }
  0x31   : > { %3885 = sst [smem:[#allocation28_spill]] %s3949_s1  ;;  %p2689_p8 = scmp.lt.s32.totalorder %s3107_s0, 4 }
  0x32   : > { %s3312_s2 = scalar_select %p494_p4, %s3087_s8, %s496_s6  }
  0x33   : > { %s3318_s3 = sand.u32 1, %s3087_s8   ;;  %p3320_p9 = por %p510_p7, %p509_p6 }
  0x34   : > { %3886 = sst [smem:[#allocation29_spill]] %s3312_s2  ;;  %s3325_s11 = sand.u32 1, %s3107_s0  }
  0x35   : > { %p3327_p10 = pnand %p2689_p8, %p505_p5  ;;  %s3889_s20 = sld [smem:[#allocation48_spill]] }
  0x36   : > { %s889_s2 = scalar_lea.vmem [#allocation9], %s3318_s3  ;;  %p2526_p11 = scmp.ge.s32.totalorder %s3107_s0, 1 }
  0x37   : > { %s896_s8 = sshll.u32 %s889_s2, 4  ;;  %s3847_s27 = scalar_lea.sflag [#allocation10], %s3325_s11  ;;  %s897_s8 = int_to_ptr.vmem [resolvable:$true] %s896_s8 }
  0x38   : > { %p994_p12 = scmp.lt.s32.totalorder %s3107_s0, 5  ;;  %s3890_s23 = sld [smem:[#allocation51_spill]] }
  0x39   : > { %s3892_s25 = sld [smem:[#allocation53_spill]]  ;;  %s3849_s17 = scalar_lea.sflag [#allocation16], %s3325_s11 }
  0x3a   : > { %p3347_p13 = pnand %p2526_p11, %p994_p12  ;;  %s3893_s18 = sld [smem:[#allocation46_spill]] }
  0x3b   : > { %s892_s1 = scalar_lea.hbm %s3889_s20, %s3099_s5  ;;  %s931_s20 = scalar_lea.vmem [#allocation12], %s3318_s3 }
  0x3c   : > { %s894_s28 = sshll.u32 %s892_s1, 4  ;;  %s938_s19 = sshll.u32 %s931_s20, 4  ;;  %s895_s28 = int_to_ptr.hbm [resolvable:$true] %s894_s28  ;;  %s939_s19 = int_to_ptr.vmem [resolvable:$true] %s938_s19 }
  0x3d   : > { %2673 = dma.hbm_to_vmem [thread:$0]  (!%p3327_p10), %s895_s28, 16, %s897_s8, %s3847_s27  }
  0x3e   : > { %s934_s1 = scalar_lea.hbm %s3890_s23, %s3099_s5  ;;  %s3848_s8 = scalar_lea.sflag [#allocation13], %s3325_s11 }
  0x3f   : > { %s936_s2 = sshll.u32 %s934_s1, 4  ;;  %s968_s10 = scalar_lea.hbm %s3892_s25, %s3099_s5  ;;  %s937_s2 = int_to_ptr.hbm [resolvable:$true] %s936_s2 }
  0x40   : > { %2679 = dma.hbm_to_vmem [thread:$0]  (!%p3327_p10), %s937_s2, 16, %s939_s19, %s3848_s8  }
  0x41   : > { %s970_s27 = sshll.u32 %s968_s10, 4  ;;  %s965_s23 = scalar_lea.vmem [#allocation15], %s3318_s3  ;;  %s971_s27 = int_to_ptr.hbm [resolvable:$true] %s970_s27 }
  0x42   : > { %s972_s1 = sshll.u32 %s965_s23, 4  ;;  %s867_s2 = scalar_lea.hbm %s3893_s18, %s3099_s5  ;;  %s973_s1 = int_to_ptr.vmem [resolvable:$true] %s972_s1 }
  0x43   : > { %2685 = dma.hbm_to_vmem [thread:$0]  (!%p3327_p10), %s971_s27, 16, %s973_s1, %s3849_s17  }
  0x44   : > { %s864_s21 = scalar_lea.vmem [#allocation7], %s3318_s3  ;;  %s869_s10 = sshll.u32 %s867_s2, 4  ;;  %s870_s10 = int_to_ptr.hbm [resolvable:$true] %s869_s10 }
  0x45   : > { %s871_s28 = sshll.u32 %s864_s21, 4  ;;  %s862_s23 = scalar_lea.sflag [#allocation8], %s3318_s3  ;;  %s872_s28 = int_to_ptr.vmem [resolvable:$true] %s871_s28 }
  0x46   : > { %2670 = dma.hbm_to_vmem [thread:$0]  (!%p3327_p10), %s870_s10, 16, %s872_s28, %s862_s23  }
  0x47   : > { %s3894_s22 = sld [smem:[#allocation50_spill]]  ;;  %s914_s1 = scalar_lea.vmem [#allocation11], %s3318_s3 }
  0x48   : > { %s921_s20 = sshll.u32 %s914_s1, 4  ;;  %s3895_s2 = scalar_lea.sflag [#allocation10], %s3325_s11  ;;  %s922_s20 = int_to_ptr.vmem [resolvable:$true] %s921_s20 }
  0x49   : > { %s3896_s24 = sld [smem:[#allocation52_spill]]  ;;  %s948_s28 = scalar_lea.vmem [#allocation14], %s3318_s3 }
  0x4a   : > { %s955_s10 = sshll.u32 %s948_s28, 4  ;;  %s3897_s25 = scalar_lea.sflag [#allocation13], %s3325_s11  ;;  %s956_s10 = int_to_ptr.vmem [resolvable:$true] %s955_s10 }
  0x4b   : > { %s3898_s26 = sld [smem:[#allocation54_spill]]  ;;  %s3899_s17 = scalar_lea.sflag [#allocation16], %s3325_s11 }
  0x4d   : > { %s917_s27 = scalar_lea.hbm %s3894_s22, %s3099_s5  ;;  %s982_s22 = scalar_lea.vmem [#allocation17], %s3318_s3 }
  0x4e   : > { %s919_s19 = sshll.u32 %s917_s27, 4  ;;  %s989_s16 = sshll.u32 %s982_s22, 4  ;;  %s920_s19 = int_to_ptr.hbm [resolvable:$true] %s919_s19  ;;  %s990_s16 = int_to_ptr.vmem [resolvable:$true] %s989_s16 }
  0x4f   : > { %2676 = dma.hbm_to_vmem [thread:$0]  (!%p3327_p10), %s920_s19, 16, %s922_s20, %s3895_s2  }
  0x50   : > { %s951_s18 = scalar_lea.hbm %s3896_s24, %s3099_s5  ;;  %998 = sbr.rel (%p3347_p13) target bundleno = 2531 (0x9e3), region = 128 }
  0x51   : > { %s953_s23 = sshll.u32 %s951_s18, 4  ;;  %s985_s1 = scalar_lea.hbm %s3898_s26, %s3099_s5  ;;  %s954_s23 = int_to_ptr.hbm [resolvable:$true] %s953_s23 }
  0x52   : > { %2682 = dma.hbm_to_vmem [thread:$0]  (!%p3327_p10), %s954_s23, 16, %s956_s10, %s3897_s25  }
  0x53   : > { %s987_s15 = sshll.u32 %s985_s1, 4  ;;  %s3405_s18 = sand.u32 (!%p3347_p13), 1, %s3083_s4   ;;  %s988_s15 = int_to_ptr.hbm [resolvable:$true] %s987_s15 }
  0x54   : > { %2688 = dma.hbm_to_vmem [thread:$0]  (!%p3327_p10), %s988_s15, 16, %s990_s16, %s3899_s17  }
  0x55   : > { %s1001_s20 = scalar_lea.sflag [#allocation8], %s3405_s18 }
  0x56   : > { %3062 = dma.done.wait (%p3320_p9), %s1001_s20, 16  }
  0x57   : > { %3064 = vsyncadd (%p3320_p9), %s1001_s20, 4294967280  ;;  %s3900_s22 = sadd.s32 4294967295, %s3107_s0  }
  0x58   : > { %s1009_s15 = sand.u32 1, %s3900_s22  }
  0x59   : > { %s1010_s16 = scalar_lea.sflag [#allocation10], %s1009_s15 }
  0x5a   : > { %3066 = dma.done.wait (%p3320_p9), %s1010_s16, 32  }
  0x5b   : > { %3068 = vsyncadd (%p3320_p9), %s1010_s16, 4294967264  ;;  %s1028_s7 = scalar_lea.sflag [#allocation13], %s1009_s15 }
  0x5c   : > { %3070 = dma.done.wait (%p3320_p9), %s1028_s7, 32  }
  0x5d   : > { %3072 = vsyncadd (%p3320_p9), %s1028_s7, 4294967264  ;;  %s1046_s21 = scalar_lea.sflag [#allocation16], %s1009_s15 }
  0x5e   : > { %3074 = dma.done.wait (%p3320_p9), %s1046_s21, 32  }
  0x5f   : > { %3076 = vsyncadd (%p3320_p9), %s1046_s21, 4294967264  ;;  %p1200_p0 = scmp.lt.s32.totalorder %s3095_s9, 1  ;;  %p1211_p1 = scmp.lt.s32.totalorder %s3091_s30, 1 }
  0x60   : > { %s3902_s20 = sld [smem:[#allocation30_spill]]  ;;  %s1057_s11 = scalar_lea.vmem [#allocation17], %s3405_s18 }
  0x61   : > { %s3951_s9 = smov (!%p1200_p0, %s3095_s9), 1  ;;  %s3903_s7 = sld [smem:[#allocation31_spill]] }
  0x62   : > { %s3438_s10 = scalar_select %p1211_p1, %s3091_s30, 1 }
  0x63   : > { %s2527_s29 = sshll.u32 %s3951_s9, 3  ;;  %s3904_s24 = sld [smem:[#allocation41_spill]] }
  0x64   : > { %s2627_s28 = sshll.u32 %s3438_s10, 4  ;;  %s3905_s13 = sld [smem:[#allocation42_spill]] }
  0x65   : > { %s3906_s16 = sld [smem:[#allocation43_spill]]  ;;  %s2632_s1 = sshll.u32 %s3438_s10, 3 }
  0x66   : > { %s1203_s22 = scalar_lea.vmem %s3902_s20, %s2527_s29  ;;  %s3907_s27 = sld [smem:[#allocation44_spill]] }
  0x67   : > { %s1207_s21 = scalar_lea.vmem %s3903_s7, %s2527_s29  ;;  %s3908_s2 = sld [smem:[#allocation45_spill]] }
  0x68   : > { %s3910_s29 = sld [smem:[#allocation49_spill]]  ;;  %p2541_p2 = scmp.ne.s32.totalorder %s3091_s30, 0 }
  0x69   : > { %s3459_s26 = scalar_lea.vmem %s3904_s24, %s2627_s28  ;;  %s3911_s3 = sld [smem:[#allocation55_spill]] }
  0x6a   : > { %s3464_s8 = scalar_lea.vmem %s3905_s13, %s2627_s28  ;;  %s3909_s13 = sld [smem:[#allocation47_spill]] }
  0x6b   : > { %s3473_s7 = scalar_lea.vmem %s3906_s16, %s2627_s28  ;;  %s3912_s6 = sld [smem:[#allocation36_spill]] (!%p2541_p2) }
  0x6c   : > { %s1234_s19 = scalar_lea.vmem %s3907_s27, %s3438_s10  ;;  %1257 = sbr.rel (%p2541_p2) target bundleno = 502 (0x1f6), region = 160 }
  0x6d   : > { %s3482_s5 = scalar_lea.vmem %s3908_s2, %s2627_s28  ;;  %s3914_s23 = sld [smem:[#allocation38_spill]] (!%p2541_p2) }
  0x6e   : > { %s3493_s15 = scalar_lea.vmem %s3910_s29, %s2632_s1  ;;  %s3915_s29 = sld [smem:[#allocation34_spill]] (!%p2541_p2) }
  0x6f   : > { %s1252_s27 = scalar_lea.vmem %s3911_s3, %s3951_s9  ;;  %s3916_s2 = sld [smem:[#allocation39_spill]] (!%p2541_p2) }
  0x70   : > { %s3487_s4 = scalar_lea.vmem %s3909_s13, %s2627_s28  ;;  %s3913_s28 = sld [smem:[#allocation35_spill]] (!%p2541_p2) }
  0x71   : > { %v1288_v0 = vld [vmem:[%s1207_s21] sm:$0xff]  ;;  %vm1269_vm0 = vcmask 1041408   ;;  %v3109_v3 = vmov 0   ;;  %vm1265_vm1 = vcmask 31744   ;;  %vm1342_vm2 = vcmask 261120   ;;  %s3917_s13 = sld [smem:[#allocation37_spill]] }
  0x72   : > { %v1260_v1 = vld [vmem:[%s3912_s6] sm:$0x3]  ;;  %2763 = vset.pattern.permute.xlu0 %v3109_v3  ;;  %v3110_v9 = vmov 0.0   ;;  %vm1396_vm3 = vcmask 253952   ;;  %v1286_v12 = vlaneseq  ;;  %vm1303_vm5 = vcmask 130048   ;;  %s3918_s25 = sld [smem:[#allocation40_spill]] }
  0x73   : > { %v1258_v2 = vld [vmem:[%s1203_s22] sm:$0xff]  ;;  %v1271_v4 = vsel %vm1269_vm0, %v1260_v1, 0  ;;  %1290 = vperm.xlu0 %2763, %v1288_v0   ;;  %v2635_v7 = vld [vmem:[%s3914_s23 + $0x8] sm:$0xff]  ;;  %1393 = vst.msk [vmem:[#allocation2] sm:$0xff] %vm1342_vm2, %v3110_v9 }
  0x74   : > { %v1259_v5 = vpack.c.bf16 %v1258_v2, %v1258_v2  ;;  %1280 = vmatpush.bf16.msra.mxu0 %v1271_v4  ;;  %1380 = vmatpush.bf16.msra.mxu3 %v2635_v7  ;;  %v2634_v8 = vld [vmem:[%s3914_s23] sm:$0xff]  ;;  %1394 = vst.msk [vmem:[#allocation2 + $0x8] sm:$0xff] %vm1342_vm2, %v3110_v9  ;;  %v1287_v13 = vand.u32 127, %v1286_v12 }
  0x75   : > { %v1395_v10 = vld [vmem:[%s3915_s29] sm:$0x1]  ;;  %v2637_v11 = vld [vmem:[%s3916_s2 + $0x8] sm:$0xff] }
  0x76   : > { %v2633_v6 = vld [vmem:[%s3913_s28] sm:$0xff]  ;;  %1397 = vst.msk [vmem:[#allocation2] sm:$0x1] %vm1396_vm3, %v1395_v10  ;;  %1352 = vmatpush.bf16.msra.mxu2 %v2637_v11 }
  0x77   : > { %2542 = vmatmul.msk.bf16.vlgmr.msra.gmra.mxu0 %vm1265_vm1, %v1259_v5  ;;  %1314 = vmatpush.bf16.msra.mxu1 %v2633_v6  ;;  %v2764_v17 = vld [vmem:[%s3917_s13] ss:$0 sm:$0xff] }
  0x78   : > { %1381 = vmatpush.bf16.msra.mxu3 %v2634_v8  ;;  %v2636_v22 = vld [vmem:[%s3916_s2] sm:$0xff] }
  0x79   : > { %v2765_v28 = vld [vmem:[%s3918_s25] ss:$0 sm:$0xff] }
  0x7a   : > { %1353 = vmatpush.bf16.msra.mxu2 %v2636_v22 }
  0xe5   : > { %v1291_v14 = vpop.permute.xlu0 %1290 }
  0xe6   : > { %vm1292_vm4 = vcmp.eq.s32.totalorder %v1287_v13, %v1291_v14 }
  0xe7   : > { %v1293_v15 = vsel %vm1292_vm4, 1.0, %v3110_v9 }
  0xe8   : > { %v1294_v16 = vpack.c.bf16 %v1293_v15, %v1293_v15 }
  0xea   : > { %2547 = vmatmul.msk.bf16.vlgmr.msra.gmra.mxu1 %vm1303_vm5, %v1294_v16 }
  0xf4   : > { %v1282_v18 = vpop.f32.mrf.mxu0 }
  0xf5   : > { %v1283_v19 = vadd.f32 %v2764_v17, %v1282_v18 }
  0xf7   : > { %v1320_v20 = vpack.c.bf16 %v1283_v19, %v1283_v19 }
  0xf9   : > { %2565 = vmatmul.msk.bf16.vlgmr.msra.gmra.mxu3 %vm1342_vm2, %v1320_v20 }
  0xfc   : > { %v1284_v21 = vpop.f32.mrf.mxu0 }
 0x167   : > { %v1316_v23 = vpop.f32.mrf.mxu1 }
 0x168   : > { %v1325_v24 = vpack.c.bf16 %v1316_v23, %v1316_v23 }
 0x16a   : > { %2556 = vmatmul.msk.bf16.vlgmr.msra.gmra.mxu2 %vm1342_vm2, %v1325_v24 }
 0x16f   : > { %v1318_v25 = vpop.f32.mrf.mxu1 }
 0x17c   : > { %v1383_v26 = vpop.f32.mrf.mxu3 }
 0x184   : > { %v1385_v27 = vpop.f32.mrf.mxu3 }
 0x1ed   : > { %v1355_v29 = vpop.f32.mrf.mxu2 }
 0x1ee   : > { %v1384_v30 = vadd.f32 %v1383_v26, %v1355_v29 }
 0x1f0   : > { %v1391_v31 = vadd.f32 %v2765_v28, %v1384_v30 }
 0x1f2   : > { %v1392_v32 = vmax.f32 %v1391_v31, 0.0 }
 0x1f4   : > { %1398 = vst.msk [vmem:[#allocation2 + $0x1] sm:$0xff] %vm1342_vm2, %v1392_v32 }
 0x1f5   : > { %v1357_v33 = vpop.f32.mrf.mxu2 }
 0x1f6 PF: > { %v2639_v34 = vld [vmem:[%s3459_s26 + $0x8] sm:$0xff]  ;;  %v2638_v35 = vld [vmem:[%s3459_s26] sm:$0xff]  ;;  %vm1431_vm6 = vcmask 261120   ;;  %s3919_s1 = scalar_lea.vmem %s3824_s12, %s3438_s10  ;;  %vm1519_vm7 = vcmask 64512   ;;  %s3920_s29 = scalar_lea.vmem %s3826_s14, %s3438_s10  ;;  %vm1704_vm8 = vcmask 523264  }
 0x1f7   : > { %1441 = vmatpush.bf16.msra.mxu1 %v2639_v34  ;;  %v2641_v38 = vld [vmem:[%s3464_s8 + $0x8] sm:$0xff]  ;;  %v2640_v40 = vld [vmem:[%s3464_s8] sm:$0xff]  ;;  %s3111_s16 = smov 120   ;;  %s3112_s3 = smov 112  }
 0x1f8   : > { %v2766_v41 = vld [vmem:[%s3919_s1] ss:$0 sm:$0xff]  ;;  %s3113_s24 = smov 104   ;;  %v2643_v53 = vld [vmem:[%s3473_s7 + $0x8] sm:$0xff]  ;;  %s3922_s21 = sld [smem:[#allocation33_spill]] }
 0x1f9   : > { %v2767_v48 = vld [vmem:[%s3920_s29] ss:$0 sm:$0xff]  ;;  %1511 = vmatpush.bf16.msra.mxu2 %v2643_v53  ;;  %s3923_s26 = sld [smem:[#allocation32_spill]]  ;;  %s3116_s20 = smov 24  }
 0x1fa   : > { %v2642_v54 = vld [vmem:[%s3473_s7] sm:$0xff]  ;;  %s3929_s25 = scalar_lea.vmem [#allocation7], %s3405_s18  ;;  %p2624_p3 = scmp.ne.s32.totalorder %s3091_s30, 1 }
 0x1fb   : > { %v3535_v36 = vld [vmem:[#allocation2] sm:$0xff]  ;;  %v3537_v37 = vld [vmem:[#allocation2 + $0x8] sm:$0xff]  ;;  %1442 = vmatpush.bf16.msra.mxu1 %v2638_v35 }
 0x1fc   : > { %v1410_v39 = vpack.c.bf16 %v3537_v37, %v3535_v36  ;;  %v2768_v31 = vld [vmem:[%s1234_s19] ss:$0 sm:$0xff] }
 0x1fd   : > { %1512 = vmatpush.bf16.msra.mxu2 %v2642_v54 }
 0x1fe   : > { %2574 = vmatmul.msk.bf16.vlgmr.msra.gmra.mxu1 %vm1431_vm6, %v1410_v39 }
 0x1ff   : > { %1477 = vmatpush.bf16.msrb.mxu1 %v2641_v38  ;;  %v1402_v38 = vld [vmem:[%s3922_s21] sm:$0xff]  ;;  %s3924_s22 = scalar_lea.vmem %s3923_s26, %s3951_s9  ;;  %s3933_s26 = scalar_lea.vmem [#allocation11], %s3405_s18 }
 0x200   : > { %2592 = vmatmul.msk.bf16.vlgmr.msra.gmra.mxu2 %vm1431_vm6, %v1410_v39 }
 0x203   : > { %1478 = vmatpush.bf16.msrb.mxu1 %v2640_v40  ;;  %v2769_v40 = vld [vmem:[%s3924_s22] ss:$0 sm:$0xff]  ;;  %s3934_s22 = scalar_lea.vmem [#allocation15], %s3405_s18 }
 0x20e   : > { %2583 = vmatmul.msk.bf16.vlgmr.msrb.gmra.mxu1 %vm1431_vm6, %v1410_v39  ;;  %v1404_v39 = vld [vmem:[%s3922_s21 + $0x10] sm:$0xff] }
 0x27b   : > { %v1444_v42 = vpop.f32.mrf.mxu1 }
 0x27c   : > { %v1445_v43 = vadd.f32 %v2766_v41, %v1444_v42 }
 0x27e   : > { %v1449_v44 = vmul.f32 0.35355338, %v1445_v43 }
 0x280   : > { %1520 = vst.msk [vmem:[#allocation3] sm:$0xff] %vm1519_vm7, %v1449_v44 }
 0x283   : > { %v1446_v45 = vpop.f32.mrf.mxu1  ;;  %v1514_v32 = vpop.f32.mrf.mxu2 }
 0x284   : > { %v1447_v46 = vadd.f32 %v2766_v41, %v1446_v45  ;;  %v3599_v33 = vadd.f32 %v2768_v31, %v1514_v32 }
 0x286   : > { %v1450_v47 = vmul.f32 0.35355338, %v1447_v46  ;;  %1524 = vst.msk [vmem:[#allocation5] sm:$0xff] %vm1519_vm7, %v3599_v33 }
 0x287   : > { %v1604_v22 = vld [vmem:[#allocation3] sm:$0xff] }
 0x288   : > { %1521 = vst.msk [vmem:[#allocation3 + $0x8] sm:$0xff] %vm1519_vm7, %v1450_v47 }
 0x28b   : > { %v1480_v49 = vpop.f32.mrf.mxu1  ;;  %v1516_v34 = vpop.f32.mrf.mxu2 }
 0x28c   : > { %v1481_v50 = vadd.f32 %v2767_v48, %v1480_v49  ;;  %v1517_v35 = vadd.f32 %v2768_v31, %v1516_v34  ;;  %v1403_v49 = vld [vmem:[%s3922_s21 + $0x8] sm:$0xff] }
 0x28e   : > { %1522 = vst.msk [vmem:[#allocation4] sm:$0xff] %vm1519_vm7, %v1481_v50  ;;  %1538 = vrot.lane.b32.xlu2 %v1481_v50, %s3111_s16  ;;  %1564 = vrot.lane.b32.xlu1 %v1481_v50, %s3112_s3 }
 0x28f   : > { %1588 = vrot.lane.b32.xlu0 %v1481_v50, %s3113_s24  ;;  %v1605_v19 = vld [vmem:[#allocation3 + $0x8] sm:$0xff]  ;;  %1525 = vst.msk [vmem:[#allocation5 + $0x8] sm:$0xff] %vm1519_vm7, %v1517_v35 }
 0x290   : > { %v1612_v23 = vpack.c.bf16 %v1605_v19, %v1604_v22  ;;  %v1405_v50 = vld [vmem:[%s3922_s21 + $0x18] sm:$0xff] }
 0x293   : > { %v1482_v51 = vpop.f32.mrf.mxu1 }
 0x294   : > { %v1483_v52 = vadd.f32 %v2767_v48, %v1482_v51 }
 0x295   : > { %v1616_v16 = vld [vmem:[#allocation4] sm:$0xff] }
 0x296   : > { %1523 = vst.msk [vmem:[#allocation4 + $0x8] sm:$0xff] %vm1519_vm7, %v1483_v52  ;;  %1540 = vrot.lane.b32.xlu2 %v1483_v52, %s3111_s16  ;;  %1566 = vrot.lane.b32.xlu1 %v1483_v52, %s3112_s3 }
 0x297   : > { %1590 = vrot.lane.b32.xlu0 %v1483_v52, %s3113_s24 }
 0x29d   : > { %v1617_v15 = vld [vmem:[#allocation4 + $0x8] sm:$0xff] }
 0x29e   : > { %1530 = vrot.lane.b32.xlu1 %v1450_v47, %s3111_s16  ;;  %1556 = vrot.lane.b32.xlu2 %v1449_v44, %s3112_s3  ;;  %v1624_v17 = vpack.c.bf16 %v1617_v15, %v1616_v16 }
 0x29f   : > { %1528 = vrot.lane.b32.xlu0 %v1449_v44, %s3111_s16 }
 0x2a0   : > { %v1653_v18 = vsel %vm1519_vm7, %v1624_v17, 0 }
 0x2a6   : > { %1580 = vrot.lane.b32.xlu1 %v1449_v44, %s3113_s24  ;;  %1582 = vrot.lane.b32.xlu2 %v1450_v47, %s3113_s24 }
 0x2a7   : > { %1558 = vrot.lane.b32.xlu0 %v1450_v47, %s3112_s3 }
 0x2ae   : > { %1596 = vrot.lane.b32.xlu1 %v3599_v33, %s3113_s24  ;;  %1598 = vrot.lane.b32.xlu2 %v1517_v35, %s3113_s24 }
 0x2e8   : > { %v1539_v55 = vpop.permute.xlu2 %1538 }
 0x2e9   : > { %1544 = vst.msk [vmem:[#allocation4 + $0x10] sm:$0xff] %vm1519_vm7, %v1539_v55 }
 0x2f0   : > { %v1541_v56 = vpop.permute.xlu2 %1540  ;;  %v1618_v12 = vld [vmem:[#allocation4 + $0x10] sm:$0xff] }
 0x2f1   : > { %1545 = vst.msk [vmem:[#allocation4 + $0x18] sm:$0xff] %vm1519_vm7, %v1541_v56 }
 0x2f8   : > { %v1557_v57 = vpop.permute.xlu2 %1556  ;;  %v1619_v11 = vld [vmem:[#allocation4 + $0x18] sm:$0xff] }
 0x2f9   : > { %1562 = vst.msk [vmem:[#allocation3 + $0x20] sm:$0xff] %vm1519_vm7, %v1557_v57  ;;  %v1625_v13 = vpack.c.bf16 %v1619_v11, %v1618_v12 }
 0x2fb   : > { %v1656_v14 = vsel %vm1519_vm7, %v1625_v13, 0  ;;  %v1409_v13 = vld [vmem:[%s3922_s21 + $0x38] sm:$0xff] }
 0x300   : > { %v1565_v58 = vpop.permute.xlu1 %1564  ;;  %v1583_v59 = vpop.permute.xlu2 %1582  ;;  %v1608_v26 = vld [vmem:[#allocation3 + $0x20] sm:$0xff] }
 0x301   : > { %1570 = vst.msk [vmem:[#allocation4 + $0x20] sm:$0xff] %vm1519_vm7, %v1565_v58  ;;  %v1589_v60 = vpop.permute.xlu0 %1588 }
 0x302   : > { %1594 = vst.msk [vmem:[#allocation4 + $0x30] sm:$0xff] %vm1519_vm7, %v1589_v60 }
 0x303   : > { %1587 = vst.msk [vmem:[#allocation3 + $0x38] sm:$0xff] %vm1519_vm7, %v1583_v59  ;;  %v1406_v59 = vld [vmem:[%s3922_s21 + $0x20] sm:$0xff] }
 0x308   : > { %v1567_v61 = vpop.permute.xlu1 %1566  ;;  %v1620_v6 = vld [vmem:[#allocation4 + $0x20] sm:$0xff] }
 0x309   : > { %1571 = vst.msk [vmem:[#allocation4 + $0x28] sm:$0xff] %vm1519_vm7, %v1567_v61  ;;  %v1591_v62 = vpop.permute.xlu0 %1590  ;;  %v1622_v1 = vld [vmem:[#allocation4 + $0x30] sm:$0xff] }
 0x30a   : > { %1595 = vst.msk [vmem:[#allocation4 + $0x38] sm:$0xff] %vm1519_vm7, %v1591_v62  ;;  %v1611_v29 = vld [vmem:[#allocation3 + $0x38] sm:$0xff] }
 0x310   : > { %v1531_v63 = vpop.permute.xlu1 %1530  ;;  %v1621_v5 = vld [vmem:[#allocation4 + $0x28] sm:$0xff] }
 0x311   : > { %1535 = vst.msk [vmem:[#allocation3 + $0x18] sm:$0xff] %vm1519_vm7, %v1531_v63  ;;  %v1529_v0 = vpop.permute.xlu0 %1528  ;;  %v1623_v2 = vld [vmem:[#allocation4 + $0x38] sm:$0xff]  ;;  %v1626_v8 = vpack.c.bf16 %v1621_v5, %v1620_v6  ;;  %v1408_v6 = vld [vmem:[%s3922_s21 + $0x30] sm:$0xff] }
 0x312   : > { %1534 = vst.msk [vmem:[#allocation3 + $0x10] sm:$0xff] %vm1519_vm7, %v1529_v0  ;;  %v1627_v3 = vpack.c.bf16 %v1623_v2, %v1622_v1  ;;  %v1407_v0 = vld [vmem:[%s3922_s21 + $0x28] sm:$0xff]  ;;  %v1599_v1 = vpop.permute.xlu2 %1598 }
 0x313   : > { %v1659_v10 = vsel %vm1519_vm7, %v1626_v8, 0  ;;  %1603 = vst.msk [vmem:[#allocation5 + $0x38] sm:$0xff] %vm1519_vm7, %v1599_v1 }
 0x314   : > { %v1662_v4 = vsel %vm1519_vm7, %v1627_v3, 0 }
 0x315   : > { %1668 = vmatpush.bf16.xpose.msrb.mxu2 %v1662_v4  ;;  %2649 = vmatpush.bf16.xpose.msra.mxu3 %v1662_v4 }
 0x318   : > { %v1581_v7 = vpop.permute.xlu1 %1580  ;;  %v1607_v21 = vld [vmem:[#allocation3 + $0x18] sm:$0xff] }
 0x319   : > { %1586 = vst.msk [vmem:[#allocation3 + $0x30] sm:$0xff] %vm1519_vm7, %v1581_v7  ;;  %v1559_v9 = vpop.permute.xlu0 %1558  ;;  %v1606_v20 = vld [vmem:[#allocation3 + $0x10] sm:$0xff] }
 0x31a   : > { %1563 = vst.msk [vmem:[#allocation3 + $0x28] sm:$0xff] %vm1519_vm7, %v1559_v9  ;;  %v1613_v24 = vpack.c.bf16 %v1607_v21, %v1606_v20  ;;  %v1635_v11 = vld [vmem:[#allocation5 + $0x38] sm:$0xff] }
 0x31d   : > { %1669 = vmatpush.bf16.xpose.msrb.mxu2 %v1659_v10  ;;  %2650 = vmatpush.bf16.xpose.msra.mxu3 %v1659_v10 }
 0x320   : > { %v1610_v28 = vld [vmem:[#allocation3 + $0x30] sm:$0xff]  ;;  %v1597_v7 = vpop.permute.xlu1 %1596 }
 0x321   : > { %v1609_v25 = vld [vmem:[#allocation3 + $0x28] sm:$0xff]  ;;  %v1615_v30 = vpack.c.bf16 %v1611_v29, %v1610_v28  ;;  %1602 = vst.msk [vmem:[#allocation5 + $0x30] sm:$0xff] %vm1519_vm7, %v1597_v7 }
 0x322   : > { %v1614_v27 = vpack.c.bf16 %v1609_v25, %v1608_v26 }
 0x325   : > { %1670 = vmatpush.bf16.xpose.msrb.mxu2 %v1656_v14  ;;  %2651 = vmatpush.bf16.xpose.msra.mxu3 %v1656_v14 }
 0x328   : > { %v1634_v14 = vld [vmem:[#allocation5 + $0x30] sm:$0xff] }
 0x329   : > { %v1639_v15 = vpack.c.bf16 %v1635_v11, %v1634_v14 }
 0x32b   : > { %1917 = vmatpush.bf16.msra.mxu0 %v1639_v15 }
 0x32d   : > { %1671 = vmatpush.bf16.xpose.msrb.mxu2 %v1653_v18  ;;  %2652 = vmatpush.bf16.xpose.msra.mxu3 %v1653_v18 }
 0x334   : > { %2593 = vmatmul.msk.bf16.vlgmr.msrb.gmra.mxu2 %vm1519_vm7, %v1612_v23  ;;  %2594 = vmatmul.msk.bf16.vlgmr.msra.gmra.mxu3 %vm1519_vm7, %v1613_v24 }
 0x344   : > { %2595 = vmatmul.msk.bf16.gmra.mxu3 %vm1519_vm7, %v1614_v27 }
 0x354   : > { %2596 = vmatmul.msk.bf16.gmra.mxu3 %vm1519_vm7, %v1615_v30 }
 0x3b7   : > { %v1673_v41 = vpop.f32.mrf.mxu2  ;;  %v1678_v42 = vpop.f32.mrf.mxu3 }
 0x3b8   : > { %v1674_v43 = vadd.f32 %v1673_v41, %v1402_v38  ;;  %v1679_v44 = vadd.f32 %v1678_v42, %v1404_v39 }
 0x3ba   : > { %v1698_v45 = vadd.f32 %v2769_v40, %v1679_v44  ;;  %v1696_v46 = vadd.f32 %v2769_v40, %v1674_v43 }
 0x3bc   : > { %v1711_v47 = vsel %vm1704_vm8, %v1698_v45, -inf  ;;  %v1705_v48 = vsel %vm1704_vm8, %v1696_v46, -inf }
 0x3bd   : > { %1712 = vmax.xlane.f32.xlu2 %v1711_v47  ;;  %1706 = vmax.xlane.f32.xlu0 %v1705_v48 }
 0x3bf   : > { %v1675_v51 = vpop.f32.mrf.mxu2  ;;  %v1680_v52 = vpop.f32.mrf.mxu3 }
 0x3c0   : > { %v1676_v53 = vadd.f32 %v1675_v51, %v1403_v49  ;;  %v1681_v54 = vadd.f32 %v1680_v52, %v1405_v50 }
 0x3c2   : > { %v1699_v55 = vadd.f32 %v2769_v40, %v1681_v54  ;;  %v1697_v56 = vadd.f32 %v2769_v40, %v1676_v53 }
 0x3c4   : > { %v1714_v57 = vsel %vm1704_vm8, %v1699_v55, -inf  ;;  %v1708_v58 = vsel %vm1704_vm8, %v1697_v56, -inf }
 0x3c5   : > { %1715 = vmax.xlane.f32.xlu2 %v1714_v57  ;;  %1709 = vmax.xlane.f32.xlu1 %v1708_v58 }
 0x3c7   : > { %v1683_v60 = vpop.f32.mrf.mxu3 }
 0x3c8   : > { %v1684_v61 = vadd.f32 %v1683_v60, %v1406_v59 }
 0x3ca   : > { %v3631_v62 = vadd.f32 %v2769_v40, %v1684_v61 }
 0x3cc   : > { %v1717_v63 = vsel %vm1704_vm8, %v3631_v62, -inf }
 0x3cd   : > { %1718 = vmax.xlane.f32.xlu0 %v1717_v63 }
 0x3cf   : > { %v1685_v2 = vpop.f32.mrf.mxu3 }
 0x3d0   : > { %v1686_v3 = vadd.f32 %v1685_v2, %v1407_v0 }
 0x3d2   : > { %v1701_v4 = vadd.f32 %v2769_v40, %v1686_v3 }
 0x3d4   : > { %v1720_v5 = vsel %vm1704_vm8, %v1701_v4, -inf }
 0x3d5   : > { %1721 = vmax.xlane.f32.xlu1 %v1720_v5 }
 0x3d7   : > { %v1688_v8 = vpop.f32.mrf.mxu3 }
 0x3d8   : > { %v1689_v9 = vadd.f32 %v1688_v8, %v1408_v6 }
 0x3da   : > { %v1702_v10 = vadd.f32 %v2769_v40, %v1689_v9 }
 0x3dc   : > { %v1723_v12 = vsel %vm1704_vm8, %v1702_v10, -inf }
 0x3dd   : > { %1724 = vmax.xlane.f32.xlu2 %v1723_v12 }
 0x3df   : > { %v1690_v16 = vpop.f32.mrf.mxu3 }
 0x3e0   : > { %v1691_v17 = vadd.f32 %v1690_v16, %v1409_v13 }
 0x3e2   : > { %v1703_v18 = vadd.f32 %v2769_v40, %v1691_v17 }
 0x3e4   : > { %v1726_v19 = vsel %vm1704_vm8, %v1703_v18, -inf }
 0x3e5   : > { %1727 = vmax.xlane.f32.xlu0 %v1726_v19 }
 0x3ee   : > { %1574 = vrot.lane.b32.xlu1 %v1517_v35, %s3112_s3 }
 0x3f5   : > { %1548 = vrot.lane.b32.xlu2 %v3599_v33, %s3111_s16 }
 0x3f6   : > { %1550 = vrot.lane.b32.xlu1 %v1517_v35, %s3111_s16  ;;  %s3114_s16 = smov 8  }
 0x430   : > { %v1713_v20 = vpop.xlane.xlu2 %1712  ;;  %v1707_v21 = vpop.xlane.xlu0 %1706 }
 0x431   : > { %v1731_v22 = vsub.f32 %v1698_v45, %v1713_v20  ;;  %v1729_v23 = vsub.f32 %v1696_v46, %v1707_v21 }
 0x433   : > { %v1741_v24 = vmul.f32 1.442695, %v1731_v22  ;;  %v1737_v25 = vmul.f32 1.442695, %v1729_v23 }
 0x435   : > { %2777 = vpow2.f32 %v1741_v24 }
 0x436   : > { %2779 = vpow2.f32 %v1737_v25 }
 0x438   : > { %v1716_v26 = vpop.xlane.xlu2 %1715  ;;  %v1710_v27 = vpop.xlane.xlu1 %1709 }
 0x439   : > { %v1732_v28 = vsub.f32 %v1699_v55, %v1716_v26  ;;  %v1730_v29 = vsub.f32 %v1697_v56, %v1710_v27 }
 0x43b   : > { %v3653_v30 = vpop.eup %2777  ;;  %v1743_v31 = vmul.f32 1.442695, %v1732_v28  ;;  %v1739_v32 = vmul.f32 1.442695, %v1730_v29 }
 0x43c   : > { %v3655_v34 = vpop.eup %2779  ;;  %v1759_v35 = vsel %vm1704_vm8, %v3653_v30, 0.0 }
 0x43d   : > { %2781 = vpow2.f32 %v1743_v31  ;;  %1760 = vadd.xlane.f32.xlu2 %v1759_v35  ;;  %v1753_v38 = vsel %vm1704_vm8, %v3655_v34, 0.0 }
 0x43e   : > { %2783 = vpow2.f32 %v1739_v32  ;;  %1754 = vadd.xlane.f32.xlu0 %v1753_v38 }
 0x440   : > { %v1719_v56 = vpop.xlane.xlu0 %1718 }
 0x441   : > { %v1733_v57 = vsub.f32 %v3631_v62, %v1719_v56 }
 0x443   : > { %v3661_v39 = vpop.eup %2781  ;;  %v1745_v58 = vmul.f32 1.442695, %v1733_v57 }
 0x444   : > { %v3663_v40 = vpop.eup %2783  ;;  %v1762_v41 = vsel %vm1704_vm8, %v3661_v39, 0.0 }
 0x445   : > { %1763 = vadd.xlane.f32.xlu1 %v1762_v41  ;;  %v1756_v42 = vsel %vm1704_vm8, %v3663_v40, 0.0 }
 0x446   : > { %1757 = vadd.xlane.f32.xlu0 %v1756_v42 }
 0x448   : > { %v1722_v43 = vpop.xlane.xlu1 %1721 }
 0x449   : > { %v1734_v44 = vsub.f32 %v1701_v4, %v1722_v43 }
 0x44b   : > { %v1747_v45 = vmul.f32 1.442695, %v1734_v44 }
 0x44d   : > { %2785 = vpow2.f32 %v1747_v45  ;;  %v1628_v45 = vld [vmem:[#allocation5] sm:$0xff] }
 0x450   : > { %v1725_v46 = vpop.xlane.xlu2 %1724 }
 0x451   : > { %v1735_v47 = vsub.f32 %v1702_v10, %v1725_v46  ;;  %v1629_v46 = vld [vmem:[#allocation5 + $0x8] sm:$0xff] }
 0x453   : > { %v3669_v48 = vpop.eup %2785  ;;  %v1749_v49 = vmul.f32 1.442695, %v1735_v47 }
 0x454   : > { %v1768_v50 = vsel %vm1704_vm8, %v3669_v48, 0.0 }
 0x455   : > { %2787 = vpow2.f32 %v1749_v49  ;;  %1769 = vadd.xlane.f32.xlu2 %v1768_v50 }
 0x456   : > { %2789 = vpow2.f32 %v1745_v58 }
 0x458   : > { %v1549_v51 = vpop.permute.xlu2 %1548  ;;  %v1728_v59 = vpop.xlane.xlu0 %1727 }
 0x459   : > { %1554 = vst.msk [vmem:[#allocation5 + $0x10] sm:$0xff] %vm1519_vm7, %v1549_v51  ;;  %v1736_v60 = vsub.f32 %v1703_v18, %v1728_v59  ;;  %v1636_v51 = vpack.c.bf16 %v1629_v46, %v1628_v45 }
 0x45a   : > { %1572 = vrot.lane.b32.xlu0 %v3599_v33, %s3112_s3  ;;  %s3115_s3 = smov 16  }
 0x45b   : > { %v3676_v52 = vpop.eup %2787  ;;  %v1751_v33 = vmul.f32 1.442695, %v1736_v60 }
 0x45c   : > { %v1771_v53 = vsel %vm1704_vm8, %v3676_v52, 0.0  ;;  %v3683_v61 = vpop.eup %2789 }
 0x45d   : > { %1772 = vadd.xlane.f32.xlu1 %v1771_v53  ;;  %2791 = vpow2.f32 %v1751_v33  ;;  %v1765_v63 = vsel %vm1704_vm8, %v3683_v61, 0.0 }
 0x460   : > { %v1575_v54 = vpop.permute.xlu1 %1574  ;;  %v1630_v35 = vld [vmem:[#allocation5 + $0x10] sm:$0xff] }
 0x461   : > { %1579 = vst.msk [vmem:[#allocation5 + $0x28] sm:$0xff] %vm1519_vm7, %v1575_v54 }
 0x463   : > { %v3687_v0 = vpop.eup %2791 }
 0x464   : > { %v1774_v1 = vsel %vm1704_vm8, %v3687_v0, 0.0 }
 0x468   : > { %v1551_v55 = vpop.permute.xlu1 %1550  ;;  %v1633_v20 = vld [vmem:[#allocation5 + $0x28] sm:$0xff] }
 0x469   : > { %1555 = vst.msk [vmem:[#allocation5 + $0x18] sm:$0xff] %vm1519_vm7, %v1551_v55 }
 0x470   : > { %v1631_v27 = vld [vmem:[#allocation5 + $0x18] sm:$0xff] }
 0x471   : > { %v1637_v42 = vpack.c.bf16 %v1631_v27, %v1630_v35 }
 0x484   : > { %1766 = vadd.xlane.f32.xlu0 %v1765_v63 }
 0x48c   : > { %1775 = vadd.xlane.f32.xlu0 %v1774_v1 }
 0x4b0   : > { %v3693_v9 = vpop.xlane.xlu2 %1760 }
 0x4b1   : > { %v1755_v2 = vpop.xlane.xlu0 %1754  ;;  %vm1812_vm5 = vweird.f32 %v3693_v9 }
 0x4b2   : > { %v1788_v22 = vand.u32 2147483648, %v1755_v2  ;;  %vm1782_vm13 = vweird.f32 %v1755_v2  ;;  %v1786_v25 = vand.u32 2147483647, %v1755_v2 }
 0x4b4   : > { %v1789_v41 = vor.u32 1.1754944e-38, %v1788_v22  ;;  %vm1787_vm0 = vcmp.eq.f32.partialorder %v1786_v25, 8.507059e+37 }
 0x4b8   : > { %v3691_v7 = vpop.xlane.xlu1 %1763 }
 0x4b9   : > { %v1758_v62 = vpop.xlane.xlu0 %1757  ;;  %v1833_v58 = vand.u32 2147483648, %v3691_v7  ;;  %vm1827_vm3 = vweird.f32 %v3691_v7  ;;  %v1831_v60 = vand.u32 2147483647, %v3691_v7 }
 0x4ba   : > { %2793 = vrcp.f32 %v1758_v62  ;;  %v1803_v16 = vand.u32 2147483648, %v1758_v62  ;;  %vm1797_vm11 = vweird.f32 %v1758_v62  ;;  %v1801_v18 = vand.u32 2147483647, %v1758_v62 }
 0x4bb   : > { %2795 = vrcp.f32 %v1755_v2  ;;  %v1834_v63 = vor.u32 1.1754944e-38, %v1833_v58 }
 0x4bc   : > { %2797 = vrcp.f32 %v3691_v7  ;;  %v1804_v31 = vor.u32 1.1754944e-38, %v1803_v16  ;;  %vm1802_vm15 = vcmp.eq.f32.partialorder %v1801_v18, 8.507059e+37 }
 0x4bd   : > { %2799 = vrcp.f32 %v3693_v9 }
 0x4c0   : > { %v2794_v3 = vpop.eup %2793 }
 0x4c1   : > { %v2796_v4 = vpop.eup %2795  ;;  %v1793_v5 = vmul.f32 %v2794_v3, %v1758_v62  ;;  %vm1798_vm9 = vweird.f32 %v2794_v3 }
 0x4c2   : > { %v1778_v6 = vmul.f32 %v2796_v4, %v1755_v2  ;;  %v2798_v15 = vpop.eup %2797  ;;  %vm1783_vm10 = vweird.f32 %v2796_v4  ;;  %vm3698_vm12 = vmor %vm1797_vm11, %vm1798_vm9 }
 0x4c3   : > { %v1794_v8 = vsub.f32 1.0, %v1793_v5  ;;  %v2800_v21 = vpop.eup %2799  ;;  %v1823_v26 = vmul.f32 %v2798_v15, %v3691_v7  ;;  %vm3705_vm14 = vmor %vm1782_vm13, %vm1783_vm10  ;;  %vm1828_vm1 = vweird.f32 %v2798_v15  ;;  %vm1832_vm10 = vcmp.eq.f32.partialorder %v1831_v60, 8.507059e+37 }
 0x4c4   : > { %v1779_v10 = vsub.f32 1.0, %v1778_v6  ;;  %v1808_v32 = vmul.f32 %v2800_v21, %v3693_v9  ;;  %vm1813_vm2 = vweird.f32 %v2800_v21  ;;  %vm1829_vm4 = vmor %vm1827_vm3, %vm1828_vm1 }
 0x4c5   : > { %v1795_v12 = vmul.f32 %v2794_v3, %v1794_v8  ;;  %v1824_v44 = vsub.f32 1.0, %v1823_v26  ;;  %vm1814_vm9 = vmor %vm1812_vm5, %vm1813_vm2 }
 0x4c6   : > { %v1780_v13 = vmul.f32 %v2796_v4, %v1779_v10  ;;  %v1809_v49 = vsub.f32 1.0, %v1808_v32 }
 0x4c7   : > { %v1796_v14 = vadd.f32 %v2794_v3, %v1795_v12  ;;  %v1825_v53 = vmul.f32 %v2798_v15, %v1824_v44 }
 0x4c8   : > { %v1781_v17 = vadd.f32 %v2796_v4, %v1780_v13  ;;  %v1810_v55 = vmul.f32 %v2800_v21, %v1809_v49  ;;  %v1770_v1 = vpop.xlane.xlu2 %1769 }
 0x4c9   : > { %v1800_v28 = vsel %vm3698_vm12, %v2794_v3, %v1796_v14  ;;  %v1826_v57 = vadd.f32 %v2798_v15, %v1825_v53  ;;  %2801 = vrcp.f32 %v1770_v1  ;;  %vm1857_vm13 = vweird.f32 %v1770_v1 }
 0x4ca   : > { %v1785_v38 = vsel %vm3705_vm14, %v2796_v4, %v1781_v17  ;;  %v1805_v43 = vsel %vm1802_vm15, %v1804_v31, %v1800_v28  ;;  %v1811_v59 = vadd.f32 %v2800_v21, %v1810_v55  ;;  %v1861_v18 = vand.u32 2147483647, %v1770_v1 }
 0x4cb   : > { %v1790_v47 = vsel %vm1787_vm0, %v1789_v41, %v1785_v38  ;;  %v1806_v50 = vmul.f32 %v3663_v40, %v1805_v43  ;;  %v1818_v40 = vand.u32 2147483648, %v3693_v9  ;;  %v1830_v33 = vsel %vm1829_vm4, %v2798_v15, %v1826_v57 }
 0x4cc   : > { %v1573_v11 = vpop.permute.xlu0 %1572  ;;  %v1791_v54 = vmul.f32 %v3655_v34, %v1790_v47  ;;  %v1816_v34 = vand.u32 2147483647, %v3693_v9  ;;  %v1815_v2 = vsel %vm1814_vm9, %v2800_v21, %v1811_v59  ;;  %v1835_v3 = vsel %vm1832_vm10, %v1834_v63, %v1830_v33 }
 0x4cd   : > { %1578 = vst.msk [vmem:[#allocation5 + $0x20] sm:$0xff] %vm1519_vm7, %v1573_v11  ;;  %v1819_v62 = vor.u32 1.1754944e-38, %v1818_v40  ;;  %v1836_v5 = vmul.f32 %v3661_v39, %v1835_v3  ;;  %vm1862_vm0 = vcmp.eq.f32.partialorder %v1861_v18, 8.507059e+37 }
 0x4ce   : > { %v1897_v56 = vpack.c.bf16 %v1806_v50, %v1791_v54  ;;  %vm1817_vm11 = vcmp.eq.f32.partialorder %v1816_v34, 8.507059e+37 }
 0x4cf   : > { %v1820_v4 = vsel %vm1817_vm11, %v1819_v62, %v1815_v2  ;;  %v2802_v7 = vpop.eup %2801 }
 0x4d0   : > { %v1821_v6 = vmul.f32 %v3653_v30, %v1820_v4  ;;  %v1853_v9 = vmul.f32 %v2802_v7, %v1770_v1  ;;  %v3724_v10 = vpop.xlane.xlu1 %1772  ;;  %vm1858_vm12 = vweird.f32 %v2802_v7  ;;  %v1863_v30 = vand.u32 2147483648, %v1770_v1 }
 0x4d1   : > { %vm1859_vm14 = vmor %vm1857_vm13, %vm1858_vm12  ;;  %v1878_v53 = vand.u32 2147483648, %v3724_v10  ;;  %vm1872_vm11 = vweird.f32 %v3724_v10 }
 0x4d2   : > { %v1898_v8 = vpack.c.bf16 %v1836_v5, %v1821_v6  ;;  %v1854_v11 = vsub.f32 1.0, %v1853_v9  ;;  %v1864_v25 = vor.u32 1.1754944e-38, %v1863_v30  ;;  %v2645_v6 = vld [vmem:[%s3482_s5 + $0x8] sm:$0xff] }
 0x4d3   : > { %2009 = vmatpush.bf16.msra.mxu1 %v2645_v6 }
 0x4d4   : > { %v1632_v19 = vld [vmem:[#allocation5 + $0x20] sm:$0xff]  ;;  %v1855_v13 = vmul.f32 %v2802_v7, %v1854_v11 }
 0x4d5   : > { %v1638_v24 = vpack.c.bf16 %v1633_v20, %v1632_v19 }
 0x4d6   : > { %v1856_v16 = vadd.f32 %v2802_v7, %v1855_v13 }
 0x4d7   : > { %1918 = vmatpush.bf16.msra.mxu0 %v1638_v24 }
 0x4d8   : > { %v1860_v24 = vsel %vm1859_vm14, %v2802_v7, %v1856_v16  ;;  %v2644_v7 = vld [vmem:[%s3482_s5] sm:$0xff]  ;;  %s3931_s5 = scalar_lea.vmem [#allocation14], %s3405_s18 }
 0x4d9   : > { %v1865_v29 = vsel %vm1862_vm0, %v1864_v25, %v1860_v24  ;;  %2010 = vmatpush.bf16.msra.mxu1 %v2644_v7 }
 0x4da   : > { %v1866_v43 = vmul.f32 %v3669_v48, %v1865_v29 }
 0x4db   : > { %1919 = vmatpush.bf16.msra.mxu0 %v1637_v42 }
 0x4df   : > { %1920 = vmatpush.bf16.msra.mxu0 %v1636_v51 }
 0x4e2   : > { %2597 = vmatmul.msk.bf16.vlgmr.msra.gmra.mxu0 %vm1704_vm8, %v1897_v56  ;;  %v1879_v56 = vor.u32 1.1754944e-38, %v1878_v53 }
 0x4f2   : > { %2598 = vmatmul.msk.bf16.gmra.mxu0 %vm1704_vm8, %v1898_v8 }
 0x4f7   : > { %v1767_v12 = vpop.xlane.xlu0 %1766 }
 0x4f8   : > { %2803 = vrcp.f32 %v1767_v12  ;;  %v1848_v21 = vand.u32 2147483648, %v1767_v12  ;;  %v1846_v23 = vand.u32 2147483647, %v1767_v12  ;;  %vm1842_vm1 = vweird.f32 %v1767_v12 }
 0x4f9   : > { %2805 = vrcp.f32 %v3724_v10 }
 0x4fa   : > { %v1849_v28 = vor.u32 1.1754944e-38, %v1848_v21  ;;  %vm1847_vm3 = vcmp.eq.f32.partialorder %v1846_v23, 8.507059e+37  ;;  %v3117_v21 = vmov 32.0  }
 0x4fe   : > { %v2804_v14 = vpop.eup %2803 }
 0x4ff   : > { %v2806_v15 = vpop.eup %2805  ;;  %v1838_v39 = vmul.f32 %v2804_v14, %v1767_v12  ;;  %v1776_v17 = vpop.xlane.xlu0 %1775  ;;  %vm1843_vm15 = vweird.f32 %v2804_v14 }
 0x500   : > { %2807 = vrcp.f32 %v1776_v17  ;;  %v1868_v20 = vmul.f32 %v2806_v15, %v3724_v10  ;;  %vm1844_vm2 = vmor %vm1842_vm1, %vm1843_vm15  ;;  %v1893_v49 = vand.u32 2147483648, %v1776_v17  ;;  %vm1873_vm5 = vweird.f32 %v2806_v15 }
 0x501   : > { %v1839_v19 = vsub.f32 1.0, %v1838_v39  ;;  %vm1887_vm9 = vweird.f32 %v1776_v17  ;;  %v1891_v51 = vand.u32 2147483647, %v1776_v17  ;;  %vm1874_vm12 = vmor %vm1872_vm11, %vm1873_vm5  ;;  %vm1974_vm15 = vcmask 261312  }
 0x502   : > { %v1869_v31 = vsub.f32 1.0, %v1868_v20  ;;  %v1894_v54 = vor.u32 1.1754944e-38, %v1893_v49  ;;  %2809 = vrcp.f32 %v3117_v21  ;;  %v2648_v49 = vld [vmem:[%s3493_s15] sm:$0xff]  ;;  %s3932_s15 = scalar_lea.vmem [#allocation9], %s3405_s18 }
 0x503   : > { %v1840_v22 = vmul.f32 %v2804_v14, %v1839_v19  ;;  %vm1892_vm13 = vcmp.eq.f32.partialorder %v1891_v51, 8.507059e+37  ;;  %2146 = vmatpush.bf16.msrb.mxu1 %v2648_v49 }
 0x504   : > { %v1870_v44 = vmul.f32 %v2806_v15, %v1869_v31 }
 0x505   : > { %v1841_v26 = vadd.f32 %v2804_v14, %v1840_v22 }
 0x506   : > { %v2808_v27 = vpop.eup %2807  ;;  %v1871_v50 = vadd.f32 %v2806_v15, %v1870_v44 }
 0x507   : > { %v1883_v32 = vmul.f32 %v2808_v27, %v1776_v17  ;;  %v1845_v35 = vsel %vm1844_vm2, %v2804_v14, %v1841_v26  ;;  %vm1888_vm4 = vweird.f32 %v2808_v27  ;;  %v2770_v14 = vld [vmem:[%s3929_s25] ss:$0 sm:$0xff] }
 0x508   : > { %v1850_v38 = vsel %vm1847_vm3, %v1849_v28, %v1845_v35  ;;  %vm1889_vm10 = vmor %vm1887_vm9, %vm1888_vm4  ;;  %v1875_v55 = vsel %vm1874_vm12, %v2806_v15, %v1871_v50  ;;  %v2810_v22 = vpop.eup %2809 }
 0x509   : > { %v1884_v41 = vsub.f32 1.0, %v1883_v32  ;;  %v1851_v42 = vmul.f32 %v3683_v61, %v1850_v38  ;;  %v1876_v61 = vand.u32 2147483647, %v3724_v10  ;;  %v2028_v23 = vmul.f32 32.0, %v2810_v22 }
 0x50a   : > { %vm2032_vm0 = vweird.f32 %v2810_v22 }
 0x50b   : > { %v1885_v45 = vmul.f32 %v2808_v27, %v1884_v41  ;;  %v1899_v46 = vpack.c.bf16 %v1866_v43, %v1851_v42  ;;  %vm1877_vm14 = vcmp.eq.f32.partialorder %v1876_v61, 8.507059e+37  ;;  %v2029_v24 = vsub.f32 1.0, %v2028_v23  ;;  %v2647_v43 = vld [vmem:[%s3487_s4 + $0x8] sm:$0xff] }
 0x50c   : > { %v1880_v58 = vsel %vm1877_vm14, %v1879_v56, %v1875_v55  ;;  %2112 = vmatpush.bf16.msra.mxu2 %v2647_v43 }
 0x50d   : > { %v1886_v47 = vadd.f32 %v2808_v27, %v1885_v45  ;;  %2599 = vmatmul.msk.bf16.gmra.mxu0 %vm1704_vm8, %v1899_v46  ;;  %v1881_v60 = vmul.f32 %v3676_v52, %v1880_v58  ;;  %v2030_v25 = vmul.f32 %v2810_v22, %v2029_v24 }
 0x50f   : > { %v1890_v48 = vsel %vm1889_vm10, %v2808_v27, %v1886_v47  ;;  %v2031_v26 = vadd.f32 %v2810_v22, %v2030_v25  ;;  %v2646_v47 = vld [vmem:[%s3487_s4] sm:$0xff]  ;;  %s3930_s4 = scalar_lea.vmem [#allocation12], %s3405_s18  ;;  %vm2135_vm10 = vcmask 130048  }
 0x510   : > { %v1895_v57 = vsel %vm1892_vm13, %v1894_v54, %v1890_v48  ;;  %2113 = vmatpush.bf16.msra.mxu2 %v2646_v47 }
 0x511   : > { %v1896_v59 = vmul.f32 %v3687_v0, %v1895_v57 }
 0x513   : > { %v1900_v40 = vpack.c.bf16 %v1896_v59, %v1881_v60 }
 0x51d   : > { %2600 = vmatmul.msk.bf16.gmra.mxu0 %vm1704_vm8, %v1900_v40  ;;  %vm1952_vm8 = vcmask 130112  }
 0x55f   : > { %v1922_v34 = vpop.f32.mrf.mxu0 }
 0x560   : > { %1942 = vst.msk [vmem:[#allocation6] sm:$0xff] %vm1519_vm7, %v1922_v34 }
 0x567   : > { %v1924_v33 = vpop.f32.mrf.mxu0 }
 0x568   : > { %1943 = vst.msk [vmem:[#allocation6 + $0x8] sm:$0xff] %vm1519_vm7, %v1924_v33  ;;  %vm1963_vm7 = vcmask 195712  }
 0x56f   : > { %v1927_v63 = vpop.f32.mrf.mxu0 }
 0x570   : > { %1946 = vrot.lane.b32.xlu2 %v1927_v63, %s3114_s16  ;;  %v2771_v63 = vld [vmem:[%s3930_s4] ss:$0 sm:$0xff] }
 0x577   : > { %v1929_v1 = vpop.f32.mrf.mxu0 }
 0x578   : > { %1948 = vrot.lane.b32.xlu1 %v1929_v1, %s3114_s16 }
 0x58a   : > { %v1932_v2 = vpop.f32.mrf.mxu0 }
 0x58b   : > { %1957 = vrot.lane.b32.xlu0 %v1932_v2, %s3115_s3 }
 0x592   : > { %v1934_v0 = vpop.f32.mrf.mxu0 }
 0x593   : > { %1959 = vrot.lane.b32.xlu2 %v1934_v0, %s3115_s3 }
 0x59a   : > { %v1937_v52 = vpop.f32.mrf.mxu0 }
 0x59b   : > { %1968 = vrot.lane.b32.xlu0 %v1937_v52, %s3116_s20  ;;  %v2772_v52 = vld [vmem:[%s3931_s5] ss:$0 sm:$0xff] }
 0x5a2   : > { %v1939_v62 = vpop.f32.mrf.mxu0 }
 0x5a3   : > { %1970 = vrot.lane.b32.xlu1 %v1939_v62, %s3116_s20 }
 0x5ca   : > { %v1947_v3 = vpop.permute.xlu2 %1946 }
 0x5cb   : > { %1953 = vst.msk [vmem:[#allocation6] sm:$0xff] %vm1952_vm8, %v1947_v3 }
 0x5ea   : > { %v1949_v4 = vpop.permute.xlu1 %1948 }
 0x5eb   : > { %1954 = vst.msk [vmem:[#allocation6 + $0x8] sm:$0xff] %vm1952_vm8, %v1949_v4 }
 0x5ed   : > { %v1960_v5 = vpop.permute.xlu2 %1959 }
 0x5ee   : > { %1965 = vst.msk [vmem:[#allocation6 + $0x8] sm:$0xff] %vm1963_vm7, %v1960_v5 }
 0x5fd   : > { %v1958_v8 = vpop.permute.xlu0 %1957 }
 0x5fe   : > { %1964 = vst.msk [vmem:[#allocation6] sm:$0xff] %vm1963_vm7, %v1958_v8 }
 0x60d   : > { %v1969_v9 = vpop.permute.xlu0 %1968 }
 0x60e   : > { %1975 = vst.msk [vmem:[#allocation6] sm:$0xff] %vm1974_vm15, %v1969_v9  ;;  %v2773_v9 = vld [vmem:[%s3932_s15] ss:$0 sm:$0xff] }
 0x615   : > { %v1971_v10 = vpop.permute.xlu1 %1970  ;;  %v1977_v11 = vld [vmem:[#allocation6] sm:$0xff] }
 0x616   : > { %1976 = vst.msk [vmem:[#allocation6 + $0x8] sm:$0xff] %vm1974_vm15, %v1971_v10 }
 0x61d   : > { %v1978_v12 = vld [vmem:[#allocation6 + $0x8] sm:$0xff] }
 0x61e   : > { %v1979_v13 = vpack.c.bf16 %v1978_v12, %v1977_v11 }
 0x620   : > { %2609 = vmatmul.msk.bf16.vlgmr.msra.gmra.mxu1 %vm1431_vm6, %v1979_v13 }
 0x69d   : > { %v2012_v15 = vpop.f32.mrf.mxu1 }
 0x69e   : > { %v2013_v16 = vadd.f32 %v2770_v14, %v2012_v15 }
 0x6a0   : > { %v2017_v39 = vadd.f32 %v2013_v16, %v3535_v36  ;;  %v3748_v36 = vsel %vm2032_vm0, %v2810_v22, %v2031_v26  ;;  %v2774_v16 = vld [vmem:[%s3933_s26] ss:$0 sm:$0xff] }
 0x6a2   : > { %v2021_v17 = vsel %vm1431_vm6, %v2017_v39, 0.0 }
 0x6a3   : > { %2022 = vadd.xlane.f32.xlu2 %v2021_v17 }
 0x6a5   : > { %v2014_v30 = vpop.f32.mrf.mxu1 }
 0x6a6   : > { %v2015_v18 = vadd.f32 %v2770_v14, %v2014_v30 }
 0x6a8   : > { %v2018_v19 = vadd.f32 %v2015_v18, %v3537_v37 }
 0x6aa   : > { %v2024_v20 = vsel %vm1431_vm6, %v2018_v19, 0.0 }
 0x6ab   : > { %2025 = vadd.xlane.f32.xlu0 %v2024_v20 }
 0x716   : > { %v2023_v27 = vpop.xlane.xlu2 %2022 }
 0x717   : > { %v2034_v28 = vmul.f32 %v3748_v36, %v2023_v27 }
 0x719   : > { %v2036_v29 = vsub.f32 %v2017_v39, %v2034_v28 }
 0x71b   : > { %v2038_v37 = vmul.f32 %v2036_v29, %v2036_v29 }
 0x71d   : > { %v2040_v31 = vsel %vm1431_vm6, %v2038_v37, 0.0 }
 0x71e   : > { %v2026_v32 = vpop.xlane.xlu0 %2025  ;;  %2041 = vadd.xlane.f32.xlu1 %v2040_v31 }
 0x71f   : > { %v2035_v35 = vmul.f32 %v3748_v36, %v2026_v32 }
 0x721   : > { %v2037_v38 = vsub.f32 %v2018_v19, %v2035_v35 }
 0x723   : > { %v2039_v41 = vmul.f32 %v2037_v38, %v2037_v38 }
 0x725   : > { %v2043_v42 = vsel %vm1431_vm6, %v2039_v41, 0.0 }
 0x726   : > { %2044 = vadd.xlane.f32.xlu2 %v2043_v42 }
 0x791   : > { %v2042_v44 = vpop.xlane.xlu1 %2041 }
 0x792   : > { %v2046_v45 = vmul.f32 %v2042_v44, %v3748_v36 }
 0x794   : > { %v2048_v46 = vadd.f32 1e-05, %v2046_v45 }
 0x796   : > { %2811 = vrsqrt.f32 %v2048_v46  ;;  %vm2056_vm2 = vweird.f32 %v2048_v46 }
 0x799   : > { %v2045_v50 = vpop.xlane.xlu2 %2044 }
 0x79a   : > { %v2047_v51 = vmul.f32 %v2045_v50, %v3748_v36 }
 0x79c   : > { %v2812_v53 = vpop.eup %2811  ;;  %v2049_v61 = vadd.f32 1e-05, %v2047_v51 }
 0x79d   : > { %v2051_v48 = vmul.f32 %v2812_v53, %v2048_v46  ;;  %vm2057_vm1 = vweird.f32 %v2812_v53 }
 0x79e   : > { %2813 = vrsqrt.f32 %v2049_v61  ;;  %vm2058_vm3 = vmor %vm2056_vm2, %vm2057_vm1  ;;  %vm2066_vm5 = vweird.f32 %v2049_v61 }
 0x79f   : > { %v2052_v54 = vmul.f32 %v2812_v53, %v2051_v48  ;;  %v2775_v48 = vld [vmem:[%s3934_s22] ss:$0 sm:$0xff] }
 0x7a1   : > { %v2053_v55 = vmul.f32 0.5, %v2052_v54 }
 0x7a3   : > { %v2054_v56 = vsub.f32 1.5, %v2053_v55 }
 0x7a4   : > { %v2814_v57 = vpop.eup %2813 }
 0x7a5   : > { %v2055_v58 = vmul.f32 %v2812_v53, %v2054_v56  ;;  %v2061_v59 = vmul.f32 %v2814_v57, %v2049_v61  ;;  %vm2067_vm4 = vweird.f32 %v2814_v57 }
 0x7a6   : > { %vm2068_vm9 = vmor %vm2066_vm5, %vm2067_vm4 }
 0x7a7   : > { %v2062_v60 = vmul.f32 %v2814_v57, %v2061_v59  ;;  %v2059_v40 = vsel %vm2058_vm3, %v2812_v53, %v2055_v58 }
 0x7a8   : > { %v2070_v1 = vmul.f32 %v2059_v40, %v2036_v29 }
 0x7a9   : > { %v2063_v34 = vmul.f32 0.5, %v2062_v60 }
 0x7aa   : > { %v2075_v62 = vmul.f32 %v2771_v63, %v2070_v1 }
 0x7ab   : > { %v2064_v33 = vsub.f32 1.5, %v2063_v34 }
 0x7ac   : > { %v2080_v5 = vadd.f32 %v2772_v52, %v2075_v62 }
 0x7ad   : > { %v2065_v2 = vmul.f32 %v2814_v57, %v2064_v33 }
 0x7af   : > { %v2069_v0 = vsel %vm2068_vm9, %v2814_v57, %v2065_v2 }
 0x7b0   : > { %v2071_v3 = vmul.f32 %v2069_v0, %v2037_v38 }
 0x7b2   : > { %v2076_v4 = vmul.f32 %v2771_v63, %v2071_v3 }
 0x7b4   : > { %v2081_v6 = vadd.f32 %v2772_v52, %v2076_v4 }
 0x7b6   : > { %v2082_v7 = vpack.c.bf16 %v2081_v6, %v2080_v5 }
 0x7b8   : > { %2618 = vmatmul.msk.bf16.vlgmr.msra.gmra.mxu2 %vm1431_vm6, %v2082_v7 }
 0x83b   : > { %v2115_v8 = vpop.f32.mrf.mxu2 }
 0x83c   : > { %v2116_v10 = vadd.f32 %v2773_v9, %v2115_v8 }
 0x83e   : > { %v2120_v13 = vmax.f32 %v2116_v10, 0.0 }
 0x843   : > { %v2117_v11 = vpop.f32.mrf.mxu2 }
 0x844   : > { %v2118_v12 = vadd.f32 %v2773_v9, %v2117_v11 }
 0x846   : > { %v2121_v14 = vmax.f32 %v2118_v12, 0.0 }
 0x848   : > { %v2122_v15 = vpack.c.bf16 %v2121_v14, %v2120_v13 }
 0x84a   : > { %2623 = vmatmul.msk.bf16.vlgmr.msrb.gmra.mxu1 %vm2135_vm10, %v2122_v15 }
 0x8c7   : > { %v2148_v39 = vpop.f32.mrf.mxu1 }
 0x8c8   : > { %v2149_v17 = vadd.f32 %v2774_v16, %v2148_v39 }
 0x8ca   : > { %v2153_v30 = vadd.f32 %v2149_v17, %v2080_v5 }
 0x8cc   : > { %v2157_v18 = vsel %vm1431_vm6, %v2153_v30, 0.0 }
 0x8cd   : > { %2158 = vadd.xlane.f32.xlu0 %v2157_v18 }
 0x8cf   : > { %v2150_v19 = vpop.f32.mrf.mxu1 }
 0x8d0   : > { %v2151_v20 = vadd.f32 %v2774_v16, %v2150_v19 }
 0x8d2   : > { %v2154_v21 = vadd.f32 %v2151_v20, %v2081_v6 }
 0x8d4   : > { %v2160_v22 = vsel %vm1431_vm6, %v2154_v21, 0.0 }
 0x8d5   : > { %2161 = vadd.xlane.f32.xlu1 %v2160_v22 }
 0x940   : > { %v2159_v23 = vpop.xlane.xlu0 %2158 }
 0x941   : > { %v2163_v24 = vmul.f32 %v2159_v23, %v3748_v36 }
 0x943   : > { %v2165_v25 = vsub.f32 %v2153_v30, %v2163_v24 }
 0x945   : > { %v2167_v26 = vmul.f32 %v2165_v25, %v2165_v25 }
 0x947   : > { %v2169_v27 = vsel %vm1431_vm6, %v2167_v26, 0.0 }
 0x948   : > { %v2162_v28 = vpop.xlane.xlu1 %2161  ;;  %2170 = vadd.xlane.f32.xlu2 %v2169_v27 }
 0x949   : > { %v2164_v29 = vmul.f32 %v2162_v28, %v3748_v36 }
 0x94b   : > { %v2166_v37 = vsub.f32 %v2154_v21, %v2164_v29 }
 0x94d   : > { %v2168_v31 = vmul.f32 %v2166_v37, %v2166_v37 }
 0x94f   : > { %v2172_v32 = vsel %vm1431_vm6, %v2168_v31, 0.0 }
 0x950   : > { %2173 = vadd.xlane.f32.xlu0 %v2172_v32 }
 0x9bb   : > { %v2171_v35 = vpop.xlane.xlu2 %2170 }
 0x9bc   : > { %v2175_v38 = vmul.f32 %v2171_v35, %v3748_v36 }
 0x9be   : > { %v2177_v41 = vadd.f32 1e-05, %v2175_v38 }
 0x9c0   : > { %2815 = vrsqrt.f32 %v2177_v41  ;;  %vm2185_vm12 = vweird.f32 %v2177_v41 }
 0x9c3   : > { %v2174_v42 = vpop.xlane.xlu0 %2173 }
 0x9c4   : > { %v2176_v43 = vmul.f32 %v2174_v42, %v3748_v36  ;;  %v2776_v36 = vld [vmem:[%s1057_s11] ss:$0 sm:$0xff] }
 0x9c6   : > { %v2816_v44 = vpop.eup %2815  ;;  %v2178_v45 = vadd.f32 1e-05, %v2176_v43 }
 0x9c7   : > { %v2180_v46 = vmul.f32 %v2816_v44, %v2177_v41  ;;  %vm2186_vm11 = vweird.f32 %v2816_v44 }
 0x9c8   : > { %2817 = vrsqrt.f32 %v2178_v45  ;;  %vm2187_vm13 = vmor %vm2185_vm12, %vm2186_vm11  ;;  %vm2195_vm8 = vweird.f32 %v2178_v45 }
 0x9c9   : > { %v2181_v47 = vmul.f32 %v2816_v44, %v2180_v46 }
 0x9cb   : > { %v2182_v49 = vmul.f32 0.5, %v2181_v47 }
 0x9cd   : > { %v2183_v50 = vsub.f32 1.5, %v2182_v49 }
 0x9ce   : > { %v2818_v51 = vpop.eup %2817 }
 0x9cf   : > { %v2184_v53 = vmul.f32 %v2816_v44, %v2183_v50  ;;  %v2190_v61 = vmul.f32 %v2818_v51, %v2178_v45  ;;  %vm2196_vm14 = vweird.f32 %v2818_v51 }
 0x9d0   : > { %vm2197_vm7 = vmor %vm2195_vm8, %vm2196_vm14 }
 0x9d1   : > { %v2188_v54 = vsel %vm2187_vm13, %v2816_v44, %v2184_v53  ;;  %v2191_v55 = vmul.f32 %v2818_v51, %v2190_v61 }
 0x9d2   : > { %v2199_v56 = vmul.f32 %v2188_v54, %v2165_v25 }
 0x9d3   : > { %v2192_v57 = vmul.f32 0.5, %v2191_v55 }
 0x9d4   : > { %v2204_v58 = vmul.f32 %v2775_v48, %v2199_v56 }
 0x9d5   : > { %v2193_v59 = vsub.f32 1.5, %v2192_v57 }
 0x9d6   : > { %v2209_v60 = vadd.f32 %v2776_v36, %v2204_v58 }
 0x9d7   : > { %v2194_v40 = vmul.f32 %v2818_v51, %v2193_v59 }
 0x9d8   : > { %2211 = vst.msk [vmem:[#allocation2] sm:$0xff] %vm1431_vm6, %v2209_v60 }
 0x9d9   : > { %v2198_v34 = vsel %vm2197_vm7, %v2818_v51, %v2194_v40 }
 0x9da   : > { %v2200_v33 = vmul.f32 %v2198_v34, %v2166_v37 }
 0x9dc   : > { %v2205_v63 = vmul.f32 %v2775_v48, %v2200_v33  ;;  %2216 = sbr.rel (%p2624_p3) target bundleno = 2531 (0x9e3), region = 164 }
 0x9de   : > { %v2210_v1 = vadd.f32 %v2776_v36, %v2205_v63 }
 0x9e0   : > { %2212 = vst.msk [vmem:[#allocation2 + $0x8] sm:$0xff] %vm1431_vm6, %v2210_v1 }
 0x9e1   : > { %vm2217_vm15 = vcmask 253952  }
 0x9e2   : > { %2218 = vst.msk [vmem:[%s1252_s27] sm:$0x1] %vm2217_vm15, %v2209_v60 }
 0x9e3 PF: > { %s3936_s8 = sld [smem:[#allocation26_spill]] }
 0x9e4   : > { %s3937_s7 = sld [smem:[#allocation22_spill]] }
 0x9e5   : > { %s3938_s4 = sld [smem:[#allocation23_spill]] }
 0x9e6   : > { %s3940_s30 = sld [smem:[#allocation24_spill]] }
 0x9e7   : > { %s3941_s9 = sld [smem:[#allocation25_spill]] }
 0x9e8   : > { %s3942_s5 = sld [smem:[#allocation27_spill]] }
 0x9e9   : > { %s49_s0 = sadd.s32 1, %s3936_s8   ;;  %s3939_s8 = sld [smem:[#allocation29_spill]] }
 0x9ea   : > { %p46_p4 = scmp.ge.s32.totalorder %s49_s0, 6   ;;  %s3943_s28 = sld [smem:[#allocation28_spill]] }
 0x9ec   :  { %48 = sbr.rel (!%p46_p4) target bundleno = 38 (0x26), region = 284 }
 0x9f1   :  { %2236 = vsyncpa [#allocation8], 1 }
 0x9f2   :  { %2238 = vsyncpa [#allocation8 + $0x1], 1 }
 0x9f3   :  { %2239 = vsyncpa [#allocation10], 1 }
 0x9f4   :  { %2241 = vsyncpa [#allocation10 + $0x1], 1 }
 0x9f5   :  { %2242 = vsyncpa [#allocation13], 1 }
 0x9f6   :  { %2244 = vsyncpa [#allocation13 + $0x1], 1 }
 0x9f7   :  { %2245 = vsyncpa [#allocation16], 1 }
 0x9f8   :  { %2247 = vsyncpa [#allocation16 + $0x1], 1 }

</bundles_post_ra>
